<compile_context>
chip_gen: v5e
topology: v5e:2x2
jax: 0.10.0
libtpu: 0.0.40
codegen_flags: <defaults>
</compile_context>

<pallas_src>
import math
import jax
import jax.numpy as jnp
from jax import lax
from jax.experimental import pallas as pl
from jax.experimental.pallas import tpu as pltpu


# ----------------------------------------------------------------------------
# Kernel: prep pass (hoisted work) -> serial recurrence -> vectorized epilogue
# ----------------------------------------------------------------------------
def rits_kernel(m_ref, d_ref, r_ref, st_ref, wrow_ref,
                wgh_ref, bgh_ref, gxd_ref, bgx_ref,
                whcomb_ref, bhist_ref, wfeat_ref, bfeat_ref,
                wc1_ref, wmcomb_ref, bc_ref,
                wih1_ref, blstm_ref,
                loss_ref, imp_ref,
                gh_s, gm_s, al_s, mr_s, om_s, cc_s, err_s):
    f32 = jnp.float32
    T, N, F = r_ref.shape            # N = 3*B rows, component-major
    H = wgh_ref.shape[1]             # rnn_hid_size
    G = 4 * H                        # LSTM gate width
    B = imp_ref.shape[1]

    # Weights stay live across both loops (tiny; VMEM/vreg resident).
    wgh = wgh_ref[...]; bgh = bgh_ref[...]
    gxd = gxd_ref[...]; bgx = bgx_ref[...]
    whcomb = whcomb_ref[...]; bhist = bhist_ref[...]
    wfeat = wfeat_ref[...]; bfeat = bfeat_ref[...]
    wc1 = wc1_ref[...]; wmcomb = wmcomb_ref[...]; bc = bc_ref[...]
    wih1 = wih1_ref[...]; blstm = blstm_ref[...]
    wrow = wrow_ref[...]                                    # (N, 1)

    # ---- Phase 1: hoisted, recurrence-independent pre-pass (off the chain) ---
    def prep(t, carry):
        m_t = m_ref[t]                                      # (N, F)
        d_t = d_ref[t]
        # TemporalDecay (dense -> H, diag -> F)
        gh_s[t] = jnp.exp(-jnp.maximum(
            jnp.dot(d_t, wgh, preferred_element_type=f32) + bgh, 0.0))
        gx_t = jnp.exp(-jnp.maximum(d_t * gxd + bgx, 0.0))
        # fused m @ [Wih2 | Wc2]  (gate block first -> 128-lane aligned split)
        mcat = jnp.dot(m_t, wmcomb, preferred_element_type=f32)       # (N, G+F)
        gm_s[t] = mcat[:, :G]
        al_s[t] = (jnp.dot(gx_t, wc1, preferred_element_type=f32)
                   + mcat[:, G:] + bc)
        mr_s[t] = m_t * r_ref[t]
        om_s[t] = 1.0 - m_t
        return carry

    lax.fori_loop(0, T, prep, 0, unroll=min(T, 8))

    # ---- Phase 2: serial recurrence (3 MXU pushes per step on the chain) -----
    def step(t, carry):
        h_prev, c_prev = carry
        # decayed hidden state (dropout == identity in eval mode)
        h = h_prev * gh_s[t]                                          # (N, H)
        # fused h @ [Whh | Whist]
        hcat = jnp.dot(h, whcomb, preferred_element_type=f32)         # (N, G+F)
        gates_h = hcat[:, :G]
        x_h = hcat[:, G:] + bhist                                     # hist_reg

        mr_t = mr_s[t]
        om_t = om_s[t]
        x_c = mr_t + om_t * x_h
        z_h = jnp.dot(x_c, wfeat, preferred_element_type=f32) + bfeat  # feat_reg
        al_t = al_s[t]
        c_h = al_t * z_h + (1.0 - al_t) * x_h
        c_c = mr_t + om_t * c_h

        # off-chain stashes: raw error tile (loss deferred) + c_c (imputation)
        r_t = r_ref[t]
        err_s[t] = (jnp.abs(r_t - x_h) + jnp.abs(r_t - z_h)
                    + jnp.abs(r_t - c_h))
        cc_s[t] = c_c

        # LSTMCell(inputs=[c_c, m], (h, c)); full-width EUP then slice
        gates = (jnp.dot(c_c, wih1, preferred_element_type=f32)
                 + gates_h + gm_s[t] + blstm)                         # (N, G)
        sg = jax.nn.sigmoid(gates)
        tg = jnp.tanh(gates)
        i_g = sg[:, 0:H]
        f_g = sg[:, H:2 * H]
        g_g = tg[:, 2 * H:3 * H]
        o_g = sg[:, 3 * H:4 * H]
        c_new = f_g * c_prev + i_g * g_g
        h_new = o_g * jnp.tanh(c_new)
        return h_new, c_new

    h0 = jnp.zeros((N, H), f32)
    c0 = jnp.zeros((N, H), f32)
    lax.fori_loop(0, T, step, (h0, c0), unroll=min(T, 8))

    # ---- Phase 3: vectorized epilogue (loss + imputation), one pass over T ---
    m_all = m_ref[...]                                                # (T, N, F)
    wm_all = wrow * m_all                                             # combine(m)
    den = jnp.sum(jnp.sum(wm_all, axis=-1), axis=-1, keepdims=True) + 1e-5
    num = jnp.sum(jnp.sum(wm_all * err_s[...], axis=-1), axis=-1,
                  keepdims=True)                                      # (T, 1)
    loss_ref[...] = jnp.zeros((1, 1), f32) + jnp.sum(num / den)

    # softmax-weighted combine of the 3 seasonal decompositions
    w_all = wrow * (cc_s[...] + st_ref[...])                          # (T, N, F)
    imp_ref[...] = (w_all[:, 0:B] + w_all[:, B:2 * B] + w_all[:, 2 * B:3 * B])


# ----------------------------------------------------------------------------
# Wrapper: layout plumbing + single (gridless) pallas_call, all VMEM-resident
# ----------------------------------------------------------------------------
def _ceil_to(x, m):
    return ((x + m - 1) // m) * m


def _padded_vmem_bytes(shape, itemsize=4):
    lead = 1
    for dim in shape[:-2]:
        lead *= dim
    rows = shape[-2] if len(shape) >= 2 else 1
    cols = shape[-1]
    return lead * _ceil_to(rows, 8) * _ceil_to(cols, 128) * itemsize


def rits_forward(data, params, *, frequencies, wrt):
    B, C, T, F = data.shape
    assert C >= 12
    H = params["wgh"].shape[1]
    N = 3 * B
    G = 4 * H

    masks = data[:, 1]    # (B, T, F)
    deltas = data[:, 2]   # (B, T, F)

    def to_tnf(x3):       # (3, B, T, F) -> (T, 3B, F), component-major rows
        return jnp.transpose(x3, (2, 0, 1, 3)).reshape(T, N, F).astype(jnp.float32)

    def stack3(i0, i1, i2):
        return to_tnf(jnp.stack([data[:, i0], data[:, i1], data[:, i2]], axis=0))

    M = to_tnf(jnp.stack([masks, masks, masks], axis=0))
    D = to_tnf(jnp.stack([deltas, deltas, deltas], axis=0))
    R = stack3(3, 6, 9)                          # remainders
    ST = stack3(4, 7, 10) + stack3(5, 8, 11)     # trend + seasonal (post-loop only)

    # softmax(combine.W) over the 3 components -> per-row weight (k-major)
    w_soft = jax.nn.softmax(params["combine_W"], axis=-1)     # (1, 3)
    wrow = jnp.repeat(w_soft[0], B).reshape(N, 1).astype(jnp.float32)

    # fuse shared-LHS matmul weights (gate block first -> 128-lane-aligned slice)
    w_hcomb = jnp.concatenate([params["whh"], params["whist"]], axis=1)   # (H, 4H+F)
    w_mcomb = jnp.concatenate([params["wih2"], params["wc2"]], axis=1)    # (F, 4H+F)

    in_arrays = (M, D, R, ST, wrow,
                 params["wgh"], params["bgh"], params["gxd"], params["bgx"],
                 w_hcomb, params["bhist"], params["wfeat"], params["bfeat"],
                 params["wc1"], w_mcomb, params["bc"],
                 params["wih1"], params["blstm"])

    scratch_dims = [(T, N, H),   # gamma_h
                    (T, N, G),   # m @ Wih2 (LSTM mask-path gates)
                    (T, N, F),   # alpha
                    (T, N, F),   # m * r
                    (T, N, F),   # 1 - m
                    (T, N, F),   # c_c stash
                    (T, N, F)]   # |err| stash
    scratch_shapes = [pltpu.VMEM(s, jnp.float32) for s in scratch_dims]

    out_dims = [(1, 1), (T, B, F)]
    out_shape = tuple(jax.ShapeDtypeStruct(s, jnp.float32) for s in out_dims)

    # VMEM re-budget (gridless => everything single-buffered & resident).
    # v7x has only 64 MiB/core; keep 2x headroom under a 32 MiB scoped limit.
    vmem_limit = 32 * 1024 * 1024
    est = (sum(_padded_vmem_bytes(a.shape) for a in in_arrays)
           + sum(_padded_vmem_bytes(s) for s in out_dims)
           + sum(_padded_vmem_bytes(s) for s in scratch_dims))
    if 2 * est > vmem_limit:
        raise ValueError(
            f"rits_forward: gridless kernel needs ~{est} VMEM bytes; add a "
            "time-chunk grid (stream (Tc,N,*) blocks) for this problem size.")

    loss_part, imps = pl.pallas_call(
        rits_kernel,
        out_shape=out_shape,
        scratch_shapes=scratch_shapes,
        compiler_params=pltpu.CompilerParams(vmem_limit_bytes=vmem_limit),
    )(*in_arrays)

    # per-step constant regulariser (added T times in the torch loop)
    inv_freq = jnp.array([1.0 / f for f in frequencies], jnp.float32)
    reg = wrt * jnp.sum(w_soft[0] * inv_freq)
    loss = loss_part[0, 0] + T * reg

    imputations = jnp.transpose(imps, (1, 0, 2))   # (B, T, F), matches torch
    return loss, imputations


# ----------------------------------------------------------------------------
# Deterministic parameter initialisation (shapes from the torch module)
# ----------------------------------------------------------------------------
def init_params(key, F, H):
    ks = jax.random.split(key, 16)

    def u(k, shape, s):
        return jax.random.uniform(k, shape, jnp.float32, -s, s)

    sH = 1.0 / math.sqrt(H)
    sF = 1.0 / math.sqrt(F)
    s2F = 1.0 / math.sqrt(2 * F)

    # TemporalDecay(F -> H, diag=False)
    W_tdh = u(ks[0], (H, F), sH)
    b_tdh = u(ks[1], (H,), sH)
    # TemporalDecay(F -> F, diag=True)
    W_tdx = u(ks[2], (F, F), sF)
    b_tdx = u(ks[3], (F,), sF)
    # hist_reg: Linear(H, F)
    W_hist = u(ks[4], (F, H), sH)
    b_hist = u(ks[5], (F,), sH)
    # feat_reg: FeatureRegression(F)
    W_feat = u(ks[6], (F, F), sF)
    b_feat = u(ks[7], (F,), sF)
    # weight_combine: Linear(2F, F)
    W_wc = u(ks[8], (F, 2 * F), s2F)
    b_wc = u(ks[9], (F,), s2F)
    # LSTMCell(2F, H)
    W_ih = u(ks[10], (4 * H, 2 * F), sH)
    W_hh = u(ks[11], (4 * H, H), sH)
    b_ih = u(ks[12], (4 * H,), sH)
    b_hh = u(ks[13], (4 * H,), sH)
    # weight_sumone_linear(3, 1)
    combine_W = u(ks[14], (1, 3), 1.0)

    eye = jnp.eye(F, dtype=jnp.float32)
    return dict(
        wgh=W_tdh.T, bgh=b_tdh.reshape(1, H),
        gxd=jnp.diag(W_tdx).reshape(1, F), bgx=b_tdx.reshape(1, F),
        whist=W_hist.T, bhist=b_hist.reshape(1, F),
        wfeat=(W_feat * (1.0 - eye)).T, bfeat=b_feat.reshape(1, F),
        wc1=W_wc[:, :F].T, wc2=W_wc[:, F:].T, bc=b_wc.reshape(1, F),
        wih1=W_ih[:, :F].T, wih2=W_ih[:, F:].T, whh=W_hh.T,
        blstm=(b_ih + b_hh).reshape(1, 4 * H),
        combine_W=combine_W,
    )


# ----------------------------------------------------------------------------
if __name__ == "__main__":
    B, T, F, H = 2, 8, 8, 32          # batch, seq len, num_features, rnn_hid_size
    key = jax.random.PRNGKey(0)
    kd, km, kdel, kp = jax.random.split(key, 4)

    # data layout matches the torch module: (B, 24, T, F); forward pass uses 0..11
    data = 0.5 * jax.random.normal(kd, (B, 24, T, F), jnp.float32)
    masks = (jax.random.uniform(km, (B, T, F)) > 0.3).astype(jnp.float32)
    deltas = jnp.abs(jax.random.normal(kdel, (B, T, F), jnp.float32)) + 0.1
    data = data.at[:, 1].set(masks).at[:, 2].set(deltas)

    params = init_params(kp, F, H)

    loss, imputations = rits_forward(
        data, params, frequencies=(24.0, 168.0, 720.0), wrt=1.0)
    loss = jax.block_until_ready(loss)
    imputations = jax.block_until_ready(imputations)

    assert imputations.shape == (B, T, F)
    assert bool(jnp.isfinite(loss)) and bool(jnp.all(jnp.isfinite(imputations)))
    print("KERNEL_OK")
</pallas_src>

<mosaic_0001>
module attributes {stable_mosaic.version = 11 : i64} {
  func.func @rits_kernel(%arg0: memref<8x6x8xf32, #tpu.memory_space<vmem>>, %arg1: memref<8x6x8xf32, #tpu.memory_space<vmem>>, %arg2: memref<8x6x8xf32, #tpu.memory_space<vmem>>, %arg3: memref<8x6x8xf32, #tpu.memory_space<vmem>>, %arg4: memref<6x1xf32, #tpu.memory_space<vmem>>, %arg5: memref<8x32xf32, #tpu.memory_space<vmem>>, %arg6: memref<1x32xf32, #tpu.memory_space<vmem>>, %arg7: memref<1x8xf32, #tpu.memory_space<vmem>>, %arg8: memref<1x8xf32, #tpu.memory_space<vmem>>, %arg9: memref<32x136xf32, #tpu.memory_space<vmem>>, %arg10: memref<1x8xf32, #tpu.memory_space<vmem>>, %arg11: memref<8x8xf32, #tpu.memory_space<vmem>>, %arg12: memref<1x8xf32, #tpu.memory_space<vmem>>, %arg13: memref<8x8xf32, #tpu.memory_space<vmem>>, %arg14: memref<8x136xf32, #tpu.memory_space<vmem>>, %arg15: memref<1x8xf32, #tpu.memory_space<vmem>>, %arg16: memref<8x128xf32, #tpu.memory_space<vmem>>, %arg17: memref<1x128xf32, #tpu.memory_space<vmem>>, %arg18: memref<1x1xf32, #tpu.memory_space<vmem>>, %arg19: memref<8x2x8xf32, #tpu.memory_space<vmem>>, %arg20: memref<8x6x32xf32, #tpu.memory_space<vmem>>, %arg21: memref<8x6x128xf32, #tpu.memory_space<vmem>>, %arg22: memref<8x6x8xf32, #tpu.memory_space<vmem>>, %arg23: memref<8x6x8xf32, #tpu.memory_space<vmem>>, %arg24: memref<8x6x8xf32, #tpu.memory_space<vmem>>, %arg25: memref<8x6x8xf32, #tpu.memory_space<vmem>>, %arg26: memref<8x6x8xf32, #tpu.memory_space<vmem>>) attributes {dimension_semantics = [], scalar_prefetch = 0 : i64, scratch_operands = 7 : i64, tpu.core_type = #tpu.core_type<tc>} {
    %c0 = arith.constant 0 : index
    %c0_0 = arith.constant 0 : index
    %0 = vector.load %arg5[%c0, %c0_0] : memref<8x32xf32, #tpu.memory_space<vmem>>, vector<8x32xf32>
    %c0_1 = arith.constant 0 : index
    %c0_2 = arith.constant 0 : index
    %1 = vector.load %arg6[%c0_1, %c0_2] : memref<1x32xf32, #tpu.memory_space<vmem>>, vector<1x32xf32>
    %c0_3 = arith.constant 0 : index
    %c0_4 = arith.constant 0 : index
    %2 = vector.load %arg7[%c0_3, %c0_4] : memref<1x8xf32, #tpu.memory_space<vmem>>, vector<1x8xf32>
    %c0_5 = arith.constant 0 : index
    %c0_6 = arith.constant 0 : index
    %3 = vector.load %arg8[%c0_5, %c0_6] : memref<1x8xf32, #tpu.memory_space<vmem>>, vector<1x8xf32>
    %c0_7 = arith.constant 0 : index
    %c0_8 = arith.constant 0 : index
    %4 = vector.load %arg9[%c0_7, %c0_8] : memref<32x136xf32, #tpu.memory_space<vmem>>, vector<32x136xf32>
    %c0_9 = arith.constant 0 : index
    %c0_10 = arith.constant 0 : index
    %5 = vector.load %arg10[%c0_9, %c0_10] : memref<1x8xf32, #tpu.memory_space<vmem>>, vector<1x8xf32>
    %c0_11 = arith.constant 0 : index
    %c0_12 = arith.constant 0 : index
    %6 = vector.load %arg11[%c0_11, %c0_12] : memref<8x8xf32, #tpu.memory_space<vmem>>, vector<8x8xf32>
    %c0_13 = arith.constant 0 : index
    %c0_14 = arith.constant 0 : index
    %7 = vector.load %arg12[%c0_13, %c0_14] : memref<1x8xf32, #tpu.memory_space<vmem>>, vector<1x8xf32>
    %c0_15 = arith.constant 0 : index
    %c0_16 = arith.constant 0 : index
    %8 = vector.load %arg13[%c0_15, %c0_16] : memref<8x8xf32, #tpu.memory_space<vmem>>, vector<8x8xf32>
    %c0_17 = arith.constant 0 : index
    %c0_18 = arith.constant 0 : index
    %9 = vector.load %arg14[%c0_17, %c0_18] : memref<8x136xf32, #tpu.memory_space<vmem>>, vector<8x136xf32>
    %c0_19 = arith.constant 0 : index
    %c0_20 = arith.constant 0 : index
    %10 = vector.load %arg15[%c0_19, %c0_20] : memref<1x8xf32, #tpu.memory_space<vmem>>, vector<1x8xf32>
    %c0_21 = arith.constant 0 : index
    %c0_22 = arith.constant 0 : index
    %11 = vector.load %arg16[%c0_21, %c0_22] : memref<8x128xf32, #tpu.memory_space<vmem>>, vector<8x128xf32>
    %c0_23 = arith.constant 0 : index
    %c0_24 = arith.constant 0 : index
    %12 = vector.load %arg17[%c0_23, %c0_24] : memref<1x128xf32, #tpu.memory_space<vmem>>, vector<1x128xf32>
    %c0_25 = arith.constant 0 : index
    %c0_26 = arith.constant 0 : index
    %13 = vector.load %arg4[%c0_25, %c0_26] : memref<6x1xf32, #tpu.memory_space<vmem>>, vector<6x1xf32>
    %c0_i32 = arith.constant 0 : i32
    %14 = arith.index_cast %c0_i32 : i32 to index
    %c0_27 = arith.constant 0 : index
    %c0_28 = arith.constant 0 : index
    %15 = vector.load %arg0[%14, %c0_27, %c0_28] : memref<8x6x8xf32, #tpu.memory_space<vmem>>, vector<1x6x8xf32>
    %16 = vector.shape_cast %15 : vector<1x6x8xf32> to vector<6x8xf32>
    %17 = arith.index_cast %c0_i32 : i32 to index
    %c0_29 = arith.constant 0 : index
    %c0_30 = arith.constant 0 : index
    %18 = vector.load %arg1[%17, %c0_29, %c0_30] : memref<8x6x8xf32, #tpu.memory_space<vmem>>, vector<1x6x8xf32>
    %19 = vector.shape_cast %18 : vector<1x6x8xf32> to vector<6x8xf32>
    %cst = arith.constant dense<0.000000e+00> : vector<6x32xf32>
    %20 = tpu.matmul %19, %0, %cst {dimension_numbers = #tpu.dot_dimension_numbers<[1], [0], [0], [1], [0, 0, 1, 1], [], []>} : vector<6x8xf32>, vector<8x32xf32>, vector<6x32xf32> -> vector<6x32xf32>
    %21 = vector.broadcast %1 : vector<1x32xf32> to vector<6x32xf32>
    %22 = arith.addf %20, %21 : vector<6x32xf32>
    %cst_31 = arith.constant 0.000000e+00 : f32
    %23 = vector.broadcast %cst_31 : f32 to vector<6x32xf32>
    %24 = arith.maximumf %22, %23 : vector<6x32xf32>
    %cst_32 = arith.constant 0.000000e+00 : f32
    %25 = vector.broadcast %cst_32 : f32 to vector<6x32xf32>
    %26 = arith.subf %25, %24 : vector<6x32xf32>
    %27 = math.exp %26 : vector<6x32xf32>
    %28 = arith.index_cast %c0_i32 : i32 to index
    %c0_33 = arith.constant 0 : index
    %c0_34 = arith.constant 0 : index
    %29 = vector.load %arg20[%28, %c0_33, %c0_34] : memref<8x6x32xf32, #tpu.memory_space<vmem>>, vector<1x6x32xf32>
    %30 = vector.shape_cast %29 : vector<1x6x32xf32> to vector<6x32xf32>
    %31 = vector.shape_cast %27 : vector<6x32xf32> to vector<1x6x32xf32>
    tpu.vector_store %arg20[%28, %c0_33, %c0_34], %31 {strides = array<i32>} : memref<8x6x32xf32, #tpu.memory_space<vmem>>, vector<1x6x32xf32>,
    %32 = vector.broadcast %2 : vector<1x8xf32> to vector<6x8xf32>
    %33 = arith.mulf %19, %32 : vector<6x8xf32>
    %34 = vector.broadcast %3 : vector<1x8xf32> to vector<6x8xf32>
    %35 = arith.addf %33, %34 : vector<6x8xf32>
    %cst_35 = arith.constant 0.000000e+00 : f32
    %36 = vector.broadcast %cst_35 : f32 to vector<6x8xf32>
    %37 = arith.maximumf %35, %36 : vector<6x8xf32>
    %cst_36 = arith.constant 0.000000e+00 : f32
    %38 = vector.broadcast %cst_36 : f32 to vector<6x8xf32>
    %39 = arith.subf %38, %37 : vector<6x8xf32>
    %40 = math.exp %39 : vector<6x8xf32>
    %cst_37 = arith.constant dense<0.000000e+00> : vector<6x136xf32>
    %41 = tpu.matmul %16, %9, %cst_37 {dimension_numbers = #tpu.dot_dimension_numbers<[1], [0], [0], [1], [0, 0, 1, 1], [], []>} : vector<6x8xf32>, vector<8x136xf32>, vector<6x136xf32> -> vector<6x136xf32>
    %42 = vector.extract_strided_slice %41 {offsets = [0, 0], sizes = [6, 128], strides = [1, 1]} : vector<6x136xf32> to vector<6x128xf32>
    %43 = arith.index_cast %c0_i32 : i32 to index
    %c0_38 = arith.constant 0 : index
    %c0_39 = arith.constant 0 : index
    %44 = vector.load %arg21[%43, %c0_38, %c0_39] : memref<8x6x128xf32, #tpu.memory_space<vmem>>, vector<1x6x128xf32>
    %45 = vector.shape_cast %44 : vector<1x6x128xf32> to vector<6x128xf32>
    %46 = vector.shape_cast %42 : vector<6x128xf32> to vector<1x6x128xf32>
    tpu.vector_store %arg21[%43, %c0_38, %c0_39], %46 {strides = array<i32>} : memref<8x6x128xf32, #tpu.memory_space<vmem>>, vector<1x6x128xf32>,
    %cst_40 = arith.constant dense<0.000000e+00> : vector<6x8xf32>
    %47 = tpu.matmul %40, %8, %cst_40 {dimension_numbers = #tpu.dot_dimension_numbers<[1], [0], [0], [1], [0, 0, 1, 1], [], []>} : vector<6x8xf32>, vector<8x8xf32>, vector<6x8xf32> -> vector<6x8xf32>
    %48 = vector.extract_strided_slice %41 {offsets = [0, 128], sizes = [6, 8], strides = [1, 1]} : vector<6x136xf32> to vector<6x8xf32>
    %49 = arith.addf %47, %48 : vector<6x8xf32>
    %50 = vector.broadcast %10 : vector<1x8xf32> to vector<6x8xf32>
    %51 = arith.addf %49, %50 : vector<6x8xf32>
    %52 = arith.index_cast %c0_i32 : i32 to index
    %c0_41 = arith.constant 0 : index
    %c0_42 = arith.constant 0 : index
    %53 = vector.load %arg22[%52, %c0_41, %c0_42] : memref<8x6x8xf32, #tpu.memory_space<vmem>>, vector<1x6x8xf32>
    %54 = vector.shape_cast %53 : vector<1x6x8xf32> to vector<6x8xf32>
    %55 = vector.shape_cast %51 : vector<6x8xf32> to vector<1x6x8xf32>
    tpu.vector_store %arg22[%52, %c0_41, %c0_42], %55 {strides = array<i32>} : memref<8x6x8xf32, #tpu.memory_space<vmem>>, vector<1x6x8xf32>,
    %56 = arith.index_cast %c0_i32 : i32 to index
    %c0_43 = arith.constant 0 : index
    %c0_44 = arith.constant 0 : index
    %57 = vector.load %arg2[%56, %c0_43, %c0_44] : memref<8x6x8xf32, #tpu.memory_space<vmem>>, vector<1x6x8xf32>
    %58 = vector.shape_cast %57 : vector<1x6x8xf32> to vector<6x8xf32>
    %59 = arith.mulf %16, %58 : vector<6x8xf32>
    %60 = arith.index_cast %c0_i32 : i32 to index
    %c0_45 = arith.constant 0 : index
    %c0_46 = arith.constant 0 : index
    %61 = vector.load %arg23[%60, %c0_45, %c0_46] : memref<8x6x8xf32, #tpu.memory_space<vmem>>, vector<1x6x8xf32>
    %62 = vector.shape_cast %61 : vector<1x6x8xf32> to vector<6x8xf32>
    %63 = vector.shape_cast %59 : vector<6x8xf32> to vector<1x6x8xf32>
    tpu.vector_store %arg23[%60, %c0_45, %c0_46], %63 {strides = array<i32>} : memref<8x6x8xf32, #tpu.memory_space<vmem>>, vector<1x6x8xf32>,
    %cst_47 = arith.constant 1.000000e+00 : f32
    %64 = vector.broadcast %cst_47 : f32 to vector<6x8xf32>
    %65 = arith.subf %64, %16 : vector<6x8xf32>
    %66 = arith.index_cast %c0_i32 : i32 to index
    %c0_48 = arith.constant 0 : index
    %c0_49 = arith.constant 0 : index
    %67 = vector.load %arg24[%66, %c0_48, %c0_49] : memref<8x6x8xf32, #tpu.memory_space<vmem>>, vector<1x6x8xf32>
    %68 = vector.shape_cast %67 : vector<1x6x8xf32> to vector<6x8xf32>
    %69 = vector.shape_cast %65 : vector<6x8xf32> to vector<1x6x8xf32>
    tpu.vector_store %arg24[%66, %c0_48, %c0_49], %69 {strides = array<i32>} : memref<8x6x8xf32, #tpu.memory_space<vmem>>, vector<1x6x8xf32>,
    %c1_i32 = arith.constant 1 : i32
    %70 = arith.index_cast %c1_i32 : i32 to index
    %c0_50 = arith.constant 0 : index
    %c0_51 = arith.constant 0 : index
    %71 = vector.load %arg0[%70, %c0_50, %c0_51] : memref<8x6x8xf32, #tpu.memory_space<vmem>>, vector<1x6x8xf32>
    %72 = vector.shape_cast %71 : vector<1x6x8xf32> to vector<6x8xf32>
    %73 = arith.index_cast %c1_i32 : i32 to index
    %c0_52 = arith.constant 0 : index
    %c0_53 = arith.constant 0 : index
    %74 = vector.load %arg1[%73, %c0_52, %c0_53] : memref<8x6x8xf32, #tpu.memory_space<vmem>>, vector<1x6x8xf32>
    %75 = vector.shape_cast %74 : vector<1x6x8xf32> to vector<6x8xf32>
    %cst_54 = arith.constant dense<0.000000e+00> : vector<6x32xf32>
    %76 = tpu.matmul %75, %0, %cst_54 {dimension_numbers = #tpu.dot_dimension_numbers<[1], [0], [0], [1], [0, 0, 1, 1], [], []>} : vector<6x8xf32>, vector<8x32xf32>, vector<6x32xf32> -> vector<6x32xf32>
    %77 = vector.broadcast %1 : vector<1x32xf32> to vector<6x32xf32>
    %78 = arith.addf %76, %77 : vector<6x32xf32>
    %cst_55 = arith.constant 0.000000e+00 : f32
    %79 = vector.broadcast %cst_55 : f32 to vector<6x32xf32>
    %80 = arith.maximumf %78, %79 : vector<6x32xf32>
    %cst_56 = arith.constant 0.000000e+00 : f32
    %81 = vector.broadcast %cst_56 : f32 to vector<6x32xf32>
    %82 = arith.subf %81, %80 : vector<6x32xf32>
    %83 = math.exp %82 : vector<6x32xf32>
    %84 = arith.index_cast %c1_i32 : i32 to index
    %c0_57 = arith.constant 0 : index
    %c0_58 = arith.constant 0 : index
    %85 = vector.load %arg20[%84, %c0_57, %c0_58] : memref<8x6x32xf32, #tpu.memory_space<vmem>>, vector<1x6x32xf32>
    %86 = vector.shape_cast %85 : vector<1x6x32xf32> to vector<6x32xf32>
    %87 = vector.shape_cast %83 : vector<6x32xf32> to vector<1x6x32xf32>
    tpu.vector_store %arg20[%84, %c0_57, %c0_58], %87 {strides = array<i32>} : memref<8x6x32xf32, #tpu.memory_space<vmem>>, vector<1x6x32xf32>,
    %88 = vector.broadcast %2 : vector<1x8xf32> to vector<6x8xf32>
    %89 = arith.mulf %75, %88 : vector<6x8xf32>
    %90 = vector.broadcast %3 : vector<1x8xf32> to vector<6x8xf32>
    %91 = arith.addf %89, %90 : vector<6x8xf32>
    %cst_59 = arith.constant 0.000000e+00 : f32
    %92 = vector.broadcast %cst_59 : f32 to vector<6x8xf32>
    %93 = arith.maximumf %91, %92 : vector<6x8xf32>
    %cst_60 = arith.constant 0.000000e+00 : f32
    %94 = vector.broadcast %cst_60 : f32 to vector<6x8xf32>
    %95 = arith.subf %94, %93 : vector<6x8xf32>
    %96 = math.exp %95 : vector<6x8xf32>
    %cst_61 = arith.constant dense<0.000000e+00> : vector<6x136xf32>
    %97 = tpu.matmul %72, %9, %cst_61 {dimension_numbers = #tpu.dot_dimension_numbers<[1], [0], [0], [1], [0, 0, 1, 1], [], []>} : vector<6x8xf32>, vector<8x136xf32>, vector<6x136xf32> -> vector<6x136xf32>
    %98 = vector.extract_strided_slice %97 {offsets = [0, 0], sizes = [6, 128], strides = [1, 1]} : vector<6x136xf32> to vector<6x128xf32>
    %99 = arith.index_cast %c1_i32 : i32 to index
    %c0_62 = arith.constant 0 : index
    %c0_63 = arith.constant 0 : index
    %100 = vector.load %arg21[%99, %c0_62, %c0_63] : memref<8x6x128xf32, #tpu.memory_space<vmem>>, vector<1x6x128xf32>
    %101 = vector.shape_cast %100 : vector<1x6x128xf32> to vector<6x128xf32>
    %102 = vector.shape_cast %98 : vector<6x128xf32> to vector<1x6x128xf32>
    tpu.vector_store %arg21[%99, %c0_62, %c0_63], %102 {strides = array<i32>} : memref<8x6x128xf32, #tpu.memory_space<vmem>>, vector<1x6x128xf32>,
    %cst_64 = arith.constant dense<0.000000e+00> : vector<6x8xf32>
    %103 = tpu.matmul %96, %8, %cst_64 {dimension_numbers = #tpu.dot_dimension_numbers<[1], [0], [0], [1], [0, 0, 1, 1], [], []>} : vector<6x8xf32>, vector<8x8xf32>, vector<6x8xf32> -> vector<6x8xf32>
    %104 = vector.extract_strided_slice %97 {offsets = [0, 128], sizes = [6, 8], strides = [1, 1]} : vector<6x136xf32> to vector<6x8xf32>
    %105 = arith.addf %103, %104 : vector<6x8xf32>
    %106 = vector.broadcast %10 : vector<1x8xf32> to vector<6x8xf32>
    %107 = arith.addf %105, %106 : vector<6x8xf32>
    %108 = arith.index_cast %c1_i32 : i32 to index
    %c0_65 = arith.constant 0 : index
    %c0_66 = arith.constant 0 : index
    %109 = vector.load %arg22[%108, %c0_65, %c0_66] : memref<8x6x8xf32, #tpu.memory_space<vmem>>, vector<1x6x8xf32>
    %110 = vector.shape_cast %109 : vector<1x6x8xf32> to vector<6x8xf32>
    %111 = vector.shape_cast %107 : vector<6x8xf32> to vector<1x6x8xf32>
    tpu.vector_store %arg22[%108, %c0_65, %c0_66], %111 {strides = array<i32>} : memref<8x6x8xf32, #tpu.memory_space<vmem>>, vector<1x6x8xf32>,
    %112 = arith.index_cast %c1_i32 : i32 to index
    %c0_67 = arith.constant 0 : index
    %c0_68 = arith.constant 0 : index
    %113 = vector.load %arg2[%112, %c0_67, %c0_68] : memref<8x6x8xf32, #tpu.memory_space<vmem>>, vector<1x6x8xf32>
    %114 = vector.shape_cast %113 : vector<1x6x8xf32> to vector<6x8xf32>
    %115 = arith.mulf %72, %114 : vector<6x8xf32>
    %116 = arith.index_cast %c1_i32 : i32 to index
    %c0_69 = arith.constant 0 : index
    %c0_70 = arith.constant 0 : index
    %117 = vector.load %arg23[%116, %c0_69, %c0_70] : memref<8x6x8xf32, #tpu.memory_space<vmem>>, vector<1x6x8xf32>
    %118 = vector.shape_cast %117 : vector<1x6x8xf32> to vector<6x8xf32>
    %119 = vector.shape_cast %115 : vector<6x8xf32> to vector<1x6x8xf32>
    tpu.vector_store %arg23[%116, %c0_69, %c0_70], %119 {strides = array<i32>} : memref<8x6x8xf32, #tpu.memory_space<vmem>>, vector<1x6x8xf32>,
    %cst_71 = arith.constant 1.000000e+00 : f32
    %120 = vector.broadcast %cst_71 : f32 to vector<6x8xf32>
    %121 = arith.subf %120, %72 : vector<6x8xf32>
    %122 = arith.index_cast %c1_i32 : i32 to index
    %c0_72 = arith.constant 0 : index
    %c0_73 = arith.constant 0 : index
    %123 = vector.load %arg24[%122, %c0_72, %c0_73] : memref<8x6x8xf32, #tpu.memory_space<vmem>>, vector<1x6x8xf32>
    %124 = vector.shape_cast %123 : vector<1x6x8xf32> to vector<6x8xf32>
    %125 = vector.shape_cast %121 : vector<6x8xf32> to vector<1x6x8xf32>
    tpu.vector_store %arg24[%122, %c0_72, %c0_73], %125 {strides = array<i32>} : memref<8x6x8xf32, #tpu.memory_space<vmem>>, vector<1x6x8xf32>,
    %c2_i32 = arith.constant 2 : i32
    %126 = arith.index_cast %c2_i32 : i32 to index
    %c0_74 = arith.constant 0 : index
    %c0_75 = arith.constant 0 : index
    %127 = vector.load %arg0[%126, %c0_74, %c0_75] : memref<8x6x8xf32, #tpu.memory_space<vmem>>, vector<1x6x8xf32>
    %128 = vector.shape_cast %127 : vector<1x6x8xf32> to vector<6x8xf32>
    %129 = arith.index_cast %c2_i32 : i32 to index
    %c0_76 = arith.constant 0 : index
    %c0_77 = arith.constant 0 : index
    %130 = vector.load %arg1[%129, %c0_76, %c0_77] : memref<8x6x8xf32, #tpu.memory_space<vmem>>, vector<1x6x8xf32>
    %131 = vector.shape_cast %130 : vector<1x6x8xf32> to vector<6x8xf32>
    %cst_78 = arith.constant dense<0.000000e+00> : vector<6x32xf32>
    %132 = tpu.matmul %131, %0, %cst_78 {dimension_numbers = #tpu.dot_dimension_numbers<[1], [0], [0], [1], [0, 0, 1, 1], [], []>} : vector<6x8xf32>, vector<8x32xf32>, vector<6x32xf32> -> vector<6x32xf32>
    %133 = vector.broadcast %1 : vector<1x32xf32> to vector<6x32xf32>
    %134 = arith.addf %132, %133 : vector<6x32xf32>
    %cst_79 = arith.constant 0.000000e+00 : f32
    %135 = vector.broadcast %cst_79 : f32 to vector<6x32xf32>
    %136 = arith.maximumf %134, %135 : vector<6x32xf32>
    %cst_80 = arith.constant 0.000000e+00 : f32
    %137 = vector.broadcast %cst_80 : f32 to vector<6x32xf32>
    %138 = arith.subf %137, %136 : vector<6x32xf32>
    %139 = math.exp %138 : vector<6x32xf32>
    %140 = arith.index_cast %c2_i32 : i32 to index
    %c0_81 = arith.constant 0 : index
    %c0_82 = arith.constant 0 : index
    %141 = vector.load %arg20[%140, %c0_81, %c0_82] : memref<8x6x32xf32, #tpu.memory_space<vmem>>, vector<1x6x32xf32>
    %142 = vector.shape_cast %141 : vector<1x6x32xf32> to vector<6x32xf32>
    %143 = vector.shape_cast %139 : vector<6x32xf32> to vector<1x6x32xf32>
    tpu.vector_store %arg20[%140, %c0_81, %c0_82], %143 {strides = array<i32>} : memref<8x6x32xf32, #tpu.memory_space<vmem>>, vector<1x6x32xf32>,
    %144 = vector.broadcast %2 : vector<1x8xf32> to vector<6x8xf32>
    %145 = arith.mulf %131, %144 : vector<6x8xf32>
    %146 = vector.broadcast %3 : vector<1x8xf32> to vector<6x8xf32>
    %147 = arith.addf %145, %146 : vector<6x8xf32>
    %cst_83 = arith.constant 0.000000e+00 : f32
    %148 = vector.broadcast %cst_83 : f32 to vector<6x8xf32>
    %149 = arith.maximumf %147, %148 : vector<6x8xf32>
    %cst_84 = arith.constant 0.000000e+00 : f32
    %150 = vector.broadcast %cst_84 : f32 to vector<6x8xf32>
    %151 = arith.subf %150, %149 : vector<6x8xf32>
    %152 = math.exp %151 : vector<6x8xf32>
    %cst_85 = arith.constant dense<0.000000e+00> : vector<6x136xf32>
    %153 = tpu.matmul %128, %9, %cst_85 {dimension_numbers = #tpu.dot_dimension_numbers<[1], [0], [0], [1], [0, 0, 1, 1], [], []>} : vector<6x8xf32>, vector<8x136xf32>, vector<6x136xf32> -> vector<6x136xf32>
    %154 = vector.extract_strided_slice %153 {offsets = [0, 0], sizes = [6, 128], strides = [1, 1]} : vector<6x136xf32> to vector<6x128xf32>
    %155 = arith.index_cast %c2_i32 : i32 to index
    %c0_86 = arith.constant 0 : index
    %c0_87 = arith.constant 0 : index
    %156 = vector.load %arg21[%155, %c0_86, %c0_87] : memref<8x6x128xf32, #tpu.memory_space<vmem>>, vector<1x6x128xf32>
    %157 = vector.shape_cast %156 : vector<1x6x128xf32> to vector<6x128xf32>
    %158 = vector.shape_cast %154 : vector<6x128xf32> to vector<1x6x128xf32>
    tpu.vector_store %arg21[%155, %c0_86, %c0_87], %158 {strides = array<i32>} : memref<8x6x128xf32, #tpu.memory_space<vmem>>, vector<1x6x128xf32>,
    %cst_88 = arith.constant dense<0.000000e+00> : vector<6x8xf32>
    %159 = tpu.matmul %152, %8, %cst_88 {dimension_numbers = #tpu.dot_dimension_numbers<[1], [0], [0], [1], [0, 0, 1, 1], [], []>} : vector<6x8xf32>, vector<8x8xf32>, vector<6x8xf32> -> vector<6x8xf32>
    %160 = vector.extract_strided_slice %153 {offsets = [0, 128], sizes = [6, 8], strides = [1, 1]} : vector<6x136xf32> to vector<6x8xf32>
    %161 = arith.addf %159, %160 : vector<6x8xf32>
    %162 = vector.broadcast %10 : vector<1x8xf32> to vector<6x8xf32>
    %163 = arith.addf %161, %162 : vector<6x8xf32>
    %164 = arith.index_cast %c2_i32 : i32 to index
    %c0_89 = arith.constant 0 : index
    %c0_90 = arith.constant 0 : index
    %165 = vector.load %arg22[%164, %c0_89, %c0_90] : memref<8x6x8xf32, #tpu.memory_space<vmem>>, vector<1x6x8xf32>
    %166 = vector.shape_cast %165 : vector<1x6x8xf32> to vector<6x8xf32>
    %167 = vector.shape_cast %163 : vector<6x8xf32> to vector<1x6x8xf32>
    tpu.vector_store %arg22[%164, %c0_89, %c0_90], %167 {strides = array<i32>} : memref<8x6x8xf32, #tpu.memory_space<vmem>>, vector<1x6x8xf32>,
    %168 = arith.index_cast %c2_i32 : i32 to index
    %c0_91 = arith.constant 0 : index
    %c0_92 = arith.constant 0 : index
    %169 = vector.load %arg2[%168, %c0_91, %c0_92] : memref<8x6x8xf32, #tpu.memory_space<vmem>>, vector<1x6x8xf32>
    %170 = vector.shape_cast %169 : vector<1x6x8xf32> to vector<6x8xf32>
    %171 = arith.mulf %128, %170 : vector<6x8xf32>
    %172 = arith.index_cast %c2_i32 : i32 to index
    %c0_93 = arith.constant 0 : index
    %c0_94 = arith.constant 0 : index
    %173 = vector.load %arg23[%172, %c0_93, %c0_94] : memref<8x6x8xf32, #tpu.memory_space<vmem>>, vector<1x6x8xf32>
    %174 = vector.shape_cast %173 : vector<1x6x8xf32> to vector<6x8xf32>
    %175 = vector.shape_cast %171 : vector<6x8xf32> to vector<1x6x8xf32>
    tpu.vector_store %arg23[%172, %c0_93, %c0_94], %175 {strides = array<i32>} : memref<8x6x8xf32, #tpu.memory_space<vmem>>, vector<1x6x8xf32>,
    %cst_95 = arith.constant 1.000000e+00 : f32
    %176 = vector.broadcast %cst_95 : f32 to vector<6x8xf32>
    %177 = arith.subf %176, %128 : vector<6x8xf32>
    %178 = arith.index_cast %c2_i32 : i32 to index
    %c0_96 = arith.constant 0 : index
    %c0_97 = arith.constant 0 : index
    %179 = vector.load %arg24[%178, %c0_96, %c0_97] : memref<8x6x8xf32, #tpu.memory_space<vmem>>, vector<1x6x8xf32>
    %180 = vector.shape_cast %179 : vector<1x6x8xf32> to vector<6x8xf32>
    %181 = vector.shape_cast %177 : vector<6x8xf32> to vector<1x6x8xf32>
    tpu.vector_store %arg24[%178, %c0_96, %c0_97], %181 {strides = array<i32>} : memref<8x6x8xf32, #tpu.memory_space<vmem>>, vector<1x6x8xf32>,
    %c3_i32 = arith.constant 3 : i32
    %182 = arith.index_cast %c3_i32 : i32 to index
    %c0_98 = arith.constant 0 : index
    %c0_99 = arith.constant 0 : index
    %183 = vector.load %arg0[%182, %c0_98, %c0_99] : memref<8x6x8xf32, #tpu.memory_space<vmem>>, vector<1x6x8xf32>
    %184 = vector.shape_cast %183 : vector<1x6x8xf32> to vector<6x8xf32>
    %185 = arith.index_cast %c3_i32 : i32 to index
    %c0_100 = arith.constant 0 : index
    %c0_101 = arith.constant 0 : index
    %186 = vector.load %arg1[%185, %c0_100, %c0_101] : memref<8x6x8xf32, #tpu.memory_space<vmem>>, vector<1x6x8xf32>
    %187 = vector.shape_cast %186 : vector<1x6x8xf32> to vector<6x8xf32>
    %cst_102 = arith.constant dense<0.000000e+00> : vector<6x32xf32>
    %188 = tpu.matmul %187, %0, %cst_102 {dimension_numbers = #tpu.dot_dimension_numbers<[1], [0], [0], [1], [0, 0, 1, 1], [], []>} : vector<6x8xf32>, vector<8x32xf32>, vector<6x32xf32> -> vector<6x32xf32>
    %189 = vector.broadcast %1 : vector<1x32xf32> to vector<6x32xf32>
    %190 = arith.addf %188, %189 : vector<6x32xf32>
    %cst_103 = arith.constant 0.000000e+00 : f32
    %191 = vector.broadcast %cst_103 : f32 to vector<6x32xf32>
    %192 = arith.maximumf %190, %191 : vector<6x32xf32>
    %cst_104 = arith.constant 0.000000e+00 : f32
    %193 = vector.broadcast %cst_104 : f32 to vector<6x32xf32>
    %194 = arith.subf %193, %192 : vector<6x32xf32>
    %195 = math.exp %194 : vector<6x32xf32>
    %196 = arith.index_cast %c3_i32 : i32 to index
    %c0_105 = arith.constant 0 : index
    %c0_106 = arith.constant 0 : index
    %197 = vector.load %arg20[%196, %c0_105, %c0_106] : memref<8x6x32xf32, #tpu.memory_space<vmem>>, vector<1x6x32xf32>
    %198 = vector.shape_cast %197 : vector<1x6x32xf32> to vector<6x32xf32>
    %199 = vector.shape_cast %195 : vector<6x32xf32> to vector<1x6x32xf32>
    tpu.vector_store %arg20[%196, %c0_105, %c0_106], %199 {strides = array<i32>} : memref<8x6x32xf32, #tpu.memory_space<vmem>>, vector<1x6x32xf32>,
    %200 = vector.broadcast %2 : vector<1x8xf32> to vector<6x8xf32>
    %201 = arith.mulf %187, %200 : vector<6x8xf32>
    %202 = vector.broadcast %3 : vector<1x8xf32> to vector<6x8xf32>
    %203 = arith.addf %201, %202 : vector<6x8xf32>
    %cst_107 = arith.constant 0.000000e+00 : f32
    %204 = vector.broadcast %cst_107 : f32 to vector<6x8xf32>
    %205 = arith.maximumf %203, %204 : vector<6x8xf32>
    %cst_108 = arith.constant 0.000000e+00 : f32
    %206 = vector.broadcast %cst_108 : f32 to vector<6x8xf32>
    %207 = arith.subf %206, %205 : vector<6x8xf32>
    %208 = math.exp %207 : vector<6x8xf32>
    %cst_109 = arith.constant dense<0.000000e+00> : vector<6x136xf32>
    %209 = tpu.matmul %184, %9, %cst_109 {dimension_numbers = #tpu.dot_dimension_numbers<[1], [0], [0], [1], [0, 0, 1, 1], [], []>} : vector<6x8xf32>, vector<8x136xf32>, vector<6x136xf32> -> vector<6x136xf32>
    %210 = vector.extract_strided_slice %209 {offsets = [0, 0], sizes = [6, 128], strides = [1, 1]} : vector<6x136xf32> to vector<6x128xf32>
    %211 = arith.index_cast %c3_i32 : i32 to index
    %c0_110 = arith.constant 0 : index
    %c0_111 = arith.constant 0 : index
    %212 = vector.load %arg21[%211, %c0_110, %c0_111] : memref<8x6x128xf32, #tpu.memory_space<vmem>>, vector<1x6x128xf32>
    %213 = vector.shape_cast %212 : vector<1x6x128xf32> to vector<6x128xf32>
    %214 = vector.shape_cast %210 : vector<6x128xf32> to vector<1x6x128xf32>
    tpu.vector_store %arg21[%211, %c0_110, %c0_111], %214 {strides = array<i32>} : memref<8x6x128xf32, #tpu.memory_space<vmem>>, vector<1x6x128xf32>,
    %cst_112 = arith.constant dense<0.000000e+00> : vector<6x8xf32>
    %215 = tpu.matmul %208, %8, %cst_112 {dimension_numbers = #tpu.dot_dimension_numbers<[1], [0], [0], [1], [0, 0, 1, 1], [], []>} : vector<6x8xf32>, vector<8x8xf32>, vector<6x8xf32> -> vector<6x8xf32>
    %216 = vector.extract_strided_slice %209 {offsets = [0, 128], sizes = [6, 8], strides = [1, 1]} : vector<6x136xf32> to vector<6x8xf32>
    %217 = arith.addf %215, %216 : vector<6x8xf32>
    %218 = vector.broadcast %10 : vector<1x8xf32> to vector<6x8xf32>
    %219 = arith.addf %217, %218 : vector<6x8xf32>
    %220 = arith.index_cast %c3_i32 : i32 to index
    %c0_113 = arith.constant 0 : index
    %c0_114 = arith.constant 0 : index
    %221 = vector.load %arg22[%220, %c0_113, %c0_114] : memref<8x6x8xf32, #tpu.memory_space<vmem>>, vector<1x6x8xf32>
    %222 = vector.shape_cast %221 : vector<1x6x8xf32> to vector<6x8xf32>
    %223 = vector.shape_cast %219 : vector<6x8xf32> to vector<1x6x8xf32>
    tpu.vector_store %arg22[%220, %c0_113, %c0_114], %223 {strides = array<i32>} : memref<8x6x8xf32, #tpu.memory_space<vmem>>, vector<1x6x8xf32>,
    %224 = arith.index_cast %c3_i32 : i32 to index
    %c0_115 = arith.constant 0 : index
    %c0_116 = arith.constant 0 : index
    %225 = vector.load %arg2[%224, %c0_115, %c0_116] : memref<8x6x8xf32, #tpu.memory_space<vmem>>, vector<1x6x8xf32>
    %226 = vector.shape_cast %225 : vector<1x6x8xf32> to vector<6x8xf32>
    %227 = arith.mulf %184, %226 : vector<6x8xf32>
    %228 = arith.index_cast %c3_i32 : i32 to index
    %c0_117 = arith.constant 0 : index
    %c0_118 = arith.constant 0 : index
    %229 = vector.load %arg23[%228, %c0_117, %c0_118] : memref<8x6x8xf32, #tpu.memory_space<vmem>>, vector<1x6x8xf32>
    %230 = vector.shape_cast %229 : vector<1x6x8xf32> to vector<6x8xf32>
    %231 = vector.shape_cast %227 : vector<6x8xf32> to vector<1x6x8xf32>
    tpu.vector_store %arg23[%228, %c0_117, %c0_118], %231 {strides = array<i32>} : memref<8x6x8xf32, #tpu.memory_space<vmem>>, vector<1x6x8xf32>,
    %cst_119 = arith.constant 1.000000e+00 : f32
    %232 = vector.broadcast %cst_119 : f32 to vector<6x8xf32>
    %233 = arith.subf %232, %184 : vector<6x8xf32>
    %234 = arith.index_cast %c3_i32 : i32 to index
    %c0_120 = arith.constant 0 : index
    %c0_121 = arith.constant 0 : index
    %235 = vector.load %arg24[%234, %c0_120, %c0_121] : memref<8x6x8xf32, #tpu.memory_space<vmem>>, vector<1x6x8xf32>
    %236 = vector.shape_cast %235 : vector<1x6x8xf32> to vector<6x8xf32>
    %237 = vector.shape_cast %233 : vector<6x8xf32> to vector<1x6x8xf32>
    tpu.vector_store %arg24[%234, %c0_120, %c0_121], %237 {strides = array<i32>} : memref<8x6x8xf32, #tpu.memory_space<vmem>>, vector<1x6x8xf32>,
    %c4_i32 = arith.constant 4 : i32
    %238 = arith.index_cast %c4_i32 : i32 to index
    %c0_122 = arith.constant 0 : index
    %c0_123 = arith.constant 0 : index
    %239 = vector.load %arg0[%238, %c0_122, %c0_123] : memref<8x6x8xf32, #tpu.memory_space<vmem>>, vector<1x6x8xf32>
    %240 = vector.shape_cast %239 : vector<1x6x8xf32> to vector<6x8xf32>
    %241 = arith.index_cast %c4_i32 : i32 to index
    %c0_124 = arith.constant 0 : index
    %c0_125 = arith.constant 0 : index
    %242 = vector.load %arg1[%241, %c0_124, %c0_125] : memref<8x6x8xf32, #tpu.memory_space<vmem>>, vector<1x6x8xf32>
    %243 = vector.shape_cast %242 : vector<1x6x8xf32> to vector<6x8xf32>
    %cst_126 = arith.constant dense<0.000000e+00> : vector<6x32xf32>
    %244 = tpu.matmul %243, %0, %cst_126 {dimension_numbers = #tpu.dot_dimension_numbers<[1], [0], [0], [1], [0, 0, 1, 1], [], []>} : vector<6x8xf32>, vector<8x32xf32>, vector<6x32xf32> -> vector<6x32xf32>
    %245 = vector.broadcast %1 : vector<1x32xf32> to vector<6x32xf32>
    %246 = arith.addf %244, %245 : vector<6x32xf32>
    %cst_127 = arith.constant 0.000000e+00 : f32
    %247 = vector.broadcast %cst_127 : f32 to vector<6x32xf32>
    %248 = arith.maximumf %246, %247 : vector<6x32xf32>
    %cst_128 = arith.constant 0.000000e+00 : f32
    %249 = vector.broadcast %cst_128 : f32 to vector<6x32xf32>
    %250 = arith.subf %249, %248 : vector<6x32xf32>
    %251 = math.exp %250 : vector<6x32xf32>
    %252 = arith.index_cast %c4_i32 : i32 to index
    %c0_129 = arith.constant 0 : index
    %c0_130 = arith.constant 0 : index
    %253 = vector.load %arg20[%252, %c0_129, %c0_130] : memref<8x6x32xf32, #tpu.memory_space<vmem>>, vector<1x6x32xf32>
    %254 = vector.shape_cast %253 : vector<1x6x32xf32> to vector<6x32xf32>
    %255 = vector.shape_cast %251 : vector<6x32xf32> to vector<1x6x32xf32>
    tpu.vector_store %arg20[%252, %c0_129, %c0_130], %255 {strides = array<i32>} : memref<8x6x32xf32, #tpu.memory_space<vmem>>, vector<1x6x32xf32>,
    %256 = vector.broadcast %2 : vector<1x8xf32> to vector<6x8xf32>
    %257 = arith.mulf %243, %256 : vector<6x8xf32>
    %258 = vector.broadcast %3 : vector<1x8xf32> to vector<6x8xf32>
    %259 = arith.addf %257, %258 : vector<6x8xf32>
    %cst_131 = arith.constant 0.000000e+00 : f32
    %260 = vector.broadcast %cst_131 : f32 to vector<6x8xf32>
    %261 = arith.maximumf %259, %260 : vector<6x8xf32>
    %cst_132 = arith.constant 0.000000e+00 : f32
    %262 = vector.broadcast %cst_132 : f32 to vector<6x8xf32>
    %263 = arith.subf %262, %261 : vector<6x8xf32>
    %264 = math.exp %263 : vector<6x8xf32>
    %cst_133 = arith.constant dense<0.000000e+00> : vector<6x136xf32>
    %265 = tpu.matmul %240, %9, %cst_133 {dimension_numbers = #tpu.dot_dimension_numbers<[1], [0], [0], [1], [0, 0, 1, 1], [], []>} : vector<6x8xf32>, vector<8x136xf32>, vector<6x136xf32> -> vector<6x136xf32>
    %266 = vector.extract_strided_slice %265 {offsets = [0, 0], sizes = [6, 128], strides = [1, 1]} : vector<6x136xf32> to vector<6x128xf32>
    %267 = arith.index_cast %c4_i32 : i32 to index
    %c0_134 = arith.constant 0 : index
    %c0_135 = arith.constant 0 : index
    %268 = vector.load %arg21[%267, %c0_134, %c0_135] : memref<8x6x128xf32, #tpu.memory_space<vmem>>, vector<1x6x128xf32>
    %269 = vector.shape_cast %268 : vector<1x6x128xf32> to vector<6x128xf32>
    %270 = vector.shape_cast %266 : vector<6x128xf32> to vector<1x6x128xf32>
    tpu.vector_store %arg21[%267, %c0_134, %c0_135], %270 {strides = array<i32>} : memref<8x6x128xf32, #tpu.memory_space<vmem>>, vector<1x6x128xf32>,
    %cst_136 = arith.constant dense<0.000000e+00> : vector<6x8xf32>
    %271 = tpu.matmul %264, %8, %cst_136 {dimension_numbers = #tpu.dot_dimension_numbers<[1], [0], [0], [1], [0, 0, 1, 1], [], []>} : vector<6x8xf32>, vector<8x8xf32>, vector<6x8xf32> -> vector<6x8xf32>
    %272 = vector.extract_strided_slice %265 {offsets = [0, 128], sizes = [6, 8], strides = [1, 1]} : vector<6x136xf32> to vector<6x8xf32>
    %273 = arith.addf %271, %272 : vector<6x8xf32>
    %274 = vector.broadcast %10 : vector<1x8xf32> to vector<6x8xf32>
    %275 = arith.addf %273, %274 : vector<6x8xf32>
    %276 = arith.index_cast %c4_i32 : i32 to index
    %c0_137 = arith.constant 0 : index
    %c0_138 = arith.constant 0 : index
    %277 = vector.load %arg22[%276, %c0_137, %c0_138] : memref<8x6x8xf32, #tpu.memory_space<vmem>>, vector<1x6x8xf32>
    %278 = vector.shape_cast %277 : vector<1x6x8xf32> to vector<6x8xf32>
    %279 = vector.shape_cast %275 : vector<6x8xf32> to vector<1x6x8xf32>
    tpu.vector_store %arg22[%276, %c0_137, %c0_138], %279 {strides = array<i32>} : memref<8x6x8xf32, #tpu.memory_space<vmem>>, vector<1x6x8xf32>,
    %280 = arith.index_cast %c4_i32 : i32 to index
    %c0_139 = arith.constant 0 : index
    %c0_140 = arith.constant 0 : index
    %281 = vector.load %arg2[%280, %c0_139, %c0_140] : memref<8x6x8xf32, #tpu.memory_space<vmem>>, vector<1x6x8xf32>
    %282 = vector.shape_cast %281 : vector<1x6x8xf32> to vector<6x8xf32>
    %283 = arith.mulf %240, %282 : vector<6x8xf32>
    %284 = arith.index_cast %c4_i32 : i32 to index
    %c0_141 = arith.constant 0 : index
    %c0_142 = arith.constant 0 : index
    %285 = vector.load %arg23[%284, %c0_141, %c0_142] : memref<8x6x8xf32, #tpu.memory_space<vmem>>, vector<1x6x8xf32>
    %286 = vector.shape_cast %285 : vector<1x6x8xf32> to vector<6x8xf32>
    %287 = vector.shape_cast %283 : vector<6x8xf32> to vector<1x6x8xf32>
    tpu.vector_store %arg23[%284, %c0_141, %c0_142], %287 {strides = array<i32>} : memref<8x6x8xf32, #tpu.memory_space<vmem>>, vector<1x6x8xf32>,
    %cst_143 = arith.constant 1.000000e+00 : f32
    %288 = vector.broadcast %cst_143 : f32 to vector<6x8xf32>
    %289 = arith.subf %288, %240 : vector<6x8xf32>
    %290 = arith.index_cast %c4_i32 : i32 to index
    %c0_144 = arith.constant 0 : index
    %c0_145 = arith.constant 0 : index
    %291 = vector.load %arg24[%290, %c0_144, %c0_145] : memref<8x6x8xf32, #tpu.memory_space<vmem>>, vector<1x6x8xf32>
    %292 = vector.shape_cast %291 : vector<1x6x8xf32> to vector<6x8xf32>
    %293 = vector.shape_cast %289 : vector<6x8xf32> to vector<1x6x8xf32>
    tpu.vector_store %arg24[%290, %c0_144, %c0_145], %293 {strides = array<i32>} : memref<8x6x8xf32, #tpu.memory_space<vmem>>, vector<1x6x8xf32>,
    %c5_i32 = arith.constant 5 : i32
    %294 = arith.index_cast %c5_i32 : i32 to index
    %c0_146 = arith.constant 0 : index
    %c0_147 = arith.constant 0 : index
    %295 = vector.load %arg0[%294, %c0_146, %c0_147] : memref<8x6x8xf32, #tpu.memory_space<vmem>>, vector<1x6x8xf32>
    %296 = vector.shape_cast %295 : vector<1x6x8xf32> to vector<6x8xf32>
    %297 = arith.index_cast %c5_i32 : i32 to index
    %c0_148 = arith.constant 0 : index
    %c0_149 = arith.constant 0 : index
    %298 = vector.load %arg1[%297, %c0_148, %c0_149] : memref<8x6x8xf32, #tpu.memory_space<vmem>>, vector<1x6x8xf32>
    %299 = vector.shape_cast %298 : vector<1x6x8xf32> to vector<6x8xf32>
    %cst_150 = arith.constant dense<0.000000e+00> : vector<6x32xf32>
    %300 = tpu.matmul %299, %0, %cst_150 {dimension_numbers = #tpu.dot_dimension_numbers<[1], [0], [0], [1], [0, 0, 1, 1], [], []>} : vector<6x8xf32>, vector<8x32xf32>, vector<6x32xf32> -> vector<6x32xf32>
    %301 = vector.broadcast %1 : vector<1x32xf32> to vector<6x32xf32>
    %302 = arith.addf %300, %301 : vector<6x32xf32>
    %cst_151 = arith.constant 0.000000e+00 : f32
    %303 = vector.broadcast %cst_151 : f32 to vector<6x32xf32>
    %304 = arith.maximumf %302, %303 : vector<6x32xf32>
    %cst_152 = arith.constant 0.000000e+00 : f32
    %305 = vector.broadcast %cst_152 : f32 to vector<6x32xf32>
    %306 = arith.subf %305, %304 : vector<6x32xf32>
    %307 = math.exp %306 : vector<6x32xf32>
    %308 = arith.index_cast %c5_i32 : i32 to index
    %c0_153 = arith.constant 0 : index
    %c0_154 = arith.constant 0 : index
    %309 = vector.load %arg20[%308, %c0_153, %c0_154] : memref<8x6x32xf32, #tpu.memory_space<vmem>>, vector<1x6x32xf32>
    %310 = vector.shape_cast %309 : vector<1x6x32xf32> to vector<6x32xf32>
    %311 = vector.shape_cast %307 : vector<6x32xf32> to vector<1x6x32xf32>
    tpu.vector_store %arg20[%308, %c0_153, %c0_154], %311 {strides = array<i32>} : memref<8x6x32xf32, #tpu.memory_space<vmem>>, vector<1x6x32xf32>,
    %312 = vector.broadcast %2 : vector<1x8xf32> to vector<6x8xf32>
    %313 = arith.mulf %299, %312 : vector<6x8xf32>
    %314 = vector.broadcast %3 : vector<1x8xf32> to vector<6x8xf32>
    %315 = arith.addf %313, %314 : vector<6x8xf32>
    %cst_155 = arith.constant 0.000000e+00 : f32
    %316 = vector.broadcast %cst_155 : f32 to vector<6x8xf32>
    %317 = arith.maximumf %315, %316 : vector<6x8xf32>
    %cst_156 = arith.constant 0.000000e+00 : f32
    %318 = vector.broadcast %cst_156 : f32 to vector<6x8xf32>
    %319 = arith.subf %318, %317 : vector<6x8xf32>
    %320 = math.exp %319 : vector<6x8xf32>
    %cst_157 = arith.constant dense<0.000000e+00> : vector<6x136xf32>
    %321 = tpu.matmul %296, %9, %cst_157 {dimension_numbers = #tpu.dot_dimension_numbers<[1], [0], [0], [1], [0, 0, 1, 1], [], []>} : vector<6x8xf32>, vector<8x136xf32>, vector<6x136xf32> -> vector<6x136xf32>
    %322 = vector.extract_strided_slice %321 {offsets = [0, 0], sizes = [6, 128], strides = [1, 1]} : vector<6x136xf32> to vector<6x128xf32>
    %323 = arith.index_cast %c5_i32 : i32 to index
    %c0_158 = arith.constant 0 : index
    %c0_159 = arith.constant 0 : index
    %324 = vector.load %arg21[%323, %c0_158, %c0_159] : memref<8x6x128xf32, #tpu.memory_space<vmem>>, vector<1x6x128xf32>
    %325 = vector.shape_cast %324 : vector<1x6x128xf32> to vector<6x128xf32>
    %326 = vector.shape_cast %322 : vector<6x128xf32> to vector<1x6x128xf32>
    tpu.vector_store %arg21[%323, %c0_158, %c0_159], %326 {strides = array<i32>} : memref<8x6x128xf32, #tpu.memory_space<vmem>>, vector<1x6x128xf32>,
    %cst_160 = arith.constant dense<0.000000e+00> : vector<6x8xf32>
    %327 = tpu.matmul %320, %8, %cst_160 {dimension_numbers = #tpu.dot_dimension_numbers<[1], [0], [0], [1], [0, 0, 1, 1], [], []>} : vector<6x8xf32>, vector<8x8xf32>, vector<6x8xf32> -> vector<6x8xf32>
    %328 = vector.extract_strided_slice %321 {offsets = [0, 128], sizes = [6, 8], strides = [1, 1]} : vector<6x136xf32> to vector<6x8xf32>
    %329 = arith.addf %327, %328 : vector<6x8xf32>
    %330 = vector.broadcast %10 : vector<1x8xf32> to vector<6x8xf32>
    %331 = arith.addf %329, %330 : vector<6x8xf32>
    %332 = arith.index_cast %c5_i32 : i32 to index
    %c0_161 = arith.constant 0 : index
    %c0_162 = arith.constant 0 : index
    %333 = vector.load %arg22[%332, %c0_161, %c0_162] : memref<8x6x8xf32, #tpu.memory_space<vmem>>, vector<1x6x8xf32>
    %334 = vector.shape_cast %333 : vector<1x6x8xf32> to vector<6x8xf32>
    %335 = vector.shape_cast %331 : vector<6x8xf32> to vector<1x6x8xf32>
    tpu.vector_store %arg22[%332, %c0_161, %c0_162], %335 {strides = array<i32>} : memref<8x6x8xf32, #tpu.memory_space<vmem>>, vector<1x6x8xf32>,
    %336 = arith.index_cast %c5_i32 : i32 to index
    %c0_163 = arith.constant 0 : index
    %c0_164 = arith.constant 0 : index
    %337 = vector.load %arg2[%336, %c0_163, %c0_164] : memref<8x6x8xf32, #tpu.memory_space<vmem>>, vector<1x6x8xf32>
    %338 = vector.shape_cast %337 : vector<1x6x8xf32> to vector<6x8xf32>
    %339 = arith.mulf %296, %338 : vector<6x8xf32>
    %340 = arith.index_cast %c5_i32 : i32 to index
    %c0_165 = arith.constant 0 : index
    %c0_166 = arith.constant 0 : index
    %341 = vector.load %arg23[%340, %c0_165, %c0_166] : memref<8x6x8xf32, #tpu.memory_space<vmem>>, vector<1x6x8xf32>
    %342 = vector.shape_cast %341 : vector<1x6x8xf32> to vector<6x8xf32>
    %343 = vector.shape_cast %339 : vector<6x8xf32> to vector<1x6x8xf32>
    tpu.vector_store %arg23[%340, %c0_165, %c0_166], %343 {strides = array<i32>} : memref<8x6x8xf32, #tpu.memory_space<vmem>>, vector<1x6x8xf32>,
    %cst_167 = arith.constant 1.000000e+00 : f32
    %344 = vector.broadcast %cst_167 : f32 to vector<6x8xf32>
    %345 = arith.subf %344, %296 : vector<6x8xf32>
    %346 = arith.index_cast %c5_i32 : i32 to index
    %c0_168 = arith.constant 0 : index
    %c0_169 = arith.constant 0 : index
    %347 = vector.load %arg24[%346, %c0_168, %c0_169] : memref<8x6x8xf32, #tpu.memory_space<vmem>>, vector<1x6x8xf32>
    %348 = vector.shape_cast %347 : vector<1x6x8xf32> to vector<6x8xf32>
    %349 = vector.shape_cast %345 : vector<6x8xf32> to vector<1x6x8xf32>
    tpu.vector_store %arg24[%346, %c0_168, %c0_169], %349 {strides = array<i32>} : memref<8x6x8xf32, #tpu.memory_space<vmem>>, vector<1x6x8xf32>,
    %c6_i32 = arith.constant 6 : i32
    %350 = arith.index_cast %c6_i32 : i32 to index
    %c0_170 = arith.constant 0 : index
    %c0_171 = arith.constant 0 : index
    %351 = vector.load %arg0[%350, %c0_170, %c0_171] : memref<8x6x8xf32, #tpu.memory_space<vmem>>, vector<1x6x8xf32>
    %352 = vector.shape_cast %351 : vector<1x6x8xf32> to vector<6x8xf32>
    %353 = arith.index_cast %c6_i32 : i32 to index
    %c0_172 = arith.constant 0 : index
    %c0_173 = arith.constant 0 : index
    %354 = vector.load %arg1[%353, %c0_172, %c0_173] : memref<8x6x8xf32, #tpu.memory_space<vmem>>, vector<1x6x8xf32>
    %355 = vector.shape_cast %354 : vector<1x6x8xf32> to vector<6x8xf32>
    %cst_174 = arith.constant dense<0.000000e+00> : vector<6x32xf32>
    %356 = tpu.matmul %355, %0, %cst_174 {dimension_numbers = #tpu.dot_dimension_numbers<[1], [0], [0], [1], [0, 0, 1, 1], [], []>} : vector<6x8xf32>, vector<8x32xf32>, vector<6x32xf32> -> vector<6x32xf32>
    %357 = vector.broadcast %1 : vector<1x32xf32> to vector<6x32xf32>
    %358 = arith.addf %356, %357 : vector<6x32xf32>
    %cst_175 = arith.constant 0.000000e+00 : f32
    %359 = vector.broadcast %cst_175 : f32 to vector<6x32xf32>
    %360 = arith.maximumf %358, %359 : vector<6x32xf32>
    %cst_176 = arith.constant 0.000000e+00 : f32
    %361 = vector.broadcast %cst_176 : f32 to vector<6x32xf32>
    %362 = arith.subf %361, %360 : vector<6x32xf32>
    %363 = math.exp %362 : vector<6x32xf32>
    %364 = arith.index_cast %c6_i32 : i32 to index
    %c0_177 = arith.constant 0 : index
    %c0_178 = arith.constant 0 : index
    %365 = vector.load %arg20[%364, %c0_177, %c0_178] : memref<8x6x32xf32, #tpu.memory_space<vmem>>, vector<1x6x32xf32>
    %366 = vector.shape_cast %365 : vector<1x6x32xf32> to vector<6x32xf32>
    %367 = vector.shape_cast %363 : vector<6x32xf32> to vector<1x6x32xf32>
    tpu.vector_store %arg20[%364, %c0_177, %c0_178], %367 {strides = array<i32>} : memref<8x6x32xf32, #tpu.memory_space<vmem>>, vector<1x6x32xf32>,
    %368 = vector.broadcast %2 : vector<1x8xf32> to vector<6x8xf32>
    %369 = arith.mulf %355, %368 : vector<6x8xf32>
    %370 = vector.broadcast %3 : vector<1x8xf32> to vector<6x8xf32>
    %371 = arith.addf %369, %370 : vector<6x8xf32>
    %cst_179 = arith.constant 0.000000e+00 : f32
    %372 = vector.broadcast %cst_179 : f32 to vector<6x8xf32>
    %373 = arith.maximumf %371, %372 : vector<6x8xf32>
    %cst_180 = arith.constant 0.000000e+00 : f32
    %374 = vector.broadcast %cst_180 : f32 to vector<6x8xf32>
    %375 = arith.subf %374, %373 : vector<6x8xf32>
    %376 = math.exp %375 : vector<6x8xf32>
    %cst_181 = arith.constant dense<0.000000e+00> : vector<6x136xf32>
    %377 = tpu.matmul %352, %9, %cst_181 {dimension_numbers = #tpu.dot_dimension_numbers<[1], [0], [0], [1], [0, 0, 1, 1], [], []>} : vector<6x8xf32>, vector<8x136xf32>, vector<6x136xf32> -> vector<6x136xf32>
    %378 = vector.extract_strided_slice %377 {offsets = [0, 0], sizes = [6, 128], strides = [1, 1]} : vector<6x136xf32> to vector<6x128xf32>
    %379 = arith.index_cast %c6_i32 : i32 to index
    %c0_182 = arith.constant 0 : index
    %c0_183 = arith.constant 0 : index
    %380 = vector.load %arg21[%379, %c0_182, %c0_183] : memref<8x6x128xf32, #tpu.memory_space<vmem>>, vector<1x6x128xf32>
    %381 = vector.shape_cast %380 : vector<1x6x128xf32> to vector<6x128xf32>
    %382 = vector.shape_cast %378 : vector<6x128xf32> to vector<1x6x128xf32>
    tpu.vector_store %arg21[%379, %c0_182, %c0_183], %382 {strides = array<i32>} : memref<8x6x128xf32, #tpu.memory_space<vmem>>, vector<1x6x128xf32>,
    %cst_184 = arith.constant dense<0.000000e+00> : vector<6x8xf32>
    %383 = tpu.matmul %376, %8, %cst_184 {dimension_numbers = #tpu.dot_dimension_numbers<[1], [0], [0], [1], [0, 0, 1, 1], [], []>} : vector<6x8xf32>, vector<8x8xf32>, vector<6x8xf32> -> vector<6x8xf32>
    %384 = vector.extract_strided_slice %377 {offsets = [0, 128], sizes = [6, 8], strides = [1, 1]} : vector<6x136xf32> to vector<6x8xf32>
    %385 = arith.addf %383, %384 : vector<6x8xf32>
    %386 = vector.broadcast %10 : vector<1x8xf32> to vector<6x8xf32>
    %387 = arith.addf %385, %386 : vector<6x8xf32>
    %388 = arith.index_cast %c6_i32 : i32 to index
    %c0_185 = arith.constant 0 : index
    %c0_186 = arith.constant 0 : index
    %389 = vector.load %arg22[%388, %c0_185, %c0_186] : memref<8x6x8xf32, #tpu.memory_space<vmem>>, vector<1x6x8xf32>
    %390 = vector.shape_cast %389 : vector<1x6x8xf32> to vector<6x8xf32>
    %391 = vector.shape_cast %387 : vector<6x8xf32> to vector<1x6x8xf32>
    tpu.vector_store %arg22[%388, %c0_185, %c0_186], %391 {strides = array<i32>} : memref<8x6x8xf32, #tpu.memory_space<vmem>>, vector<1x6x8xf32>,
    %392 = arith.index_cast %c6_i32 : i32 to index
    %c0_187 = arith.constant 0 : index
    %c0_188 = arith.constant 0 : index
    %393 = vector.load %arg2[%392, %c0_187, %c0_188] : memref<8x6x8xf32, #tpu.memory_space<vmem>>, vector<1x6x8xf32>
    %394 = vector.shape_cast %393 : vector<1x6x8xf32> to vector<6x8xf32>
    %395 = arith.mulf %352, %394 : vector<6x8xf32>
    %396 = arith.index_cast %c6_i32 : i32 to index
    %c0_189 = arith.constant 0 : index
    %c0_190 = arith.constant 0 : index
    %397 = vector.load %arg23[%396, %c0_189, %c0_190] : memref<8x6x8xf32, #tpu.memory_space<vmem>>, vector<1x6x8xf32>
    %398 = vector.shape_cast %397 : vector<1x6x8xf32> to vector<6x8xf32>
    %399 = vector.shape_cast %395 : vector<6x8xf32> to vector<1x6x8xf32>
    tpu.vector_store %arg23[%396, %c0_189, %c0_190], %399 {strides = array<i32>} : memref<8x6x8xf32, #tpu.memory_space<vmem>>, vector<1x6x8xf32>,
    %cst_191 = arith.constant 1.000000e+00 : f32
    %400 = vector.broadcast %cst_191 : f32 to vector<6x8xf32>
    %401 = arith.subf %400, %352 : vector<6x8xf32>
    %402 = arith.index_cast %c6_i32 : i32 to index
    %c0_192 = arith.constant 0 : index
    %c0_193 = arith.constant 0 : index
    %403 = vector.load %arg24[%402, %c0_192, %c0_193] : memref<8x6x8xf32, #tpu.memory_space<vmem>>, vector<1x6x8xf32>
    %404 = vector.shape_cast %403 : vector<1x6x8xf32> to vector<6x8xf32>
    %405 = vector.shape_cast %401 : vector<6x8xf32> to vector<1x6x8xf32>
    tpu.vector_store %arg24[%402, %c0_192, %c0_193], %405 {strides = array<i32>} : memref<8x6x8xf32, #tpu.memory_space<vmem>>, vector<1x6x8xf32>,
    %c7_i32 = arith.constant 7 : i32
    %406 = arith.index_cast %c7_i32 : i32 to index
    %c0_194 = arith.constant 0 : index
    %c0_195 = arith.constant 0 : index
    %407 = vector.load %arg0[%406, %c0_194, %c0_195] : memref<8x6x8xf32, #tpu.memory_space<vmem>>, vector<1x6x8xf32>
    %408 = vector.shape_cast %407 : vector<1x6x8xf32> to vector<6x8xf32>
    %409 = arith.index_cast %c7_i32 : i32 to index
    %c0_196 = arith.constant 0 : index
    %c0_197 = arith.constant 0 : index
    %410 = vector.load %arg1[%409, %c0_196, %c0_197] : memref<8x6x8xf32, #tpu.memory_space<vmem>>, vector<1x6x8xf32>
    %411 = vector.shape_cast %410 : vector<1x6x8xf32> to vector<6x8xf32>
    %cst_198 = arith.constant dense<0.000000e+00> : vector<6x32xf32>
    %412 = tpu.matmul %411, %0, %cst_198 {dimension_numbers = #tpu.dot_dimension_numbers<[1], [0], [0], [1], [0, 0, 1, 1], [], []>} : vector<6x8xf32>, vector<8x32xf32>, vector<6x32xf32> -> vector<6x32xf32>
    %413 = vector.broadcast %1 : vector<1x32xf32> to vector<6x32xf32>
    %414 = arith.addf %412, %413 : vector<6x32xf32>
    %cst_199 = arith.constant 0.000000e+00 : f32
    %415 = vector.broadcast %cst_199 : f32 to vector<6x32xf32>
    %416 = arith.maximumf %414, %415 : vector<6x32xf32>
    %cst_200 = arith.constant 0.000000e+00 : f32
    %417 = vector.broadcast %cst_200 : f32 to vector<6x32xf32>
    %418 = arith.subf %417, %416 : vector<6x32xf32>
    %419 = math.exp %418 : vector<6x32xf32>
    %420 = arith.index_cast %c7_i32 : i32 to index
    %c0_201 = arith.constant 0 : index
    %c0_202 = arith.constant 0 : index
    %421 = vector.load %arg20[%420, %c0_201, %c0_202] : memref<8x6x32xf32, #tpu.memory_space<vmem>>, vector<1x6x32xf32>
    %422 = vector.shape_cast %421 : vector<1x6x32xf32> to vector<6x32xf32>
    %423 = vector.shape_cast %419 : vector<6x32xf32> to vector<1x6x32xf32>
    tpu.vector_store %arg20[%420, %c0_201, %c0_202], %423 {strides = array<i32>} : memref<8x6x32xf32, #tpu.memory_space<vmem>>, vector<1x6x32xf32>,
    %424 = vector.broadcast %2 : vector<1x8xf32> to vector<6x8xf32>
    %425 = arith.mulf %411, %424 : vector<6x8xf32>
    %426 = vector.broadcast %3 : vector<1x8xf32> to vector<6x8xf32>
    %427 = arith.addf %425, %426 : vector<6x8xf32>
    %cst_203 = arith.constant 0.000000e+00 : f32
    %428 = vector.broadcast %cst_203 : f32 to vector<6x8xf32>
    %429 = arith.maximumf %427, %428 : vector<6x8xf32>
    %cst_204 = arith.constant 0.000000e+00 : f32
    %430 = vector.broadcast %cst_204 : f32 to vector<6x8xf32>
    %431 = arith.subf %430, %429 : vector<6x8xf32>
    %432 = math.exp %431 : vector<6x8xf32>
    %cst_205 = arith.constant dense<0.000000e+00> : vector<6x136xf32>
    %433 = tpu.matmul %408, %9, %cst_205 {dimension_numbers = #tpu.dot_dimension_numbers<[1], [0], [0], [1], [0, 0, 1, 1], [], []>} : vector<6x8xf32>, vector<8x136xf32>, vector<6x136xf32> -> vector<6x136xf32>
    %434 = vector.extract_strided_slice %433 {offsets = [0, 0], sizes = [6, 128], strides = [1, 1]} : vector<6x136xf32> to vector<6x128xf32>
    %435 = arith.index_cast %c7_i32 : i32 to index
    %c0_206 = arith.constant 0 : index
    %c0_207 = arith.constant 0 : index
    %436 = vector.load %arg21[%435, %c0_206, %c0_207] : memref<8x6x128xf32, #tpu.memory_space<vmem>>, vector<1x6x128xf32>
    %437 = vector.shape_cast %436 : vector<1x6x128xf32> to vector<6x128xf32>
    %438 = vector.shape_cast %434 : vector<6x128xf32> to vector<1x6x128xf32>
    tpu.vector_store %arg21[%435, %c0_206, %c0_207], %438 {strides = array<i32>} : memref<8x6x128xf32, #tpu.memory_space<vmem>>, vector<1x6x128xf32>,
    %cst_208 = arith.constant dense<0.000000e+00> : vector<6x8xf32>
    %439 = tpu.matmul %432, %8, %cst_208 {dimension_numbers = #tpu.dot_dimension_numbers<[1], [0], [0], [1], [0, 0, 1, 1], [], []>} : vector<6x8xf32>, vector<8x8xf32>, vector<6x8xf32> -> vector<6x8xf32>
    %440 = vector.extract_strided_slice %433 {offsets = [0, 128], sizes = [6, 8], strides = [1, 1]} : vector<6x136xf32> to vector<6x8xf32>
    %441 = arith.addf %439, %440 : vector<6x8xf32>
    %442 = vector.broadcast %10 : vector<1x8xf32> to vector<6x8xf32>
    %443 = arith.addf %441, %442 : vector<6x8xf32>
    %444 = arith.index_cast %c7_i32 : i32 to index
    %c0_209 = arith.constant 0 : index
    %c0_210 = arith.constant 0 : index
    %445 = vector.load %arg22[%444, %c0_209, %c0_210] : memref<8x6x8xf32, #tpu.memory_space<vmem>>, vector<1x6x8xf32>
    %446 = vector.shape_cast %445 : vector<1x6x8xf32> to vector<6x8xf32>
    %447 = vector.shape_cast %443 : vector<6x8xf32> to vector<1x6x8xf32>
    tpu.vector_store %arg22[%444, %c0_209, %c0_210], %447 {strides = array<i32>} : memref<8x6x8xf32, #tpu.memory_space<vmem>>, vector<1x6x8xf32>,
    %448 = arith.index_cast %c7_i32 : i32 to index
    %c0_211 = arith.constant 0 : index
    %c0_212 = arith.constant 0 : index
    %449 = vector.load %arg2[%448, %c0_211, %c0_212] : memref<8x6x8xf32, #tpu.memory_space<vmem>>, vector<1x6x8xf32>
    %450 = vector.shape_cast %449 : vector<1x6x8xf32> to vector<6x8xf32>
    %451 = arith.mulf %408, %450 : vector<6x8xf32>
    %452 = arith.index_cast %c7_i32 : i32 to index
    %c0_213 = arith.constant 0 : index
    %c0_214 = arith.constant 0 : index
    %453 = vector.load %arg23[%452, %c0_213, %c0_214] : memref<8x6x8xf32, #tpu.memory_space<vmem>>, vector<1x6x8xf32>
    %454 = vector.shape_cast %453 : vector<1x6x8xf32> to vector<6x8xf32>
    %455 = vector.shape_cast %451 : vector<6x8xf32> to vector<1x6x8xf32>
    tpu.vector_store %arg23[%452, %c0_213, %c0_214], %455 {strides = array<i32>} : memref<8x6x8xf32, #tpu.memory_space<vmem>>, vector<1x6x8xf32>,
    %cst_215 = arith.constant 1.000000e+00 : f32
    %456 = vector.broadcast %cst_215 : f32 to vector<6x8xf32>
    %457 = arith.subf %456, %408 : vector<6x8xf32>
    %458 = arith.index_cast %c7_i32 : i32 to index
    %c0_216 = arith.constant 0 : index
    %c0_217 = arith.constant 0 : index
    %459 = vector.load %arg24[%458, %c0_216, %c0_217] : memref<8x6x8xf32, #tpu.memory_space<vmem>>, vector<1x6x8xf32>
    %460 = vector.shape_cast %459 : vector<1x6x8xf32> to vector<6x8xf32>
    %461 = vector.shape_cast %457 : vector<6x8xf32> to vector<1x6x8xf32>
    tpu.vector_store %arg24[%458, %c0_216, %c0_217], %461 {strides = array<i32>} : memref<8x6x8xf32, #tpu.memory_space<vmem>>, vector<1x6x8xf32>,
    %c8_i32 = arith.constant 8 : i32
    %cst_218 = arith.constant 0.000000e+00 : f32
    %462 = vector.broadcast %cst_218 : f32 to vector<6x32xf32>
    %cst_219 = arith.constant 0.000000e+00 : f32
    %463 = vector.broadcast %cst_219 : f32 to vector<6x32xf32>
    %c0_i32_220 = arith.constant 0 : i32
    %464 = arith.index_cast %c0_i32_220 : i32 to index
    %c0_221 = arith.constant 0 : index
    %c0_222 = arith.constant 0 : index
    %465 = vector.load %arg20[%464, %c0_221, %c0_222] : memref<8x6x32xf32, #tpu.memory_space<vmem>>, vector<1x6x32xf32>
    %466 = vector.shape_cast %465 : vector<1x6x32xf32> to vector<6x32xf32>
    %467 = arith.mulf %462, %466 : vector<6x32xf32>
    %cst_223 = arith.constant dense<0.000000e+00> : vector<6x136xf32>
    %468 = tpu.matmul %467, %4, %cst_223 {dimension_numbers = #tpu.dot_dimension_numbers<[1], [0], [0], [1], [0, 0, 1, 1], [], []>} : vector<6x32xf32>, vector<32x136xf32>, vector<6x136xf32> -> vector<6x136xf32>
    %469 = vector.extract_strided_slice %468 {offsets = [0, 0], sizes = [6, 128], strides = [1, 1]} : vector<6x136xf32> to vector<6x128xf32>
    %470 = vector.extract_strided_slice %468 {offsets = [0, 128], sizes = [6, 8], strides = [1, 1]} : vector<6x136xf32> to vector<6x8xf32>
    %471 = vector.broadcast %5 : vector<1x8xf32> to vector<6x8xf32>
    %472 = arith.addf %470, %471 : vector<6x8xf32>
    %473 = arith.index_cast %c0_i32_220 : i32 to index
    %c0_224 = arith.constant 0 : index
    %c0_225 = arith.constant 0 : index
    %474 = vector.load %arg23[%473, %c0_224, %c0_225] : memref<8x6x8xf32, #tpu.memory_space<vmem>>, vector<1x6x8xf32>
    %475 = vector.shape_cast %474 : vector<1x6x8xf32> to vector<6x8xf32>
    %476 = arith.index_cast %c0_i32_220 : i32 to index
    %c0_226 = arith.constant 0 : index
    %c0_227 = arith.constant 0 : index
    %477 = vector.load %arg24[%476, %c0_226, %c0_227] : memref<8x6x8xf32, #tpu.memory_space<vmem>>, vector<1x6x8xf32>
    %478 = vector.shape_cast %477 : vector<1x6x8xf32> to vector<6x8xf32>
    %479 = arith.mulf %478, %472 : vector<6x8xf32>
    %480 = arith.addf %475, %479 : vector<6x8xf32>
    %cst_228 = arith.constant dense<0.000000e+00> : vector<6x8xf32>
    %481 = tpu.matmul %480, %6, %cst_228 {dimension_numbers = #tpu.dot_dimension_numbers<[1], [0], [0], [1], [0, 0, 1, 1], [], []>} : vector<6x8xf32>, vector<8x8xf32>, vector<6x8xf32> -> vector<6x8xf32>
    %482 = vector.broadcast %7 : vector<1x8xf32> to vector<6x8xf32>
    %483 = arith.addf %481, %482 : vector<6x8xf32>
    %484 = arith.index_cast %c0_i32_220 : i32 to index
    %c0_229 = arith.constant 0 : index
    %c0_230 = arith.constant 0 : index
    %485 = vector.load %arg22[%484, %c0_229, %c0_230] : memref<8x6x8xf32, #tpu.memory_space<vmem>>, vector<1x6x8xf32>
    %486 = vector.shape_cast %485 : vector<1x6x8xf32> to vector<6x8xf32>
    %487 = arith.mulf %486, %483 : vector<6x8xf32>
    %cst_231 = arith.constant 1.000000e+00 : f32
    %488 = vector.broadcast %cst_231 : f32 to vector<6x8xf32>
    %489 = arith.subf %488, %486 : vector<6x8xf32>
    %490 = arith.mulf %489, %472 : vector<6x8xf32>
    %491 = arith.addf %487, %490 : vector<6x8xf32>
    %492 = arith.mulf %478, %491 : vector<6x8xf32>
    %493 = arith.addf %475, %492 : vector<6x8xf32>
    %494 = arith.index_cast %c0_i32_220 : i32 to index
    %c0_232 = arith.constant 0 : index
    %c0_233 = arith.constant 0 : index
    %495 = vector.load %arg2[%494, %c0_232, %c0_233] : memref<8x6x8xf32, #tpu.memory_space<vmem>>, vector<1x6x8xf32>
    %496 = vector.shape_cast %495 : vector<1x6x8xf32> to vector<6x8xf32>
    %497 = arith.subf %496, %472 : vector<6x8xf32>
    %498 = math.absf %497 : vector<6x8xf32>
    %499 = arith.subf %496, %483 : vector<6x8xf32>
    %500 = math.absf %499 : vector<6x8xf32>
    %501 = arith.addf %498, %500 : vector<6x8xf32>
    %502 = arith.subf %496, %491 : vector<6x8xf32>
    %503 = math.absf %502 : vector<6x8xf32>
    %504 = arith.addf %501, %503 : vector<6x8xf32>
    %505 = arith.index_cast %c0_i32_220 : i32 to index
    %c0_234 = arith.constant 0 : index
    %c0_235 = arith.constant 0 : index
    %506 = vector.load %arg26[%505, %c0_234, %c0_235] : memref<8x6x8xf32, #tpu.memory_space<vmem>>, vector<1x6x8xf32>
    %507 = vector.shape_cast %506 : vector<1x6x8xf32> to vector<6x8xf32>
    %508 = vector.shape_cast %504 : vector<6x8xf32> to vector<1x6x8xf32>
    tpu.vector_store %arg26[%505, %c0_234, %c0_235], %508 {strides = array<i32>} : memref<8x6x8xf32, #tpu.memory_space<vmem>>, vector<1x6x8xf32>,
    %509 = arith.index_cast %c0_i32_220 : i32 to index
    %c0_236 = arith.constant 0 : index
    %c0_237 = arith.constant 0 : index
    %510 = vector.load %arg25[%509, %c0_236, %c0_237] : memref<8x6x8xf32, #tpu.memory_space<vmem>>, vector<1x6x8xf32>
    %511 = vector.shape_cast %510 : vector<1x6x8xf32> to vector<6x8xf32>
    %512 = vector.shape_cast %493 : vector<6x8xf32> to vector<1x6x8xf32>
    tpu.vector_store %arg25[%509, %c0_236, %c0_237], %512 {strides = array<i32>} : memref<8x6x8xf32, #tpu.memory_space<vmem>>, vector<1x6x8xf32>,
    %cst_238 = arith.constant dense<0.000000e+00> : vector<6x128xf32>
    %513 = tpu.matmul %493, %11, %cst_238 {dimension_numbers = #tpu.dot_dimension_numbers<[1], [0], [0], [1], [0, 0, 1, 1], [], []>} : vector<6x8xf32>, vector<8x128xf32>, vector<6x128xf32> -> vector<6x128xf32>
    %514 = arith.addf %513, %469 : vector<6x128xf32>
    %515 = arith.index_cast %c0_i32_220 : i32 to index
    %c0_239 = arith.constant 0 : index
    %c0_240 = arith.constant 0 : index
    %516 = vector.load %arg21[%515, %c0_239, %c0_240] : memref<8x6x128xf32, #tpu.memory_space<vmem>>, vector<1x6x128xf32>
    %517 = vector.shape_cast %516 : vector<1x6x128xf32> to vector<6x128xf32>
    %518 = arith.addf %514, %517 : vector<6x128xf32>
    %519 = vector.broadcast %12 : vector<1x128xf32> to vector<6x128xf32>
    %520 = arith.addf %518, %519 : vector<6x128xf32>
    %521 = arith.negf %520 : vector<6x128xf32>
    %522 = math.exp %521 : vector<6x128xf32>
    %cst_241 = arith.constant 1.000000e+00 : f32
    %523 = vector.broadcast %cst_241 : f32 to vector<6x128xf32>
    %524 = arith.addf %523, %522 : vector<6x128xf32>
    %525 = arith.divf %523, %524 : vector<6x128xf32>
    %526 = math.tanh %520 : vector<6x128xf32>
    %527 = vector.extract_strided_slice %525 {offsets = [0, 0], sizes = [6, 32], strides = [1, 1]} : vector<6x128xf32> to vector<6x32xf32>
    %528 = vector.extract_strided_slice %525 {offsets = [0, 32], sizes = [6, 32], strides = [1, 1]} : vector<6x128xf32> to vector<6x32xf32>
    %529 = vector.extract_strided_slice %526 {offsets = [0, 64], sizes = [6, 32], strides = [1, 1]} : vector<6x128xf32> to vector<6x32xf32>
    %530 = vector.extract_strided_slice %525 {offsets = [0, 96], sizes = [6, 32], strides = [1, 1]} : vector<6x128xf32> to vector<6x32xf32>
    %531 = arith.mulf %528, %463 : vector<6x32xf32>
    %532 = arith.mulf %527, %529 : vector<6x32xf32>
    %533 = arith.addf %531, %532 : vector<6x32xf32>
    %534 = math.tanh %533 : vector<6x32xf32>
    %535 = arith.mulf %530, %534 : vector<6x32xf32>
    %c1_i32_242 = arith.constant 1 : i32
    %536 = arith.index_cast %c1_i32_242 : i32 to index
    %c0_243 = arith.constant 0 : index
    %c0_244 = arith.constant 0 : index
    %537 = vector.load %arg20[%536, %c0_243, %c0_244] : memref<8x6x32xf32, #tpu.memory_space<vmem>>, vector<1x6x32xf32>
    %538 = vector.shape_cast %537 : vector<1x6x32xf32> to vector<6x32xf32>
    %539 = arith.mulf %535, %538 : vector<6x32xf32>
    %cst_245 = arith.constant dense<0.000000e+00> : vector<6x136xf32>
    %540 = tpu.matmul %539, %4, %cst_245 {dimension_numbers = #tpu.dot_dimension_numbers<[1], [0], [0], [1], [0, 0, 1, 1], [], []>} : vector<6x32xf32>, vector<32x136xf32>, vector<6x136xf32> -> vector<6x136xf32>
    %541 = vector.extract_strided_slice %540 {offsets = [0, 0], sizes = [6, 128], strides = [1, 1]} : vector<6x136xf32> to vector<6x128xf32>
    %542 = vector.extract_strided_slice %540 {offsets = [0, 128], sizes = [6, 8], strides = [1, 1]} : vector<6x136xf32> to vector<6x8xf32>
    %543 = vector.broadcast %5 : vector<1x8xf32> to vector<6x8xf32>
    %544 = arith.addf %542, %543 : vector<6x8xf32>
    %545 = arith.index_cast %c1_i32_242 : i32 to index
    %c0_246 = arith.constant 0 : index
    %c0_247 = arith.constant 0 : index
    %546 = vector.load %arg23[%545, %c0_246, %c0_247] : memref<8x6x8xf32, #tpu.memory_space<vmem>>, vector<1x6x8xf32>
    %547 = vector.shape_cast %546 : vector<1x6x8xf32> to vector<6x8xf32>
    %548 = arith.index_cast %c1_i32_242 : i32 to index
    %c0_248 = arith.constant 0 : index
    %c0_249 = arith.constant 0 : index
    %549 = vector.load %arg24[%548, %c0_248, %c0_249] : memref<8x6x8xf32, #tpu.memory_space<vmem>>, vector<1x6x8xf32>
    %550 = vector.shape_cast %549 : vector<1x6x8xf32> to vector<6x8xf32>
    %551 = arith.mulf %550, %544 : vector<6x8xf32>
    %552 = arith.addf %547, %551 : vector<6x8xf32>
    %cst_250 = arith.constant dense<0.000000e+00> : vector<6x8xf32>
    %553 = tpu.matmul %552, %6, %cst_250 {dimension_numbers = #tpu.dot_dimension_numbers<[1], [0], [0], [1], [0, 0, 1, 1], [], []>} : vector<6x8xf32>, vector<8x8xf32>, vector<6x8xf32> -> vector<6x8xf32>
    %554 = vector.broadcast %7 : vector<1x8xf32> to vector<6x8xf32>
    %555 = arith.addf %553, %554 : vector<6x8xf32>
    %556 = arith.index_cast %c1_i32_242 : i32 to index
    %c0_251 = arith.constant 0 : index
    %c0_252 = arith.constant 0 : index
    %557 = vector.load %arg22[%556, %c0_251, %c0_252] : memref<8x6x8xf32, #tpu.memory_space<vmem>>, vector<1x6x8xf32>
    %558 = vector.shape_cast %557 : vector<1x6x8xf32> to vector<6x8xf32>
    %559 = arith.mulf %558, %555 : vector<6x8xf32>
    %cst_253 = arith.constant 1.000000e+00 : f32
    %560 = vector.broadcast %cst_253 : f32 to vector<6x8xf32>
    %561 = arith.subf %560, %558 : vector<6x8xf32>
    %562 = arith.mulf %561, %544 : vector<6x8xf32>
    %563 = arith.addf %559, %562 : vector<6x8xf32>
    %564 = arith.mulf %550, %563 : vector<6x8xf32>
    %565 = arith.addf %547, %564 : vector<6x8xf32>
    %566 = arith.index_cast %c1_i32_242 : i32 to index
    %c0_254 = arith.constant 0 : index
    %c0_255 = arith.constant 0 : index
    %567 = vector.load %arg2[%566, %c0_254, %c0_255] : memref<8x6x8xf32, #tpu.memory_space<vmem>>, vector<1x6x8xf32>
    %568 = vector.shape_cast %567 : vector<1x6x8xf32> to vector<6x8xf32>
    %569 = arith.subf %568, %544 : vector<6x8xf32>
    %570 = math.absf %569 : vector<6x8xf32>
    %571 = arith.subf %568, %555 : vector<6x8xf32>
    %572 = math.absf %571 : vector<6x8xf32>
    %573 = arith.addf %570, %572 : vector<6x8xf32>
    %574 = arith.subf %568, %563 : vector<6x8xf32>
    %575 = math.absf %574 : vector<6x8xf32>
    %576 = arith.addf %573, %575 : vector<6x8xf32>
    %577 = arith.index_cast %c1_i32_242 : i32 to index
    %c0_256 = arith.constant 0 : index
    %c0_257 = arith.constant 0 : index
    %578 = vector.load %arg26[%577, %c0_256, %c0_257] : memref<8x6x8xf32, #tpu.memory_space<vmem>>, vector<1x6x8xf32>
    %579 = vector.shape_cast %578 : vector<1x6x8xf32> to vector<6x8xf32>
    %580 = vector.shape_cast %576 : vector<6x8xf32> to vector<1x6x8xf32>
    tpu.vector_store %arg26[%577, %c0_256, %c0_257], %580 {strides = array<i32>} : memref<8x6x8xf32, #tpu.memory_space<vmem>>, vector<1x6x8xf32>,
    %581 = arith.index_cast %c1_i32_242 : i32 to index
    %c0_258 = arith.constant 0 : index
    %c0_259 = arith.constant 0 : index
    %582 = vector.load %arg25[%581, %c0_258, %c0_259] : memref<8x6x8xf32, #tpu.memory_space<vmem>>, vector<1x6x8xf32>
    %583 = vector.shape_cast %582 : vector<1x6x8xf32> to vector<6x8xf32>
    %584 = vector.shape_cast %565 : vector<6x8xf32> to vector<1x6x8xf32>
    tpu.vector_store %arg25[%581, %c0_258, %c0_259], %584 {strides = array<i32>} : memref<8x6x8xf32, #tpu.memory_space<vmem>>, vector<1x6x8xf32>,
    %cst_260 = arith.constant dense<0.000000e+00> : vector<6x128xf32>
    %585 = tpu.matmul %565, %11, %cst_260 {dimension_numbers = #tpu.dot_dimension_numbers<[1], [0], [0], [1], [0, 0, 1, 1], [], []>} : vector<6x8xf32>, vector<8x128xf32>, vector<6x128xf32> -> vector<6x128xf32>
    %586 = arith.addf %585, %541 : vector<6x128xf32>
    %587 = arith.index_cast %c1_i32_242 : i32 to index
    %c0_261 = arith.constant 0 : index
    %c0_262 = arith.constant 0 : index
    %588 = vector.load %arg21[%587, %c0_261, %c0_262] : memref<8x6x128xf32, #tpu.memory_space<vmem>>, vector<1x6x128xf32>
    %589 = vector.shape_cast %588 : vector<1x6x128xf32> to vector<6x128xf32>
    %590 = arith.addf %586, %589 : vector<6x128xf32>
    %591 = vector.broadcast %12 : vector<1x128xf32> to vector<6x128xf32>
    %592 = arith.addf %590, %591 : vector<6x128xf32>
    %593 = arith.negf %592 : vector<6x128xf32>
    %594 = math.exp %593 : vector<6x128xf32>
    %cst_263 = arith.constant 1.000000e+00 : f32
    %595 = vector.broadcast %cst_263 : f32 to vector<6x128xf32>
    %596 = arith.addf %595, %594 : vector<6x128xf32>
    %597 = arith.divf %595, %596 : vector<6x128xf32>
    %598 = math.tanh %592 : vector<6x128xf32>
    %599 = vector.extract_strided_slice %597 {offsets = [0, 0], sizes = [6, 32], strides = [1, 1]} : vector<6x128xf32> to vector<6x32xf32>
    %600 = vector.extract_strided_slice %597 {offsets = [0, 32], sizes = [6, 32], strides = [1, 1]} : vector<6x128xf32> to vector<6x32xf32>
    %601 = vector.extract_strided_slice %598 {offsets = [0, 64], sizes = [6, 32], strides = [1, 1]} : vector<6x128xf32> to vector<6x32xf32>
    %602 = vector.extract_strided_slice %597 {offsets = [0, 96], sizes = [6, 32], strides = [1, 1]} : vector<6x128xf32> to vector<6x32xf32>
    %603 = arith.mulf %600, %533 : vector<6x32xf32>
    %604 = arith.mulf %599, %601 : vector<6x32xf32>
    %605 = arith.addf %603, %604 : vector<6x32xf32>
    %606 = math.tanh %605 : vector<6x32xf32>
    %607 = arith.mulf %602, %606 : vector<6x32xf32>
    %c2_i32_264 = arith.constant 2 : i32
    %608 = arith.index_cast %c2_i32_264 : i32 to index
    %c0_265 = arith.constant 0 : index
    %c0_266 = arith.constant 0 : index
    %609 = vector.load %arg20[%608, %c0_265, %c0_266] : memref<8x6x32xf32, #tpu.memory_space<vmem>>, vector<1x6x32xf32>
    %610 = vector.shape_cast %609 : vector<1x6x32xf32> to vector<6x32xf32>
    %611 = arith.mulf %607, %610 : vector<6x32xf32>
    %cst_267 = arith.constant dense<0.000000e+00> : vector<6x136xf32>
    %612 = tpu.matmul %611, %4, %cst_267 {dimension_numbers = #tpu.dot_dimension_numbers<[1], [0], [0], [1], [0, 0, 1, 1], [], []>} : vector<6x32xf32>, vector<32x136xf32>, vector<6x136xf32> -> vector<6x136xf32>
    %613 = vector.extract_strided_slice %612 {offsets = [0, 0], sizes = [6, 128], strides = [1, 1]} : vector<6x136xf32> to vector<6x128xf32>
    %614 = vector.extract_strided_slice %612 {offsets = [0, 128], sizes = [6, 8], strides = [1, 1]} : vector<6x136xf32> to vector<6x8xf32>
    %615 = vector.broadcast %5 : vector<1x8xf32> to vector<6x8xf32>
    %616 = arith.addf %614, %615 : vector<6x8xf32>
    %617 = arith.index_cast %c2_i32_264 : i32 to index
    %c0_268 = arith.constant 0 : index
    %c0_269 = arith.constant 0 : index
    %618 = vector.load %arg23[%617, %c0_268, %c0_269] : memref<8x6x8xf32, #tpu.memory_space<vmem>>, vector<1x6x8xf32>
    %619 = vector.shape_cast %618 : vector<1x6x8xf32> to vector<6x8xf32>
    %620 = arith.index_cast %c2_i32_264 : i32 to index
    %c0_270 = arith.constant 0 : index
    %c0_271 = arith.constant 0 : index
    %621 = vector.load %arg24[%620, %c0_270, %c0_271] : memref<8x6x8xf32, #tpu.memory_space<vmem>>, vector<1x6x8xf32>
    %622 = vector.shape_cast %621 : vector<1x6x8xf32> to vector<6x8xf32>
    %623 = arith.mulf %622, %616 : vector<6x8xf32>
    %624 = arith.addf %619, %623 : vector<6x8xf32>
    %cst_272 = arith.constant dense<0.000000e+00> : vector<6x8xf32>
    %625 = tpu.matmul %624, %6, %cst_272 {dimension_numbers = #tpu.dot_dimension_numbers<[1], [0], [0], [1], [0, 0, 1, 1], [], []>} : vector<6x8xf32>, vector<8x8xf32>, vector<6x8xf32> -> vector<6x8xf32>
    %626 = vector.broadcast %7 : vector<1x8xf32> to vector<6x8xf32>
    %627 = arith.addf %625, %626 : vector<6x8xf32>
    %628 = arith.index_cast %c2_i32_264 : i32 to index
    %c0_273 = arith.constant 0 : index
    %c0_274 = arith.constant 0 : index
    %629 = vector.load %arg22[%628, %c0_273, %c0_274] : memref<8x6x8xf32, #tpu.memory_space<vmem>>, vector<1x6x8xf32>
    %630 = vector.shape_cast %629 : vector<1x6x8xf32> to vector<6x8xf32>
    %631 = arith.mulf %630, %627 : vector<6x8xf32>
    %cst_275 = arith.constant 1.000000e+00 : f32
    %632 = vector.broadcast %cst_275 : f32 to vector<6x8xf32>
    %633 = arith.subf %632, %630 : vector<6x8xf32>
    %634 = arith.mulf %633, %616 : vector<6x8xf32>
    %635 = arith.addf %631, %634 : vector<6x8xf32>
    %636 = arith.mulf %622, %635 : vector<6x8xf32>
    %637 = arith.addf %619, %636 : vector<6x8xf32>
    %638 = arith.index_cast %c2_i32_264 : i32 to index
    %c0_276 = arith.constant 0 : index
    %c0_277 = arith.constant 0 : index
    %639 = vector.load %arg2[%638, %c0_276, %c0_277] : memref<8x6x8xf32, #tpu.memory_space<vmem>>, vector<1x6x8xf32>
    %640 = vector.shape_cast %639 : vector<1x6x8xf32> to vector<6x8xf32>
    %641 = arith.subf %640, %616 : vector<6x8xf32>
    %642 = math.absf %641 : vector<6x8xf32>
    %643 = arith.subf %640, %627 : vector<6x8xf32>
    %644 = math.absf %643 : vector<6x8xf32>
    %645 = arith.addf %642, %644 : vector<6x8xf32>
    %646 = arith.subf %640, %635 : vector<6x8xf32>
    %647 = math.absf %646 : vector<6x8xf32>
    %648 = arith.addf %645, %647 : vector<6x8xf32>
    %649 = arith.index_cast %c2_i32_264 : i32 to index
    %c0_278 = arith.constant 0 : index
    %c0_279 = arith.constant 0 : index
    %650 = vector.load %arg26[%649, %c0_278, %c0_279] : memref<8x6x8xf32, #tpu.memory_space<vmem>>, vector<1x6x8xf32>
    %651 = vector.shape_cast %650 : vector<1x6x8xf32> to vector<6x8xf32>
    %652 = vector.shape_cast %648 : vector<6x8xf32> to vector<1x6x8xf32>
    tpu.vector_store %arg26[%649, %c0_278, %c0_279], %652 {strides = array<i32>} : memref<8x6x8xf32, #tpu.memory_space<vmem>>, vector<1x6x8xf32>,
    %653 = arith.index_cast %c2_i32_264 : i32 to index
    %c0_280 = arith.constant 0 : index
    %c0_281 = arith.constant 0 : index
    %654 = vector.load %arg25[%653, %c0_280, %c0_281] : memref<8x6x8xf32, #tpu.memory_space<vmem>>, vector<1x6x8xf32>
    %655 = vector.shape_cast %654 : vector<1x6x8xf32> to vector<6x8xf32>
    %656 = vector.shape_cast %637 : vector<6x8xf32> to vector<1x6x8xf32>
    tpu.vector_store %arg25[%653, %c0_280, %c0_281], %656 {strides = array<i32>} : memref<8x6x8xf32, #tpu.memory_space<vmem>>, vector<1x6x8xf32>,
    %cst_282 = arith.constant dense<0.000000e+00> : vector<6x128xf32>
    %657 = tpu.matmul %637, %11, %cst_282 {dimension_numbers = #tpu.dot_dimension_numbers<[1], [0], [0], [1], [0, 0, 1, 1], [], []>} : vector<6x8xf32>, vector<8x128xf32>, vector<6x128xf32> -> vector<6x128xf32>
    %658 = arith.addf %657, %613 : vector<6x128xf32>
    %659 = arith.index_cast %c2_i32_264 : i32 to index
    %c0_283 = arith.constant 0 : index
    %c0_284 = arith.constant 0 : index
    %660 = vector.load %arg21[%659, %c0_283, %c0_284] : memref<8x6x128xf32, #tpu.memory_space<vmem>>, vector<1x6x128xf32>
    %661 = vector.shape_cast %660 : vector<1x6x128xf32> to vector<6x128xf32>
    %662 = arith.addf %658, %661 : vector<6x128xf32>
    %663 = vector.broadcast %12 : vector<1x128xf32> to vector<6x128xf32>
    %664 = arith.addf %662, %663 : vector<6x128xf32>
    %665 = arith.negf %664 : vector<6x128xf32>
    %666 = math.exp %665 : vector<6x128xf32>
    %cst_285 = arith.constant 1.000000e+00 : f32
    %667 = vector.broadcast %cst_285 : f32 to vector<6x128xf32>
    %668 = arith.addf %667, %666 : vector<6x128xf32>
    %669 = arith.divf %667, %668 : vector<6x128xf32>
    %670 = math.tanh %664 : vector<6x128xf32>
    %671 = vector.extract_strided_slice %669 {offsets = [0, 0], sizes = [6, 32], strides = [1, 1]} : vector<6x128xf32> to vector<6x32xf32>
    %672 = vector.extract_strided_slice %669 {offsets = [0, 32], sizes = [6, 32], strides = [1, 1]} : vector<6x128xf32> to vector<6x32xf32>
    %673 = vector.extract_strided_slice %670 {offsets = [0, 64], sizes = [6, 32], strides = [1, 1]} : vector<6x128xf32> to vector<6x32xf32>
    %674 = vector.extract_strided_slice %669 {offsets = [0, 96], sizes = [6, 32], strides = [1, 1]} : vector<6x128xf32> to vector<6x32xf32>
    %675 = arith.mulf %672, %605 : vector<6x32xf32>
    %676 = arith.mulf %671, %673 : vector<6x32xf32>
    %677 = arith.addf %675, %676 : vector<6x32xf32>
    %678 = math.tanh %677 : vector<6x32xf32>
    %679 = arith.mulf %674, %678 : vector<6x32xf32>
    %c3_i32_286 = arith.constant 3 : i32
    %680 = arith.index_cast %c3_i32_286 : i32 to index
    %c0_287 = arith.constant 0 : index
    %c0_288 = arith.constant 0 : index
    %681 = vector.load %arg20[%680, %c0_287, %c0_288] : memref<8x6x32xf32, #tpu.memory_space<vmem>>, vector<1x6x32xf32>
    %682 = vector.shape_cast %681 : vector<1x6x32xf32> to vector<6x32xf32>
    %683 = arith.mulf %679, %682 : vector<6x32xf32>
    %cst_289 = arith.constant dense<0.000000e+00> : vector<6x136xf32>
    %684 = tpu.matmul %683, %4, %cst_289 {dimension_numbers = #tpu.dot_dimension_numbers<[1], [0], [0], [1], [0, 0, 1, 1], [], []>} : vector<6x32xf32>, vector<32x136xf32>, vector<6x136xf32> -> vector<6x136xf32>
    %685 = vector.extract_strided_slice %684 {offsets = [0, 0], sizes = [6, 128], strides = [1, 1]} : vector<6x136xf32> to vector<6x128xf32>
    %686 = vector.extract_strided_slice %684 {offsets = [0, 128], sizes = [6, 8], strides = [1, 1]} : vector<6x136xf32> to vector<6x8xf32>
    %687 = vector.broadcast %5 : vector<1x8xf32> to vector<6x8xf32>
    %688 = arith.addf %686, %687 : vector<6x8xf32>
    %689 = arith.index_cast %c3_i32_286 : i32 to index
    %c0_290 = arith.constant 0 : index
    %c0_291 = arith.constant 0 : index
    %690 = vector.load %arg23[%689, %c0_290, %c0_291] : memref<8x6x8xf32, #tpu.memory_space<vmem>>, vector<1x6x8xf32>
    %691 = vector.shape_cast %690 : vector<1x6x8xf32> to vector<6x8xf32>
    %692 = arith.index_cast %c3_i32_286 : i32 to index
    %c0_292 = arith.constant 0 : index
    %c0_293 = arith.constant 0 : index
    %693 = vector.load %arg24[%692, %c0_292, %c0_293] : memref<8x6x8xf32, #tpu.memory_space<vmem>>, vector<1x6x8xf32>
    %694 = vector.shape_cast %693 : vector<1x6x8xf32> to vector<6x8xf32>
    %695 = arith.mulf %694, %688 : vector<6x8xf32>
    %696 = arith.addf %691, %695 : vector<6x8xf32>
    %cst_294 = arith.constant dense<0.000000e+00> : vector<6x8xf32>
    %697 = tpu.matmul %696, %6, %cst_294 {dimension_numbers = #tpu.dot_dimension_numbers<[1], [0], [0], [1], [0, 0, 1, 1], [], []>} : vector<6x8xf32>, vector<8x8xf32>, vector<6x8xf32> -> vector<6x8xf32>
    %698 = vector.broadcast %7 : vector<1x8xf32> to vector<6x8xf32>
    %699 = arith.addf %697, %698 : vector<6x8xf32>
    %700 = arith.index_cast %c3_i32_286 : i32 to index
    %c0_295 = arith.constant 0 : index
    %c0_296 = arith.constant 0 : index
    %701 = vector.load %arg22[%700, %c0_295, %c0_296] : memref<8x6x8xf32, #tpu.memory_space<vmem>>, vector<1x6x8xf32>
    %702 = vector.shape_cast %701 : vector<1x6x8xf32> to vector<6x8xf32>
    %703 = arith.mulf %702, %699 : vector<6x8xf32>
    %cst_297 = arith.constant 1.000000e+00 : f32
    %704 = vector.broadcast %cst_297 : f32 to vector<6x8xf32>
    %705 = arith.subf %704, %702 : vector<6x8xf32>
    %706 = arith.mulf %705, %688 : vector<6x8xf32>
    %707 = arith.addf %703, %706 : vector<6x8xf32>
    %708 = arith.mulf %694, %707 : vector<6x8xf32>
    %709 = arith.addf %691, %708 : vector<6x8xf32>
    %710 = arith.index_cast %c3_i32_286 : i32 to index
    %c0_298 = arith.constant 0 : index
    %c0_299 = arith.constant 0 : index
    %711 = vector.load %arg2[%710, %c0_298, %c0_299] : memref<8x6x8xf32, #tpu.memory_space<vmem>>, vector<1x6x8xf32>
    %712 = vector.shape_cast %711 : vector<1x6x8xf32> to vector<6x8xf32>
    %713 = arith.subf %712, %688 : vector<6x8xf32>
    %714 = math.absf %713 : vector<6x8xf32>
    %715 = arith.subf %712, %699 : vector<6x8xf32>
    %716 = math.absf %715 : vector<6x8xf32>
    %717 = arith.addf %714, %716 : vector<6x8xf32>
    %718 = arith.subf %712, %707 : vector<6x8xf32>
    %719 = math.absf %718 : vector<6x8xf32>
    %720 = arith.addf %717, %719 : vector<6x8xf32>
    %721 = arith.index_cast %c3_i32_286 : i32 to index
    %c0_300 = arith.constant 0 : index
    %c0_301 = arith.constant 0 : index
    %722 = vector.load %arg26[%721, %c0_300, %c0_301] : memref<8x6x8xf32, #tpu.memory_space<vmem>>, vector<1x6x8xf32>
    %723 = vector.shape_cast %722 : vector<1x6x8xf32> to vector<6x8xf32>
    %724 = vector.shape_cast %720 : vector<6x8xf32> to vector<1x6x8xf32>
    tpu.vector_store %arg26[%721, %c0_300, %c0_301], %724 {strides = array<i32>} : memref<8x6x8xf32, #tpu.memory_space<vmem>>, vector<1x6x8xf32>,
    %725 = arith.index_cast %c3_i32_286 : i32 to index
    %c0_302 = arith.constant 0 : index
    %c0_303 = arith.constant 0 : index
    %726 = vector.load %arg25[%725, %c0_302, %c0_303] : memref<8x6x8xf32, #tpu.memory_space<vmem>>, vector<1x6x8xf32>
    %727 = vector.shape_cast %726 : vector<1x6x8xf32> to vector<6x8xf32>
    %728 = vector.shape_cast %709 : vector<6x8xf32> to vector<1x6x8xf32>
    tpu.vector_store %arg25[%725, %c0_302, %c0_303], %728 {strides = array<i32>} : memref<8x6x8xf32, #tpu.memory_space<vmem>>, vector<1x6x8xf32>,
    %cst_304 = arith.constant dense<0.000000e+00> : vector<6x128xf32>
    %729 = tpu.matmul %709, %11, %cst_304 {dimension_numbers = #tpu.dot_dimension_numbers<[1], [0], [0], [1], [0, 0, 1, 1], [], []>} : vector<6x8xf32>, vector<8x128xf32>, vector<6x128xf32> -> vector<6x128xf32>
    %730 = arith.addf %729, %685 : vector<6x128xf32>
    %731 = arith.index_cast %c3_i32_286 : i32 to index
    %c0_305 = arith.constant 0 : index
    %c0_306 = arith.constant 0 : index
    %732 = vector.load %arg21[%731, %c0_305, %c0_306] : memref<8x6x128xf32, #tpu.memory_space<vmem>>, vector<1x6x128xf32>
    %733 = vector.shape_cast %732 : vector<1x6x128xf32> to vector<6x128xf32>
    %734 = arith.addf %730, %733 : vector<6x128xf32>
    %735 = vector.broadcast %12 : vector<1x128xf32> to vector<6x128xf32>
    %736 = arith.addf %734, %735 : vector<6x128xf32>
    %737 = arith.negf %736 : vector<6x128xf32>
    %738 = math.exp %737 : vector<6x128xf32>
    %cst_307 = arith.constant 1.000000e+00 : f32
    %739 = vector.broadcast %cst_307 : f32 to vector<6x128xf32>
    %740 = arith.addf %739, %738 : vector<6x128xf32>
    %741 = arith.divf %739, %740 : vector<6x128xf32>
    %742 = math.tanh %736 : vector<6x128xf32>
    %743 = vector.extract_strided_slice %741 {offsets = [0, 0], sizes = [6, 32], strides = [1, 1]} : vector<6x128xf32> to vector<6x32xf32>
    %744 = vector.extract_strided_slice %741 {offsets = [0, 32], sizes = [6, 32], strides = [1, 1]} : vector<6x128xf32> to vector<6x32xf32>
    %745 = vector.extract_strided_slice %742 {offsets = [0, 64], sizes = [6, 32], strides = [1, 1]} : vector<6x128xf32> to vector<6x32xf32>
    %746 = vector.extract_strided_slice %741 {offsets = [0, 96], sizes = [6, 32], strides = [1, 1]} : vector<6x128xf32> to vector<6x32xf32>
    %747 = arith.mulf %744, %677 : vector<6x32xf32>
    %748 = arith.mulf %743, %745 : vector<6x32xf32>
    %749 = arith.addf %747, %748 : vector<6x32xf32>
    %750 = math.tanh %749 : vector<6x32xf32>
    %751 = arith.mulf %746, %750 : vector<6x32xf32>
    %c4_i32_308 = arith.constant 4 : i32
    %752 = arith.index_cast %c4_i32_308 : i32 to index
    %c0_309 = arith.constant 0 : index
    %c0_310 = arith.constant 0 : index
    %753 = vector.load %arg20[%752, %c0_309, %c0_310] : memref<8x6x32xf32, #tpu.memory_space<vmem>>, vector<1x6x32xf32>
    %754 = vector.shape_cast %753 : vector<1x6x32xf32> to vector<6x32xf32>
    %755 = arith.mulf %751, %754 : vector<6x32xf32>
    %cst_311 = arith.constant dense<0.000000e+00> : vector<6x136xf32>
    %756 = tpu.matmul %755, %4, %cst_311 {dimension_numbers = #tpu.dot_dimension_numbers<[1], [0], [0], [1], [0, 0, 1, 1], [], []>} : vector<6x32xf32>, vector<32x136xf32>, vector<6x136xf32> -> vector<6x136xf32>
    %757 = vector.extract_strided_slice %756 {offsets = [0, 0], sizes = [6, 128], strides = [1, 1]} : vector<6x136xf32> to vector<6x128xf32>
    %758 = vector.extract_strided_slice %756 {offsets = [0, 128], sizes = [6, 8], strides = [1, 1]} : vector<6x136xf32> to vector<6x8xf32>
    %759 = vector.broadcast %5 : vector<1x8xf32> to vector<6x8xf32>
    %760 = arith.addf %758, %759 : vector<6x8xf32>
    %761 = arith.index_cast %c4_i32_308 : i32 to index
    %c0_312 = arith.constant 0 : index
    %c0_313 = arith.constant 0 : index
    %762 = vector.load %arg23[%761, %c0_312, %c0_313] : memref<8x6x8xf32, #tpu.memory_space<vmem>>, vector<1x6x8xf32>
    %763 = vector.shape_cast %762 : vector<1x6x8xf32> to vector<6x8xf32>
    %764 = arith.index_cast %c4_i32_308 : i32 to index
    %c0_314 = arith.constant 0 : index
    %c0_315 = arith.constant 0 : index
    %765 = vector.load %arg24[%764, %c0_314, %c0_315] : memref<8x6x8xf32, #tpu.memory_space<vmem>>, vector<1x6x8xf32>
    %766 = vector.shape_cast %765 : vector<1x6x8xf32> to vector<6x8xf32>
    %767 = arith.mulf %766, %760 : vector<6x8xf32>
    %768 = arith.addf %763, %767 : vector<6x8xf32>
    %cst_316 = arith.constant dense<0.000000e+00> : vector<6x8xf32>
    %769 = tpu.matmul %768, %6, %cst_316 {dimension_numbers = #tpu.dot_dimension_numbers<[1], [0], [0], [1], [0, 0, 1, 1], [], []>} : vector<6x8xf32>, vector<8x8xf32>, vector<6x8xf32> -> vector<6x8xf32>
    %770 = vector.broadcast %7 : vector<1x8xf32> to vector<6x8xf32>
    %771 = arith.addf %769, %770 : vector<6x8xf32>
    %772 = arith.index_cast %c4_i32_308 : i32 to index
    %c0_317 = arith.constant 0 : index
    %c0_318 = arith.constant 0 : index
    %773 = vector.load %arg22[%772, %c0_317, %c0_318] : memref<8x6x8xf32, #tpu.memory_space<vmem>>, vector<1x6x8xf32>
    %774 = vector.shape_cast %773 : vector<1x6x8xf32> to vector<6x8xf32>
    %775 = arith.mulf %774, %771 : vector<6x8xf32>
    %cst_319 = arith.constant 1.000000e+00 : f32
    %776 = vector.broadcast %cst_319 : f32 to vector<6x8xf32>
    %777 = arith.subf %776, %774 : vector<6x8xf32>
    %778 = arith.mulf %777, %760 : vector<6x8xf32>
    %779 = arith.addf %775, %778 : vector<6x8xf32>
    %780 = arith.mulf %766, %779 : vector<6x8xf32>
    %781 = arith.addf %763, %780 : vector<6x8xf32>
    %782 = arith.index_cast %c4_i32_308 : i32 to index
    %c0_320 = arith.constant 0 : index
    %c0_321 = arith.constant 0 : index
    %783 = vector.load %arg2[%782, %c0_320, %c0_321] : memref<8x6x8xf32, #tpu.memory_space<vmem>>, vector<1x6x8xf32>
    %784 = vector.shape_cast %783 : vector<1x6x8xf32> to vector<6x8xf32>
    %785 = arith.subf %784, %760 : vector<6x8xf32>
    %786 = math.absf %785 : vector<6x8xf32>
    %787 = arith.subf %784, %771 : vector<6x8xf32>
    %788 = math.absf %787 : vector<6x8xf32>
    %789 = arith.addf %786, %788 : vector<6x8xf32>
    %790 = arith.subf %784, %779 : vector<6x8xf32>
    %791 = math.absf %790 : vector<6x8xf32>
    %792 = arith.addf %789, %791 : vector<6x8xf32>
    %793 = arith.index_cast %c4_i32_308 : i32 to index
    %c0_322 = arith.constant 0 : index
    %c0_323 = arith.constant 0 : index
    %794 = vector.load %arg26[%793, %c0_322, %c0_323] : memref<8x6x8xf32, #tpu.memory_space<vmem>>, vector<1x6x8xf32>
    %795 = vector.shape_cast %794 : vector<1x6x8xf32> to vector<6x8xf32>
    %796 = vector.shape_cast %792 : vector<6x8xf32> to vector<1x6x8xf32>
    tpu.vector_store %arg26[%793, %c0_322, %c0_323], %796 {strides = array<i32>} : memref<8x6x8xf32, #tpu.memory_space<vmem>>, vector<1x6x8xf32>,
    %797 = arith.index_cast %c4_i32_308 : i32 to index
    %c0_324 = arith.constant 0 : index
    %c0_325 = arith.constant 0 : index
    %798 = vector.load %arg25[%797, %c0_324, %c0_325] : memref<8x6x8xf32, #tpu.memory_space<vmem>>, vector<1x6x8xf32>
    %799 = vector.shape_cast %798 : vector<1x6x8xf32> to vector<6x8xf32>
    %800 = vector.shape_cast %781 : vector<6x8xf32> to vector<1x6x8xf32>
    tpu.vector_store %arg25[%797, %c0_324, %c0_325], %800 {strides = array<i32>} : memref<8x6x8xf32, #tpu.memory_space<vmem>>, vector<1x6x8xf32>,
    %cst_326 = arith.constant dense<0.000000e+00> : vector<6x128xf32>
    %801 = tpu.matmul %781, %11, %cst_326 {dimension_numbers = #tpu.dot_dimension_numbers<[1], [0], [0], [1], [0, 0, 1, 1], [], []>} : vector<6x8xf32>, vector<8x128xf32>, vector<6x128xf32> -> vector<6x128xf32>
    %802 = arith.addf %801, %757 : vector<6x128xf32>
    %803 = arith.index_cast %c4_i32_308 : i32 to index
    %c0_327 = arith.constant 0 : index
    %c0_328 = arith.constant 0 : index
    %804 = vector.load %arg21[%803, %c0_327, %c0_328] : memref<8x6x128xf32, #tpu.memory_space<vmem>>, vector<1x6x128xf32>
    %805 = vector.shape_cast %804 : vector<1x6x128xf32> to vector<6x128xf32>
    %806 = arith.addf %802, %805 : vector<6x128xf32>
    %807 = vector.broadcast %12 : vector<1x128xf32> to vector<6x128xf32>
    %808 = arith.addf %806, %807 : vector<6x128xf32>
    %809 = arith.negf %808 : vector<6x128xf32>
    %810 = math.exp %809 : vector<6x128xf32>
    %cst_329 = arith.constant 1.000000e+00 : f32
    %811 = vector.broadcast %cst_329 : f32 to vector<6x128xf32>
    %812 = arith.addf %811, %810 : vector<6x128xf32>
    %813 = arith.divf %811, %812 : vector<6x128xf32>
    %814 = math.tanh %808 : vector<6x128xf32>
    %815 = vector.extract_strided_slice %813 {offsets = [0, 0], sizes = [6, 32], strides = [1, 1]} : vector<6x128xf32> to vector<6x32xf32>
    %816 = vector.extract_strided_slice %813 {offsets = [0, 32], sizes = [6, 32], strides = [1, 1]} : vector<6x128xf32> to vector<6x32xf32>
    %817 = vector.extract_strided_slice %814 {offsets = [0, 64], sizes = [6, 32], strides = [1, 1]} : vector<6x128xf32> to vector<6x32xf32>
    %818 = vector.extract_strided_slice %813 {offsets = [0, 96], sizes = [6, 32], strides = [1, 1]} : vector<6x128xf32> to vector<6x32xf32>
    %819 = arith.mulf %816, %749 : vector<6x32xf32>
    %820 = arith.mulf %815, %817 : vector<6x32xf32>
    %821 = arith.addf %819, %820 : vector<6x32xf32>
    %822 = math.tanh %821 : vector<6x32xf32>
    %823 = arith.mulf %818, %822 : vector<6x32xf32>
    %c5_i32_330 = arith.constant 5 : i32
    %824 = arith.index_cast %c5_i32_330 : i32 to index
    %c0_331 = arith.constant 0 : index
    %c0_332 = arith.constant 0 : index
    %825 = vector.load %arg20[%824, %c0_331, %c0_332] : memref<8x6x32xf32, #tpu.memory_space<vmem>>, vector<1x6x32xf32>
    %826 = vector.shape_cast %825 : vector<1x6x32xf32> to vector<6x32xf32>
    %827 = arith.mulf %823, %826 : vector<6x32xf32>
    %cst_333 = arith.constant dense<0.000000e+00> : vector<6x136xf32>
    %828 = tpu.matmul %827, %4, %cst_333 {dimension_numbers = #tpu.dot_dimension_numbers<[1], [0], [0], [1], [0, 0, 1, 1], [], []>} : vector<6x32xf32>, vector<32x136xf32>, vector<6x136xf32> -> vector<6x136xf32>
    %829 = vector.extract_strided_slice %828 {offsets = [0, 0], sizes = [6, 128], strides = [1, 1]} : vector<6x136xf32> to vector<6x128xf32>
    %830 = vector.extract_strided_slice %828 {offsets = [0, 128], sizes = [6, 8], strides = [1, 1]} : vector<6x136xf32> to vector<6x8xf32>
    %831 = vector.broadcast %5 : vector<1x8xf32> to vector<6x8xf32>
    %832 = arith.addf %830, %831 : vector<6x8xf32>
    %833 = arith.index_cast %c5_i32_330 : i32 to index
    %c0_334 = arith.constant 0 : index
    %c0_335 = arith.constant 0 : index
    %834 = vector.load %arg23[%833, %c0_334, %c0_335] : memref<8x6x8xf32, #tpu.memory_space<vmem>>, vector<1x6x8xf32>
    %835 = vector.shape_cast %834 : vector<1x6x8xf32> to vector<6x8xf32>
    %836 = arith.index_cast %c5_i32_330 : i32 to index
    %c0_336 = arith.constant 0 : index
    %c0_337 = arith.constant 0 : index
    %837 = vector.load %arg24[%836, %c0_336, %c0_337] : memref<8x6x8xf32, #tpu.memory_space<vmem>>, vector<1x6x8xf32>
    %838 = vector.shape_cast %837 : vector<1x6x8xf32> to vector<6x8xf32>
    %839 = arith.mulf %838, %832 : vector<6x8xf32>
    %840 = arith.addf %835, %839 : vector<6x8xf32>
    %cst_338 = arith.constant dense<0.000000e+00> : vector<6x8xf32>
    %841 = tpu.matmul %840, %6, %cst_338 {dimension_numbers = #tpu.dot_dimension_numbers<[1], [0], [0], [1], [0, 0, 1, 1], [], []>} : vector<6x8xf32>, vector<8x8xf32>, vector<6x8xf32> -> vector<6x8xf32>
    %842 = vector.broadcast %7 : vector<1x8xf32> to vector<6x8xf32>
    %843 = arith.addf %841, %842 : vector<6x8xf32>
    %844 = arith.index_cast %c5_i32_330 : i32 to index
    %c0_339 = arith.constant 0 : index
    %c0_340 = arith.constant 0 : index
    %845 = vector.load %arg22[%844, %c0_339, %c0_340] : memref<8x6x8xf32, #tpu.memory_space<vmem>>, vector<1x6x8xf32>
    %846 = vector.shape_cast %845 : vector<1x6x8xf32> to vector<6x8xf32>
    %847 = arith.mulf %846, %843 : vector<6x8xf32>
    %cst_341 = arith.constant 1.000000e+00 : f32
    %848 = vector.broadcast %cst_341 : f32 to vector<6x8xf32>
    %849 = arith.subf %848, %846 : vector<6x8xf32>
    %850 = arith.mulf %849, %832 : vector<6x8xf32>
    %851 = arith.addf %847, %850 : vector<6x8xf32>
    %852 = arith.mulf %838, %851 : vector<6x8xf32>
    %853 = arith.addf %835, %852 : vector<6x8xf32>
    %854 = arith.index_cast %c5_i32_330 : i32 to index
    %c0_342 = arith.constant 0 : index
    %c0_343 = arith.constant 0 : index
    %855 = vector.load %arg2[%854, %c0_342, %c0_343] : memref<8x6x8xf32, #tpu.memory_space<vmem>>, vector<1x6x8xf32>
    %856 = vector.shape_cast %855 : vector<1x6x8xf32> to vector<6x8xf32>
    %857 = arith.subf %856, %832 : vector<6x8xf32>
    %858 = math.absf %857 : vector<6x8xf32>
    %859 = arith.subf %856, %843 : vector<6x8xf32>
    %860 = math.absf %859 : vector<6x8xf32>
    %861 = arith.addf %858, %860 : vector<6x8xf32>
    %862 = arith.subf %856, %851 : vector<6x8xf32>
    %863 = math.absf %862 : vector<6x8xf32>
    %864 = arith.addf %861, %863 : vector<6x8xf32>
    %865 = arith.index_cast %c5_i32_330 : i32 to index
    %c0_344 = arith.constant 0 : index
    %c0_345 = arith.constant 0 : index
    %866 = vector.load %arg26[%865, %c0_344, %c0_345] : memref<8x6x8xf32, #tpu.memory_space<vmem>>, vector<1x6x8xf32>
    %867 = vector.shape_cast %866 : vector<1x6x8xf32> to vector<6x8xf32>
    %868 = vector.shape_cast %864 : vector<6x8xf32> to vector<1x6x8xf32>
    tpu.vector_store %arg26[%865, %c0_344, %c0_345], %868 {strides = array<i32>} : memref<8x6x8xf32, #tpu.memory_space<vmem>>, vector<1x6x8xf32>,
    %869 = arith.index_cast %c5_i32_330 : i32 to index
    %c0_346 = arith.constant 0 : index
    %c0_347 = arith.constant 0 : index
    %870 = vector.load %arg25[%869, %c0_346, %c0_347] : memref<8x6x8xf32, #tpu.memory_space<vmem>>, vector<1x6x8xf32>
    %871 = vector.shape_cast %870 : vector<1x6x8xf32> to vector<6x8xf32>
    %872 = vector.shape_cast %853 : vector<6x8xf32> to vector<1x6x8xf32>
    tpu.vector_store %arg25[%869, %c0_346, %c0_347], %872 {strides = array<i32>} : memref<8x6x8xf32, #tpu.memory_space<vmem>>, vector<1x6x8xf32>,
    %cst_348 = arith.constant dense<0.000000e+00> : vector<6x128xf32>
    %873 = tpu.matmul %853, %11, %cst_348 {dimension_numbers = #tpu.dot_dimension_numbers<[1], [0], [0], [1], [0, 0, 1, 1], [], []>} : vector<6x8xf32>, vector<8x128xf32>, vector<6x128xf32> -> vector<6x128xf32>
    %874 = arith.addf %873, %829 : vector<6x128xf32>
    %875 = arith.index_cast %c5_i32_330 : i32 to index
    %c0_349 = arith.constant 0 : index
    %c0_350 = arith.constant 0 : index
    %876 = vector.load %arg21[%875, %c0_349, %c0_350] : memref<8x6x128xf32, #tpu.memory_space<vmem>>, vector<1x6x128xf32>
    %877 = vector.shape_cast %876 : vector<1x6x128xf32> to vector<6x128xf32>
    %878 = arith.addf %874, %877 : vector<6x128xf32>
    %879 = vector.broadcast %12 : vector<1x128xf32> to vector<6x128xf32>
    %880 = arith.addf %878, %879 : vector<6x128xf32>
    %881 = arith.negf %880 : vector<6x128xf32>
    %882 = math.exp %881 : vector<6x128xf32>
    %cst_351 = arith.constant 1.000000e+00 : f32
    %883 = vector.broadcast %cst_351 : f32 to vector<6x128xf32>
    %884 = arith.addf %883, %882 : vector<6x128xf32>
    %885 = arith.divf %883, %884 : vector<6x128xf32>
    %886 = math.tanh %880 : vector<6x128xf32>
    %887 = vector.extract_strided_slice %885 {offsets = [0, 0], sizes = [6, 32], strides = [1, 1]} : vector<6x128xf32> to vector<6x32xf32>
    %888 = vector.extract_strided_slice %885 {offsets = [0, 32], sizes = [6, 32], strides = [1, 1]} : vector<6x128xf32> to vector<6x32xf32>
    %889 = vector.extract_strided_slice %886 {offsets = [0, 64], sizes = [6, 32], strides = [1, 1]} : vector<6x128xf32> to vector<6x32xf32>
    %890 = vector.extract_strided_slice %885 {offsets = [0, 96], sizes = [6, 32], strides = [1, 1]} : vector<6x128xf32> to vector<6x32xf32>
    %891 = arith.mulf %888, %821 : vector<6x32xf32>
    %892 = arith.mulf %887, %889 : vector<6x32xf32>
    %893 = arith.addf %891, %892 : vector<6x32xf32>
    %894 = math.tanh %893 : vector<6x32xf32>
    %895 = arith.mulf %890, %894 : vector<6x32xf32>
    %c6_i32_352 = arith.constant 6 : i32
    %896 = arith.index_cast %c6_i32_352 : i32 to index
    %c0_353 = arith.constant 0 : index
    %c0_354 = arith.constant 0 : index
    %897 = vector.load %arg20[%896, %c0_353, %c0_354] : memref<8x6x32xf32, #tpu.memory_space<vmem>>, vector<1x6x32xf32>
    %898 = vector.shape_cast %897 : vector<1x6x32xf32> to vector<6x32xf32>
    %899 = arith.mulf %895, %898 : vector<6x32xf32>
    %cst_355 = arith.constant dense<0.000000e+00> : vector<6x136xf32>
    %900 = tpu.matmul %899, %4, %cst_355 {dimension_numbers = #tpu.dot_dimension_numbers<[1], [0], [0], [1], [0, 0, 1, 1], [], []>} : vector<6x32xf32>, vector<32x136xf32>, vector<6x136xf32> -> vector<6x136xf32>
    %901 = vector.extract_strided_slice %900 {offsets = [0, 0], sizes = [6, 128], strides = [1, 1]} : vector<6x136xf32> to vector<6x128xf32>
    %902 = vector.extract_strided_slice %900 {offsets = [0, 128], sizes = [6, 8], strides = [1, 1]} : vector<6x136xf32> to vector<6x8xf32>
    %903 = vector.broadcast %5 : vector<1x8xf32> to vector<6x8xf32>
    %904 = arith.addf %902, %903 : vector<6x8xf32>
    %905 = arith.index_cast %c6_i32_352 : i32 to index
    %c0_356 = arith.constant 0 : index
    %c0_357 = arith.constant 0 : index
    %906 = vector.load %arg23[%905, %c0_356, %c0_357] : memref<8x6x8xf32, #tpu.memory_space<vmem>>, vector<1x6x8xf32>
    %907 = vector.shape_cast %906 : vector<1x6x8xf32> to vector<6x8xf32>
    %908 = arith.index_cast %c6_i32_352 : i32 to index
    %c0_358 = arith.constant 0 : index
    %c0_359 = arith.constant 0 : index
    %909 = vector.load %arg24[%908, %c0_358, %c0_359] : memref<8x6x8xf32, #tpu.memory_space<vmem>>, vector<1x6x8xf32>
    %910 = vector.shape_cast %909 : vector<1x6x8xf32> to vector<6x8xf32>
    %911 = arith.mulf %910, %904 : vector<6x8xf32>
    %912 = arith.addf %907, %911 : vector<6x8xf32>
    %cst_360 = arith.constant dense<0.000000e+00> : vector<6x8xf32>
    %913 = tpu.matmul %912, %6, %cst_360 {dimension_numbers = #tpu.dot_dimension_numbers<[1], [0], [0], [1], [0, 0, 1, 1], [], []>} : vector<6x8xf32>, vector<8x8xf32>, vector<6x8xf32> -> vector<6x8xf32>
    %914 = vector.broadcast %7 : vector<1x8xf32> to vector<6x8xf32>
    %915 = arith.addf %913, %914 : vector<6x8xf32>
    %916 = arith.index_cast %c6_i32_352 : i32 to index
    %c0_361 = arith.constant 0 : index
    %c0_362 = arith.constant 0 : index
    %917 = vector.load %arg22[%916, %c0_361, %c0_362] : memref<8x6x8xf32, #tpu.memory_space<vmem>>, vector<1x6x8xf32>
    %918 = vector.shape_cast %917 : vector<1x6x8xf32> to vector<6x8xf32>
    %919 = arith.mulf %918, %915 : vector<6x8xf32>
    %cst_363 = arith.constant 1.000000e+00 : f32
    %920 = vector.broadcast %cst_363 : f32 to vector<6x8xf32>
    %921 = arith.subf %920, %918 : vector<6x8xf32>
    %922 = arith.mulf %921, %904 : vector<6x8xf32>
    %923 = arith.addf %919, %922 : vector<6x8xf32>
    %924 = arith.mulf %910, %923 : vector<6x8xf32>
    %925 = arith.addf %907, %924 : vector<6x8xf32>
    %926 = arith.index_cast %c6_i32_352 : i32 to index
    %c0_364 = arith.constant 0 : index
    %c0_365 = arith.constant 0 : index
    %927 = vector.load %arg2[%926, %c0_364, %c0_365] : memref<8x6x8xf32, #tpu.memory_space<vmem>>, vector<1x6x8xf32>
    %928 = vector.shape_cast %927 : vector<1x6x8xf32> to vector<6x8xf32>
    %929 = arith.subf %928, %904 : vector<6x8xf32>
    %930 = math.absf %929 : vector<6x8xf32>
    %931 = arith.subf %928, %915 : vector<6x8xf32>
    %932 = math.absf %931 : vector<6x8xf32>
    %933 = arith.addf %930, %932 : vector<6x8xf32>
    %934 = arith.subf %928, %923 : vector<6x8xf32>
    %935 = math.absf %934 : vector<6x8xf32>
    %936 = arith.addf %933, %935 : vector<6x8xf32>
    %937 = arith.index_cast %c6_i32_352 : i32 to index
    %c0_366 = arith.constant 0 : index
    %c0_367 = arith.constant 0 : index
    %938 = vector.load %arg26[%937, %c0_366, %c0_367] : memref<8x6x8xf32, #tpu.memory_space<vmem>>, vector<1x6x8xf32>
    %939 = vector.shape_cast %938 : vector<1x6x8xf32> to vector<6x8xf32>
    %940 = vector.shape_cast %936 : vector<6x8xf32> to vector<1x6x8xf32>
    tpu.vector_store %arg26[%937, %c0_366, %c0_367], %940 {strides = array<i32>} : memref<8x6x8xf32, #tpu.memory_space<vmem>>, vector<1x6x8xf32>,
    %941 = arith.index_cast %c6_i32_352 : i32 to index
    %c0_368 = arith.constant 0 : index
    %c0_369 = arith.constant 0 : index
    %942 = vector.load %arg25[%941, %c0_368, %c0_369] : memref<8x6x8xf32, #tpu.memory_space<vmem>>, vector<1x6x8xf32>
    %943 = vector.shape_cast %942 : vector<1x6x8xf32> to vector<6x8xf32>
    %944 = vector.shape_cast %925 : vector<6x8xf32> to vector<1x6x8xf32>
    tpu.vector_store %arg25[%941, %c0_368, %c0_369], %944 {strides = array<i32>} : memref<8x6x8xf32, #tpu.memory_space<vmem>>, vector<1x6x8xf32>,
    %cst_370 = arith.constant dense<0.000000e+00> : vector<6x128xf32>
    %945 = tpu.matmul %925, %11, %cst_370 {dimension_numbers = #tpu.dot_dimension_numbers<[1], [0], [0], [1], [0, 0, 1, 1], [], []>} : vector<6x8xf32>, vector<8x128xf32>, vector<6x128xf32> -> vector<6x128xf32>
    %946 = arith.addf %945, %901 : vector<6x128xf32>
    %947 = arith.index_cast %c6_i32_352 : i32 to index
    %c0_371 = arith.constant 0 : index
    %c0_372 = arith.constant 0 : index
    %948 = vector.load %arg21[%947, %c0_371, %c0_372] : memref<8x6x128xf32, #tpu.memory_space<vmem>>, vector<1x6x128xf32>
    %949 = vector.shape_cast %948 : vector<1x6x128xf32> to vector<6x128xf32>
    %950 = arith.addf %946, %949 : vector<6x128xf32>
    %951 = vector.broadcast %12 : vector<1x128xf32> to vector<6x128xf32>
    %952 = arith.addf %950, %951 : vector<6x128xf32>
    %953 = arith.negf %952 : vector<6x128xf32>
    %954 = math.exp %953 : vector<6x128xf32>
    %cst_373 = arith.constant 1.000000e+00 : f32
    %955 = vector.broadcast %cst_373 : f32 to vector<6x128xf32>
    %956 = arith.addf %955, %954 : vector<6x128xf32>
    %957 = arith.divf %955, %956 : vector<6x128xf32>
    %958 = math.tanh %952 : vector<6x128xf32>
    %959 = vector.extract_strided_slice %957 {offsets = [0, 0], sizes = [6, 32], strides = [1, 1]} : vector<6x128xf32> to vector<6x32xf32>
    %960 = vector.extract_strided_slice %957 {offsets = [0, 32], sizes = [6, 32], strides = [1, 1]} : vector<6x128xf32> to vector<6x32xf32>
    %961 = vector.extract_strided_slice %958 {offsets = [0, 64], sizes = [6, 32], strides = [1, 1]} : vector<6x128xf32> to vector<6x32xf32>
    %962 = vector.extract_strided_slice %957 {offsets = [0, 96], sizes = [6, 32], strides = [1, 1]} : vector<6x128xf32> to vector<6x32xf32>
    %963 = arith.mulf %960, %893 : vector<6x32xf32>
    %964 = arith.mulf %959, %961 : vector<6x32xf32>
    %965 = arith.addf %963, %964 : vector<6x32xf32>
    %966 = math.tanh %965 : vector<6x32xf32>
    %967 = arith.mulf %962, %966 : vector<6x32xf32>
    %c7_i32_374 = arith.constant 7 : i32
    %968 = arith.index_cast %c7_i32_374 : i32 to index
    %c0_375 = arith.constant 0 : index
    %c0_376 = arith.constant 0 : index
    %969 = vector.load %arg20[%968, %c0_375, %c0_376] : memref<8x6x32xf32, #tpu.memory_space<vmem>>, vector<1x6x32xf32>
    %970 = vector.shape_cast %969 : vector<1x6x32xf32> to vector<6x32xf32>
    %971 = arith.mulf %967, %970 : vector<6x32xf32>
    %cst_377 = arith.constant dense<0.000000e+00> : vector<6x136xf32>
    %972 = tpu.matmul %971, %4, %cst_377 {dimension_numbers = #tpu.dot_dimension_numbers<[1], [0], [0], [1], [0, 0, 1, 1], [], []>} : vector<6x32xf32>, vector<32x136xf32>, vector<6x136xf32> -> vector<6x136xf32>
    %973 = vector.extract_strided_slice %972 {offsets = [0, 0], sizes = [6, 128], strides = [1, 1]} : vector<6x136xf32> to vector<6x128xf32>
    %974 = vector.extract_strided_slice %972 {offsets = [0, 128], sizes = [6, 8], strides = [1, 1]} : vector<6x136xf32> to vector<6x8xf32>
    %975 = vector.broadcast %5 : vector<1x8xf32> to vector<6x8xf32>
    %976 = arith.addf %974, %975 : vector<6x8xf32>
    %977 = arith.index_cast %c7_i32_374 : i32 to index
    %c0_378 = arith.constant 0 : index
    %c0_379 = arith.constant 0 : index
    %978 = vector.load %arg23[%977, %c0_378, %c0_379] : memref<8x6x8xf32, #tpu.memory_space<vmem>>, vector<1x6x8xf32>
    %979 = vector.shape_cast %978 : vector<1x6x8xf32> to vector<6x8xf32>
    %980 = arith.index_cast %c7_i32_374 : i32 to index
    %c0_380 = arith.constant 0 : index
    %c0_381 = arith.constant 0 : index
    %981 = vector.load %arg24[%980, %c0_380, %c0_381] : memref<8x6x8xf32, #tpu.memory_space<vmem>>, vector<1x6x8xf32>
    %982 = vector.shape_cast %981 : vector<1x6x8xf32> to vector<6x8xf32>
    %983 = arith.mulf %982, %976 : vector<6x8xf32>
    %984 = arith.addf %979, %983 : vector<6x8xf32>
    %cst_382 = arith.constant dense<0.000000e+00> : vector<6x8xf32>
    %985 = tpu.matmul %984, %6, %cst_382 {dimension_numbers = #tpu.dot_dimension_numbers<[1], [0], [0], [1], [0, 0, 1, 1], [], []>} : vector<6x8xf32>, vector<8x8xf32>, vector<6x8xf32> -> vector<6x8xf32>
    %986 = vector.broadcast %7 : vector<1x8xf32> to vector<6x8xf32>
    %987 = arith.addf %985, %986 : vector<6x8xf32>
    %988 = arith.index_cast %c7_i32_374 : i32 to index
    %c0_383 = arith.constant 0 : index
    %c0_384 = arith.constant 0 : index
    %989 = vector.load %arg22[%988, %c0_383, %c0_384] : memref<8x6x8xf32, #tpu.memory_space<vmem>>, vector<1x6x8xf32>
    %990 = vector.shape_cast %989 : vector<1x6x8xf32> to vector<6x8xf32>
    %991 = arith.mulf %990, %987 : vector<6x8xf32>
    %cst_385 = arith.constant 1.000000e+00 : f32
    %992 = vector.broadcast %cst_385 : f32 to vector<6x8xf32>
    %993 = arith.subf %992, %990 : vector<6x8xf32>
    %994 = arith.mulf %993, %976 : vector<6x8xf32>
    %995 = arith.addf %991, %994 : vector<6x8xf32>
    %996 = arith.mulf %982, %995 : vector<6x8xf32>
    %997 = arith.addf %979, %996 : vector<6x8xf32>
    %998 = arith.index_cast %c7_i32_374 : i32 to index
    %c0_386 = arith.constant 0 : index
    %c0_387 = arith.constant 0 : index
    %999 = vector.load %arg2[%998, %c0_386, %c0_387] : memref<8x6x8xf32, #tpu.memory_space<vmem>>, vector<1x6x8xf32>
    %1000 = vector.shape_cast %999 : vector<1x6x8xf32> to vector<6x8xf32>
    %1001 = arith.subf %1000, %976 : vector<6x8xf32>
    %1002 = math.absf %1001 : vector<6x8xf32>
    %1003 = arith.subf %1000, %987 : vector<6x8xf32>
    %1004 = math.absf %1003 : vector<6x8xf32>
    %1005 = arith.addf %1002, %1004 : vector<6x8xf32>
    %1006 = arith.subf %1000, %995 : vector<6x8xf32>
    %1007 = math.absf %1006 : vector<6x8xf32>
    %1008 = arith.addf %1005, %1007 : vector<6x8xf32>
    %1009 = arith.index_cast %c7_i32_374 : i32 to index
    %c0_388 = arith.constant 0 : index
    %c0_389 = arith.constant 0 : index
    %1010 = vector.load %arg26[%1009, %c0_388, %c0_389] : memref<8x6x8xf32, #tpu.memory_space<vmem>>, vector<1x6x8xf32>
    %1011 = vector.shape_cast %1010 : vector<1x6x8xf32> to vector<6x8xf32>
    %1012 = vector.shape_cast %1008 : vector<6x8xf32> to vector<1x6x8xf32>
    tpu.vector_store %arg26[%1009, %c0_388, %c0_389], %1012 {strides = array<i32>} : memref<8x6x8xf32, #tpu.memory_space<vmem>>, vector<1x6x8xf32>,
    %1013 = arith.index_cast %c7_i32_374 : i32 to index
    %c0_390 = arith.constant 0 : index
    %c0_391 = arith.constant 0 : index
    %1014 = vector.load %arg25[%1013, %c0_390, %c0_391] : memref<8x6x8xf32, #tpu.memory_space<vmem>>, vector<1x6x8xf32>
    %1015 = vector.shape_cast %1014 : vector<1x6x8xf32> to vector<6x8xf32>
    %1016 = vector.shape_cast %997 : vector<6x8xf32> to vector<1x6x8xf32>
    tpu.vector_store %arg25[%1013, %c0_390, %c0_391], %1016 {strides = array<i32>} : memref<8x6x8xf32, #tpu.memory_space<vmem>>, vector<1x6x8xf32>,
    %cst_392 = arith.constant dense<0.000000e+00> : vector<6x128xf32>
    %1017 = tpu.matmul %997, %11, %cst_392 {dimension_numbers = #tpu.dot_dimension_numbers<[1], [0], [0], [1], [0, 0, 1, 1], [], []>} : vector<6x8xf32>, vector<8x128xf32>, vector<6x128xf32> -> vector<6x128xf32>
    %1018 = arith.addf %1017, %973 : vector<6x128xf32>
    %1019 = arith.index_cast %c7_i32_374 : i32 to index
    %c0_393 = arith.constant 0 : index
    %c0_394 = arith.constant 0 : index
    %1020 = vector.load %arg21[%1019, %c0_393, %c0_394] : memref<8x6x128xf32, #tpu.memory_space<vmem>>, vector<1x6x128xf32>
    %1021 = vector.shape_cast %1020 : vector<1x6x128xf32> to vector<6x128xf32>
    %1022 = arith.addf %1018, %1021 : vector<6x128xf32>
    %1023 = vector.broadcast %12 : vector<1x128xf32> to vector<6x128xf32>
    %1024 = arith.addf %1022, %1023 : vector<6x128xf32>
    %1025 = arith.negf %1024 : vector<6x128xf32>
    %1026 = math.exp %1025 : vector<6x128xf32>
    %cst_395 = arith.constant 1.000000e+00 : f32
    %1027 = vector.broadcast %cst_395 : f32 to vector<6x128xf32>
    %1028 = arith.addf %1027, %1026 : vector<6x128xf32>
    %1029 = arith.divf %1027, %1028 : vector<6x128xf32>
    %1030 = math.tanh %1024 : vector<6x128xf32>
    %1031 = vector.extract_strided_slice %1029 {offsets = [0, 0], sizes = [6, 32], strides = [1, 1]} : vector<6x128xf32> to vector<6x32xf32>
    %1032 = vector.extract_strided_slice %1029 {offsets = [0, 32], sizes = [6, 32], strides = [1, 1]} : vector<6x128xf32> to vector<6x32xf32>
    %1033 = vector.extract_strided_slice %1030 {offsets = [0, 64], sizes = [6, 32], strides = [1, 1]} : vector<6x128xf32> to vector<6x32xf32>
    %1034 = vector.extract_strided_slice %1029 {offsets = [0, 96], sizes = [6, 32], strides = [1, 1]} : vector<6x128xf32> to vector<6x32xf32>
    %1035 = arith.mulf %1032, %965 : vector<6x32xf32>
    %1036 = arith.mulf %1031, %1033 : vector<6x32xf32>
    %1037 = arith.addf %1035, %1036 : vector<6x32xf32>
    %1038 = math.tanh %1037 : vector<6x32xf32>
    %1039 = arith.mulf %1034, %1038 : vector<6x32xf32>
    %c8_i32_396 = arith.constant 8 : i32
    %c0_397 = arith.constant 0 : index
    %c0_398 = arith.constant 0 : index
    %c0_399 = arith.constant 0 : index
    %1040 = vector.load %arg0[%c0_397, %c0_398, %c0_399] : memref<8x6x8xf32, #tpu.memory_space<vmem>>, vector<8x6x8xf32>
    %1041 = vector.shape_cast %13 : vector<6x1xf32> to vector<1x6x1xf32>
    %1042 = vector.broadcast %1041 : vector<1x6x1xf32> to vector<8x6x8xf32>
    %1043 = arith.mulf %1042, %1040 : vector<8x6x8xf32>
    %cst_400 = arith.constant dense<0.000000e+00> : vector<8x6xf32>
    %1044 = vector.multi_reduction <add>, %1043, %cst_400 [2] : vector<8x6x8xf32> to vector<8x6xf32>
    %cst_401 = arith.constant dense<0.000000e+00> : vector<8xf32>
    %1045 = vector.multi_reduction <add>, %1044, %cst_401 [1] : vector<8x6xf32> to vector<8xf32>
    %1046 = vector.shape_cast %1045 : vector<8xf32> to vector<8x1xf32>
    %cst_402 = arith.constant 9.99999974E-6 : f32
    %1047 = vector.broadcast %cst_402 : f32 to vector<8x1xf32>
    %1048 = arith.addf %1046, %1047 : vector<8x1xf32>
    %c0_403 = arith.constant 0 : index
    %c0_404 = arith.constant 0 : index
    %c0_405 = arith.constant 0 : index
    %1049 = vector.load %arg26[%c0_403, %c0_404, %c0_405] : memref<8x6x8xf32, #tpu.memory_space<vmem>>, vector<8x6x8xf32>
    %1050 = arith.mulf %1043, %1049 : vector<8x6x8xf32>
    %cst_406 = arith.constant dense<0.000000e+00> : vector<8x6xf32>
    %1051 = vector.multi_reduction <add>, %1050, %cst_406 [2] : vector<8x6x8xf32> to vector<8x6xf32>
    %cst_407 = arith.constant dense<0.000000e+00> : vector<8xf32>
    %1052 = vector.multi_reduction <add>, %1051, %cst_407 [1] : vector<8x6xf32> to vector<8xf32>
    %1053 = vector.shape_cast %1052 : vector<8xf32> to vector<8x1xf32>
    %cst_408 = arith.constant 0.000000e+00 : f32
    %1054 = vector.broadcast %cst_408 : f32 to vector<1x1xf32>
    %1055 = arith.divf %1053, %1048 : vector<8x1xf32>
    %1056 = vector.shape_cast %1055 : vector<8x1xf32> to vector<1x8x1xf32>
    %cst_409 = arith.constant dense<0.000000e+00> : vector<1xf32>
    %1057 = vector.multi_reduction <add>, %1056, %cst_409 [1, 2] : vector<1x8x1xf32> to vector<1xf32>
    %1058 = vector.shape_cast %1057 : vector<1xf32> to vector<1x1x1xf32>
    %1059 = vector.extract %1058[0, 0, 0] : f32 from vector<1x1x1xf32>
    %1060 = vector.broadcast %1059 : f32 to vector<1x1xf32>
    %1061 = arith.addf %1054, %1060 : vector<1x1xf32>
    %c0_410 = arith.constant 0 : index
    %c0_411 = arith.constant 0 : index
    %1062 = vector.load %arg18[%c0_410, %c0_411] : memref<1x1xf32, #tpu.memory_space<vmem>>, vector<1x1xf32>
    tpu.vector_store %arg18[%c0_410, %c0_411], %1061 {strides = array<i32>} : memref<1x1xf32, #tpu.memory_space<vmem>>, vector<1x1xf32>,
    %c0_412 = arith.constant 0 : index
    %c0_413 = arith.constant 0 : index
    %c0_414 = arith.constant 0 : index
    %1063 = vector.load %arg25[%c0_412, %c0_413, %c0_414] : memref<8x6x8xf32, #tpu.memory_space<vmem>>, vector<8x6x8xf32>
    %c0_415 = arith.constant 0 : index
    %c0_416 = arith.constant 0 : index
    %c0_417 = arith.constant 0 : index
    %1064 = vector.load %arg3[%c0_415, %c0_416, %c0_417] : memref<8x6x8xf32, #tpu.memory_space<vmem>>, vector<8x6x8xf32>
    %1065 = arith.addf %1063, %1064 : vector<8x6x8xf32>
    %1066 = vector.shape_cast %13 : vector<6x1xf32> to vector<1x6x1xf32>
    %1067 = vector.broadcast %1066 : vector<1x6x1xf32> to vector<8x6x8xf32>
    %1068 = arith.mulf %1067, %1065 : vector<8x6x8xf32>
    %1069 = vector.extract_strided_slice %1068 {offsets = [0, 0, 0], sizes = [8, 2, 8], strides = [1, 1, 1]} : vector<8x6x8xf32> to vector<8x2x8xf32>
    %1070 = vector.extract_strided_slice %1068 {offsets = [0, 2, 0], sizes = [8, 2, 8], strides = [1, 1, 1]} : vector<8x6x8xf32> to vector<8x2x8xf32>
    %1071 = arith.addf %1069, %1070 : vector<8x2x8xf32>
    %1072 = vector.extract_strided_slice %1068 {offsets = [0, 4, 0], sizes = [8, 2, 8], strides = [1, 1, 1]} : vector<8x6x8xf32> to vector<8x2x8xf32>
    %1073 = arith.addf %1071, %1072 : vector<8x2x8xf32>
    %c0_418 = arith.constant 0 : index
    %c0_419 = arith.constant 0 : index
    %c0_420 = arith.constant 0 : index
    %1074 = vector.load %arg19[%c0_418, %c0_419, %c0_420] : memref<8x2x8xf32, #tpu.memory_space<vmem>>, vector<8x2x8xf32>
    tpu.vector_store %arg19[%c0_418, %c0_419, %c0_420], %1073 {strides = array<i32>} : memref<8x2x8xf32, #tpu.memory_space<vmem>>, vector<8x2x8xf32>,
    return
  }
}

</mosaic_0001>

<bundles_post_ra>
// kernel: tpu_custom_call.1
= control target key start
LH: loop header
LB: loop body
LE: loop exit
PB: predicated region body
PF: predicated region fallthrough
CT: control target
= control target key end

     0   :  { %s3717_s0 = inlined_call_operand.vmem [shape: f32[8,6,8], index: 0, kind: input, shape index: {}]   ;;  %s3718_s1 = inlined_call_operand.vmem [shape: f32[8,6,8], index: 1, kind: input, shape index: {}]   ;;  %s3719_s2 = inlined_call_operand.vmem [shape: f32[8,6,8], index: 2, kind: input, shape index: {}]   ;;  %s3720_s3 = inlined_call_operand.vmem [shape: f32[8,6,8], index: 3, kind: input, shape index: {}]   ;;  %s3721_s4 = inlined_call_operand.vmem [shape: f32[6,1], index: 4, kind: input, shape index: {}]   ;;  %s3722_s5 = inlined_call_operand.vmem [shape: f32[8,32], index: 5, kind: input, shape index: {}]   ;;  %s3723_s6 = inlined_call_operand.vmem [shape: f32[1,32], index: 6, kind: input, shape index: {}]   ;;  %s3724_s7 = inlined_call_operand.vmem [shape: f32[1,8], index: 7, kind: input, shape index: {}]   ;;  %s3725_s8 = inlined_call_operand.vmem [shape: f32[1,8], index: 8, kind: input, shape index: {}]   ;;  %s3726_s9 = inlined_call_operand.vmem [shape: f32[32,136], index: 9, kind: input, shape index: {}]   ;;  %s3727_s10 = inlined_call_operand.vmem [shape: f32[1,8], index: 10, kind: input, shape index: {}]   ;;  %s3728_s11 = inlined_call_operand.vmem [shape: f32[8,8], index: 11, kind: input, shape index: {}]   ;;  %s3729_s12 = inlined_call_operand.vmem [shape: f32[1,8], index: 12, kind: input, shape index: {}]   ;;  %s3730_s13 = inlined_call_operand.vmem [shape: f32[8,8], index: 13, kind: input, shape index: {}]   ;;  %s3731_s14 = inlined_call_operand.vmem [shape: f32[8,136], index: 14, kind: input, shape index: {}]   ;;  %s3732_s15 = inlined_call_operand.vmem [shape: f32[1,8], index: 15, kind: input, shape index: {}]   ;;  %s3733_s16 = inlined_call_operand.vmem [shape: f32[8,128], index: 16, kind: input, shape index: {}]   ;;  %s3734_s17 = inlined_call_operand.vmem [shape: f32[1,128], index: 17, kind: input, shape index: {}]   ;;  %s3735_s18 = inlined_call_operand.hbm [shape: f32[1,1], index: 18, kind: output, shape index: {0}]   ;;  %s3736_s19 = inlined_call_operand.hbm [shape: f32[8,2,8], index: 19, kind: output, shape index: {1}]  }
   0x1   :  { %3741 = sst [smem:[#allocation15_spill]] %s3717_s0 }
   0x2   :  { %3742 = sst [smem:[#allocation16_spill]] %s3718_s1 }
   0x3   :  { %3743 = sst [smem:[#allocation17_spill]] %s3719_s2 }
   0x4   :  { %3744 = sst [smem:[#allocation18_spill]] %s3720_s3 }
   0x5   :  { %25 = vsyncpa [#allocation10], 0  ;;  %v2939_v0 = vld [vmem:[%s3722_s5] sm:$0xff]  ;;  %vm90_vm0 = vcmask 64512   ;;  %s3745_s1 = sld [smem:[#allocation16_spill]]  ;;  %vm203_vm1 = vcmask 62464  }
   0x6   :  { %109 = vmatpush.msra.mxu0 %v2939_v0  ;;  %v2949_v2 = vld [vmem:[%s3731_s14] sm:$0xff]  ;;  %s3746_s25 = sld [smem:[#allocation15_spill]] }
   0x7   :  { %s3747_s26 = sld [smem:[#allocation17_spill]]  ;;  %150 = vmatpush.msra.mxu1 %v2949_v2 }
   0x8   :  { %232 = vmatpush.msrb.mxu0 %v2939_v0 }
   0x9   :  { %267 = vmatpush.msrb.mxu1 %v2949_v2 }
   0xb   :  { %v86_v1 = vld [vmem:[%s3745_s1] sm:$0x3f]  ;;  %v2567_v15 = vld [vmem:[%s3745_s1 + $0x8] sm:$0x3f]  ;;  %v2574_v24 = vld [vmem:[%s3745_s1 + $0x10] sm:$0x3f] }
   0xc   :  { %2562 = vmatmul.msk.f32.vlgmr.msra.gmra.mxu0 %vm90_vm0, %v86_v1  ;;  %v2954_v3 = vld [vmem:[%s3746_s25] sm:$0x3f]  ;;  %v2966_v7 = vld [vmem:[%s3746_s25 + $0x8] sm:$0x3f]  ;;  %v2981_v11 = vld [vmem:[%s3746_s25 + $0x10] sm:$0x3f] }
   0xd   :  { %v205_v4 = vld [vmem:[%s3747_s26] sm:$0x3f]  ;;  %v208_v6 = vsub.f32 1.0, %v2954_v3  ;;  %2563 = vmatmul.msk.f32.vlgmr.msra.gmra.mxu1 %vm90_vm0, %v2954_v3  ;;  %v2572_v8 = vld [vmem:[%s3747_s26 + $0x8] sm:$0x3f]  ;;  %v325_v9 = vsub.f32 1.0, %v2966_v7  ;;  %350 = vmatpush.msra.mxu0 %v2939_v0 }
   0xe   :  { %v206_v5 = vmul.f32 %v205_v4, %v2954_v3  ;;  %v322_v10 = vmul.f32 %v2572_v8, %v2966_v7  ;;  %v2579_v12 = vld [vmem:[%s3747_s26 + $0x10] sm:$0x3f]  ;;  %385 = vmatpush.msra.mxu1 %v2949_v2  ;;  %v443_v14 = vsub.f32 1.0, %v2981_v11  ;;  %v2997_v16 = vld [vmem:[%s3746_s25 + $0x18] sm:$0x3f] }
   0xf   :  { %209 = vst.msk [vmem:[#allocation6] sm:$0x3f] %vm203_vm1, %v208_v6  ;;  %v440_v13 = vmul.f32 %v2579_v12, %v2981_v11  ;;  %v2586_v17 = vld [vmem:[%s3747_s26 + $0x18] sm:$0x3f]  ;;  %v561_v18 = vsub.f32 1.0, %v2997_v16 }
  0x10   :  { %207 = vst.msk [vmem:[#allocation5] sm:$0x3f] %vm203_vm1, %v206_v5  ;;  %v558_v19 = vmul.f32 %v2586_v17, %v2997_v16  ;;  %v3016_v20 = vld [vmem:[%s3746_s25 + $0x20] sm:$0x3f] }
  0x11   :  { %324 = vst.msk [vmem:[#allocation5 + $0x8] sm:$0x3f] %vm203_vm1, %v322_v10  ;;  %v2593_v21 = vld [vmem:[%s3747_s26 + $0x20] sm:$0x3f]  ;;  %v679_v23 = vsub.f32 1.0, %v3016_v20 }
  0x12   :  { %327 = vst.msk [vmem:[#allocation6 + $0x8] sm:$0x3f] %vm203_vm1, %v325_v9  ;;  %v676_v22 = vmul.f32 %v2593_v21, %v3016_v20 }
  0x13   :  { %442 = vst.msk [vmem:[#allocation5 + $0x10] sm:$0x3f] %vm203_vm1, %v440_v13 }
  0x14   :  { %2568 = vmatmul.msk.f32.vlgmr.msrb.gmra.mxu0 %vm90_vm0, %v2567_v15  ;;  %445 = vst.msk [vmem:[#allocation6 + $0x10] sm:$0x3f] %vm203_vm1, %v443_v14 }
  0x15   :  { %468 = vmatpush.msrb.mxu0 %v2939_v0  ;;  %560 = vst.msk [vmem:[#allocation5 + $0x18] sm:$0x3f] %vm203_vm1, %v558_v19  ;;  %2569 = vmatmul.msk.f32.vlgmr.msrb.gmra.mxu1 %vm90_vm0, %v2966_v7 }
  0x16   :  { %563 = vst.msk [vmem:[#allocation6 + $0x18] sm:$0x3f] %vm203_vm1, %v561_v18  ;;  %503 = vmatpush.msrb.mxu1 %v2949_v2 }
  0x17   :  { %678 = vst.msk [vmem:[#allocation5 + $0x20] sm:$0x3f] %vm203_vm1, %v676_v22 }
  0x18   :  { %681 = vst.msk [vmem:[#allocation6 + $0x20] sm:$0x3f] %vm203_vm1, %v679_v23 }
  0x19   :  { %26 = vsyncpa [#allocation12], 0  ;;  %v2581_v25 = vld [vmem:[%s3745_s1 + $0x18] sm:$0x3f]  ;;  %v2588_v26 = vld [vmem:[%s3745_s1 + $0x20] sm:$0x3f] }
  0x1a   :  { %v3053_v27 = vld [vmem:[%s3724_s7] ss:$0 sm:$0xff]  ;;  %v2595_v40 = vld [vmem:[%s3745_s1 + $0x28] sm:$0x3f]  ;;  %v3099_v50 = vld [vmem:[%s3745_s1 + $0x30] sm:$0x3f] }
  0x1b   :  { %v123_v28 = vmul.f32 %v3053_v27, %v86_v1  ;;  %v3059_v29 = vld [vmem:[%s3725_s8] ss:$0 sm:$0xff]  ;;  %v243_v32 = vmul.f32 %v3053_v27, %v2567_v15  ;;  %v361_v37 = vmul.f32 %v3053_v27, %v2574_v24  ;;  %v3072_v41 = vld [vmem:[%s3746_s25 + $0x28] sm:$0x3f]  ;;  %v479_v44 = vmul.f32 %v3053_v27, %v2581_v25  ;;  %v3104_v51 = vld [vmem:[%s3746_s25 + $0x30] sm:$0x3f] }
  0x1c   :  { %2575 = vmatmul.msk.f32.vlgmr.msra.gmra.mxu0 %vm90_vm0, %v2574_v24  ;;  %v3083_v46 = vld [vmem:[%s3731_s14 + $0x8] sm:$0xff]  ;;  %v3088_v47 = vld [vmem:[%s3730_s13] sm:$0xff]  ;;  %v597_v52 = vmul.f32 %v3053_v27, %v2588_v26  ;;  %v797_v59 = vsub.f32 1.0, %v3072_v41  ;;  %v2607_v60 = vld [vmem:[%s3747_s26 + $0x30] sm:$0x3f]  ;;  %v915_v61 = vsub.f32 1.0, %v3104_v51  ;;  %v715_v8 = vmul.f32 %v3053_v27, %v2595_v40 }
  0x1d   :  { %586 = vmatpush.msra.mxu0 %v2939_v0  ;;  %2576 = vmatmul.msk.f32.vlgmr.msra.gmra.mxu1 %vm90_vm0, %v2981_v11  ;;  %v127_v30 = vadd.f32 %v3059_v29, %v123_v28  ;;  %v244_v34 = vadd.f32 %v3059_v29, %v243_v32  ;;  %v362_v39 = vadd.f32 %v3059_v29, %v361_v37  ;;  %v2600_v58 = vld [vmem:[%s3747_s26 + $0x28] sm:$0x3f]  ;;  %v3137_v1 = vld [vmem:[%s3746_s25 + $0x38] sm:$0x3f]  ;;  %v3157_v5 = vld [vmem:[%s3726_s9 + $0x30] sm:$0xff]  ;;  %vm118_vm2 = vcmask 259072  }
  0x1e   :  { %621 = vmatpush.msra.mxu1 %v2949_v2  ;;  %v480_v49 = vadd.f32 %v3059_v29, %v479_v44  ;;  %170 = vmatpush.msra.mxu2 %v3083_v46  ;;  %v598_v56 = vadd.f32 %v3059_v29, %v597_v52  ;;  %v794_v62 = vmul.f32 %v2600_v58, %v3072_v41  ;;  %v3152_v4 = vld [vmem:[%s3726_s9 + $0x38] sm:$0xff]  ;;  %v3162_v6 = vld [vmem:[%s3726_s9 + $0x28] sm:$0xff]  ;;  %v1033_v10 = vsub.f32 1.0, %v3137_v1  ;;  %v3173_v12 = vld [vmem:[%s3726_s9 + $0x20] sm:$0xff]  ;;  %s2829_s3 = smov 64   ;;  %s2831_s27 = smov 96  }
  0x1f   :  { %v128_v31 = vmax.f32 %v127_v30, 0.0  ;;  %v245_v36 = vmax.f32 %v244_v34, 0.0  ;;  %v363_v43 = vmax.f32 %v362_v39, 0.0  ;;  %194 = vmatpush.msra.mxu3 %v3088_v47  ;;  %2564 = vmatmul.msk.f32.vlgmr.msra.gmra.mxu2 %vm90_vm0, %v2954_v3  ;;  %v912_v63 = vmul.f32 %v2607_v60, %v3104_v51  ;;  %799 = vst.msk [vmem:[#allocation6 + $0x28] sm:$0x3f] %vm203_vm1, %v797_v59  ;;  %v3179_v13 = vld [vmem:[%s3726_s9 + $0x18] sm:$0xff] }
  0x20   :  { %287 = vmatpush.msrb.mxu2 %v3083_v46  ;;  %v481_v54 = vmax.f32 %v480_v49, 0.0  ;;  %v599_v3 = vmax.f32 %v598_v56, 0.0  ;;  %796 = vst.msk [vmem:[#allocation5 + $0x28] sm:$0x3f] %vm203_vm1, %v794_v62  ;;  %v3184_v14 = vld [vmem:[%s3726_s9 + $0x10] sm:$0xff]  ;;  %v3193_v17 = vld [vmem:[%s3726_s9 + $0x8] sm:$0xff]  ;;  %v716_v21 = vadd.f32 %v3059_v29, %v715_v8  ;;  %v833_v24 = vmul.f32 %v3053_v27, %v3099_v50 }
  0x21   :  { %v129_v33 = vsub.f32 0.0, %v128_v31  ;;  %v246_v38 = vsub.f32 0.0, %v245_v36  ;;  %v364_v48 = vsub.f32 0.0, %v363_v43  ;;  %312 = vmatpush.msrb.mxu3 %v3088_v47  ;;  %914 = vst.msk [vmem:[#allocation5 + $0x30] sm:$0x3f] %vm203_vm1, %v912_v63  ;;  %v3198_v18 = vld [vmem:[%s3726_s9] sm:$0xff] }
  0x22   :  { %405 = vmatpush.msra.mxu2 %v3083_v46  ;;  %v482_v57 = vsub.f32 0.0, %v481_v54  ;;  %917 = vst.msk [vmem:[#allocation6 + $0x30] sm:$0x3f] %vm203_vm1, %v915_v61  ;;  %v600_v19 = vsub.f32 0.0, %v599_v3  ;;  %v717_v23 = vmax.f32 %v716_v21, 0.0  ;;  %v834_v28 = vadd.f32 %v3059_v29, %v833_v24  ;;  %s3748_s2 = sld [smem:[#allocation18_spill]] }
  0x23   :  { %v130_v35 = vmul.f32 1.442695, %v129_v33  ;;  %v247_v42 = vmul.f32 1.442695, %v246_v38  ;;  %v365_v53 = vmul.f32 1.442695, %v364_v48 }
  0x24   :  { %2582 = vmatmul.msk.f32.vlgmr.msrb.gmra.mxu0 %vm90_vm0, %v2581_v25  ;;  %1035 = vst.msk [vmem:[#allocation6 + $0x38] sm:$0x3f] %vm203_vm1, %v1033_v10  ;;  %v601_v22 = vmul.f32 1.442695, %v600_v19  ;;  %v3218_v25 = vld [vmem:[%s3723_s6] ss:$0 sm:$0xff] }
  0x25   :  { %704 = vmatpush.msrb.mxu0 %v2939_v0  ;;  %2583 = vmatmul.msk.f32.vlgmr.msrb.gmra.mxu1 %vm90_vm0, %v2997_v16  ;;  %2677 = vpow2.f32 %v130_v35  ;;  %v835_v35 = vmax.f32 %v834_v28, 0.0  ;;  %vm1038_vm3 = vcmask 261120   ;;  %s2545_s28 = sshll.u32 %s3736_s19, 4  ;;  %s2834_s7 = smov 2   ;;  %s2546_s28 = int_to_ptr.hbm [resolvable:$true] %s2545_s28 }
  0x26   :  { %739 = vmatpush.msrb.mxu1 %v2949_v2  ;;  %2679 = vpow2.f32 %v247_v42  ;;  %s2835_s0 = smov [#allocation9]  }
  0x27   :  { %2681 = vpow2.f32 %v365_v53  ;;  %2570 = vmatmul.msk.f32.vlgmr.msrb.gmra.mxu2 %vm90_vm0, %v2966_v7  ;;  %v483_v7 = vmul.f32 1.442695, %v482_v57  ;;  %v836_v39 = vsub.f32 0.0, %v835_v35  ;;  %s2533_s19 = sshll.u32 %s2835_s0, 4  ;;  %s2534_s19 = int_to_ptr.vmem [resolvable:$true] %s2533_s19 }
  0x28   :  { %523 = vmatpush.msrb.mxu2 %v3083_v46 }
  0x29   :  { %2683 = vpow2.f32 %v483_v7  ;;  %v837_v44 = vmul.f32 1.442695, %v836_v39 }
  0x2a   :  { %2685 = vpow2.f32 %v601_v22 }
  0x2b   :  { %v2678_v45 = vpop.eup %2677 }
  0x2c   :  { %2589 = vmatmul.msk.f32.vlgmr.msra.gmra.mxu0 %vm90_vm0, %v2588_v26  ;;  %2565 = vmatmul.msk.f32.vlgmr.msra.gmra.mxu3 %vm90_vm0, %v2678_v45  ;;  %v2680_v55 = vpop.eup %2679  ;;  %v718_v26 = vsub.f32 0.0, %v717_v23 }
  0x2d   :  { %822 = vmatpush.msra.mxu0 %v2939_v0  ;;  %2590 = vmatmul.msk.f32.vlgmr.msra.gmra.mxu1 %vm90_vm0, %v3016_v20  ;;  %v2682_v15 = vpop.eup %2681 }
  0x2e   :  { %857 = vmatpush.msra.mxu1 %v2949_v2  ;;  %430 = vmatpush.msra.mxu3 %v3088_v47  ;;  %v719_v34 = vmul.f32 1.442695, %v718_v26 }
  0x2f   :  { %2577 = vmatmul.msk.f32.vlgmr.msra.gmra.mxu2 %vm90_vm0, %v2981_v11  ;;  %v2684_v11 = vpop.eup %2683 }
  0x30   :  { %641 = vmatpush.msra.mxu2 %v3083_v46  ;;  %2687 = vpow2.f32 %v719_v34 }
  0x34   :  { %2596 = vmatmul.msk.f32.vlgmr.msrb.gmra.mxu0 %vm90_vm0, %v2595_v40  ;;  %2571 = vmatmul.msk.f32.vlgmr.msrb.gmra.mxu3 %vm90_vm0, %v2680_v55 }
  0x35   :  { %2597 = vmatmul.msk.f32.vlgmr.msrb.gmra.mxu1 %vm90_vm0, %v3072_v41  ;;  %940 = vmatpush.msrb.mxu0 %v2939_v0  ;;  %v3132_v0 = vld [vmem:[%s3745_s1 + $0x38] sm:$0x3f] }
  0x36   :  { %975 = vmatpush.msrb.mxu1 %v2949_v2  ;;  %v2614_v2 = vld [vmem:[%s3747_s26 + $0x38] sm:$0x3f]  ;;  %548 = vmatpush.msrb.mxu3 %v3088_v47  ;;  %v951_v36 = vmul.f32 %v3053_v27, %v3132_v0 }
  0x37   :  { %v1030_v9 = vmul.f32 %v2614_v2, %v3137_v1  ;;  %2584 = vmatmul.msk.f32.vlgmr.msrb.gmra.mxu2 %vm90_vm0, %v2997_v16  ;;  %v2686_v16 = vpop.eup %2685 }
  0x38   :  { %759 = vmatpush.msrb.mxu2 %v3083_v46  ;;  %v952_v40 = vadd.f32 %v3059_v29, %v951_v36  ;;  %v2688_v49 = vpop.eup %2687  ;;  %v3283_v36 = vld [vmem:[%s3732_s15] ss:$0 sm:$0xff] }
  0x39   :  { %1032 = vst.msk [vmem:[#allocation5 + $0x38] sm:$0x3f] %vm203_vm1, %v1030_v9 }
  0x3a   :  { %v953_v45 = vmax.f32 %v952_v40, 0.0 }
  0x3c   :  { %2603 = vmatmul.msk.f32.vlgmr.msra.gmra.mxu0 %vm90_vm0, %v3099_v50  ;;  %2578 = vmatmul.msk.f32.vlgmr.msra.gmra.mxu3 %vm90_vm0, %v2682_v15 }
  0x3d   :  { %2604 = vmatmul.msk.f32.vlgmr.msra.gmra.mxu1 %vm90_vm0, %v3104_v51  ;;  %1054 = vmatpush.msra.mxu0 %v3157_v5 }
  0x3e   :  { %1074 = vmatpush.msra.mxu1 %v3152_v4  ;;  %666 = vmatpush.msra.mxu3 %v3088_v47 }
  0x3f   :  { %1055 = vmatpush.msra.mxu0 %v3173_v12  ;;  %2591 = vmatmul.msk.f32.vlgmr.msra.gmra.mxu2 %vm90_vm0, %v3016_v20  ;;  %v954_v20 = vsub.f32 0.0, %v953_v45 }
  0x40   :  { %1075 = vmatpush.msra.mxu1 %v3162_v6  ;;  %877 = vmatpush.msra.mxu2 %v3083_v46 }
  0x41   :  { %1056 = vmatpush.msra.mxu0 %v3184_v14  ;;  %v955_v56 = vmul.f32 1.442695, %v954_v20 }
  0x42   :  { %1076 = vmatpush.msra.mxu1 %v3179_v13 }
  0x43   :  { %1057 = vmatpush.msra.mxu0 %v3198_v18 }
  0x44   :  { %2610 = vmatmul.msk.f32.vlgmr.msrb.gmra.mxu0 %vm90_vm0, %v3132_v0  ;;  %1077 = vmatpush.msra.mxu1 %v3193_v17 }
  0x45   :  { %2611 = vmatmul.msk.f32.vlgmr.msrb.gmra.mxu1 %vm90_vm0, %v3137_v1  ;;  %1223 = vmatpush.msrb.mxu0 %v3157_v5 }
  0x46   :  { %1243 = vmatpush.msrb.mxu1 %v3152_v4  ;;  %2585 = vmatmul.msk.f32.vlgmr.msrb.gmra.mxu3 %vm90_vm0, %v2684_v11  ;;  %v3274_v11 = vld [vmem:[%s3728_s11] sm:$0xff] }
  0x47   :  { %1224 = vmatpush.msrb.mxu0 %v3173_v12  ;;  %784 = vmatpush.msrb.mxu3 %v3088_v47 }
  0x48   :  { %1244 = vmatpush.msrb.mxu1 %v3162_v6  ;;  %2598 = vmatmul.msk.f32.vlgmr.msrb.gmra.mxu2 %vm90_vm0, %v3072_v41 }
  0x49   :  { %1225 = vmatpush.msrb.mxu0 %v3184_v14  ;;  %995 = vmatpush.msrb.mxu2 %v3083_v46 }
  0x4a   :  { %1245 = vmatpush.msrb.mxu1 %v3179_v13 }
  0x4b   :  { %1226 = vmatpush.msrb.mxu0 %v3198_v18 }
  0x4c   :  { %1246 = vmatpush.msrb.mxu1 %v3193_v17 }
  0x4e   :  { %2592 = vmatmul.msk.f32.vlgmr.msra.gmra.mxu3 %vm90_vm0, %v2686_v16 }
  0x4f   :  { %902 = vmatpush.msra.mxu3 %v3088_v47 }
  0x50   :  { %2605 = vmatmul.msk.f32.vlgmr.msra.gmra.mxu2 %vm90_vm0, %v3104_v51 }
  0x51   :  { %1111 = vmatpush.msra.mxu2 %v3274_v11 }
  0x56   :  { %2599 = vmatmul.msk.f32.vlgmr.msrb.gmra.mxu3 %vm90_vm0, %v2688_v49 }
  0x57   :  { %1020 = vmatpush.msrb.mxu3 %v3088_v47 }
  0x58   :  { %2612 = vmatmul.msk.f32.vlgmr.msrb.gmra.mxu2 %vm90_vm0, %v3137_v1 }
  0x59   :  { %1274 = vmatpush.msrb.mxu2 %v3274_v11 }
  0x89   :  { %v111_v30 = vpop.f32.mrf.mxu0 }
  0x8a   :  { %v112_v31 = vadd.f32 %v3218_v25, %v111_v30  ;;  %v152_v32 = vpop.f32.mrf.mxu1 }
  0x8b   :  { %175 = vst [vmem:[#allocation3 + $0x30] sm:$0x3f] %v152_v32 }
  0x8c   :  { %v114_v33 = vmax.f32 %v112_v31, 0.0 }
  0x8e   :  { %v115_v37 = vsub.f32 0.0, %v114_v33 }
  0x90   :  { %v116_v38 = vmul.f32 1.442695, %v115_v37 }
  0x91   :  { %v234_v42 = vpop.f32.mrf.mxu0 }
  0x92   :  { %2689 = vpow2.f32 %v116_v38  ;;  %v235_v43 = vadd.f32 %v3218_v25, %v234_v42  ;;  %v269_v27 = vpop.f32.mrf.mxu1 }
  0x93   :  { %293 = vst [vmem:[#allocation3] sm:$0x3f] %v269_v27  ;;  %2691 = vpow2.f32 %v837_v44 }
  0x94   :  { %v237_v48 = vmax.f32 %v235_v43, 0.0 }
  0x96   :  { %v238_v29 = vsub.f32 0.0, %v237_v48 }
  0x98   :  { %v2690_v50 = vpop.eup %2689  ;;  %v239_v52 = vmul.f32 1.442695, %v238_v29 }
  0x99   :  { %119 = vst.msk [vmem:[#allocation2] sm:$0x3f] %vm118_vm2, %v2690_v50  ;;  %v352_v53 = vpop.f32.mrf.mxu0  ;;  %v2692_v58 = vpop.eup %2691 }
  0x9a   :  { %2693 = vpow2.f32 %v239_v52  ;;  %v353_v54 = vadd.f32 %v3218_v25, %v352_v53  ;;  %v387_v55 = vpop.f32.mrf.mxu1  ;;  %2606 = vmatmul.msk.f32.vlgmr.msra.gmra.mxu3 %vm90_vm0, %v2692_v58 }
  0x9b   :  { %411 = vst [vmem:[#allocation3 + $0x18] sm:$0x3f] %v387_v55  ;;  %2695 = vpow2.f32 %v955_v56 }
  0x9c   :  { %v355_v57 = vmax.f32 %v353_v54, 0.0 }
  0x9e   :  { %v356_v59 = vsub.f32 0.0, %v355_v57 }
  0xa0   :  { %v2694_v60 = vpop.eup %2693  ;;  %v1036_v61 = vld [vmem:[#allocation2] sm:$0x3f]  ;;  %v357_v41 = vmul.f32 1.442695, %v356_v59 }
  0xa1   :  { %v1037_v62 = vmul.f32 0.0, %v1036_v61  ;;  %242 = vst.msk [vmem:[#allocation2 + $0x8] sm:$0x3f] %vm118_vm2, %v2694_v60  ;;  %v470_v63 = vpop.f32.mrf.mxu0  ;;  %v2696_v2 = vpop.eup %2695 }
  0xa2   :  { %2697 = vpow2.f32 %v357_v41  ;;  %v471_v46 = vadd.f32 %v3218_v25, %v470_v63  ;;  %v505_v47 = vpop.f32.mrf.mxu1  ;;  %2613 = vmatmul.msk.f32.vlgmr.msrb.gmra.mxu3 %vm90_vm0, %v2696_v2  ;;  %v172_v16 = vpop.f32.mrf.mxu2 }
  0xa3   :  { %2615 = vmatmul.msk.f32.vlgmr.msra.gmra.mxu0 %vm1038_vm3, %v1037_v62  ;;  %2616 = vmatmul.msk.f32.vlgmr.msra.gmra.mxu1 %vm1038_vm3, %v1037_v62  ;;  %529 = vst [vmem:[#allocation3 + $0x10] sm:$0x3f] %v505_v47  ;;  %v3300_v62 = vld [vmem:[%s3727_s10] ss:$0 sm:$0xff] }
  0xa4   :  { %v473_v0 = vmax.f32 %v471_v46, 0.0  ;;  %1405 = vmatpush.msra.mxu1 %v3152_v4  ;;  %1385 = vmatpush.msra.mxu0 %v3157_v5 }
  0xa6   :  { %v474_v3 = vsub.f32 0.0, %v473_v0  ;;  %1406 = vmatpush.msra.mxu1 %v3162_v6  ;;  %1386 = vmatpush.msra.mxu0 %v3173_v12  ;;  %v1087_v0 = vld [vmem:[#allocation6] sm:$0x3f] }
  0xa8   :  { %v2698_v51 = vpop.eup %2697  ;;  %v475_v7 = vmul.f32 1.442695, %v474_v3  ;;  %1407 = vmatpush.msra.mxu1 %v3179_v13  ;;  %1387 = vmatpush.msra.mxu0 %v3184_v14 }
  0xa9   :  { %360 = vst.msk [vmem:[#allocation2 + $0x10] sm:$0x3f] %vm118_vm2, %v2698_v51  ;;  %v588_v8 = vpop.f32.mrf.mxu0  ;;  %v1086_v51 = vld [vmem:[#allocation5] sm:$0x3f] }
  0xaa   :  { %2699 = vpow2.f32 %v475_v7  ;;  %v589_v9 = vadd.f32 %v3218_v25, %v588_v8  ;;  %1408 = vmatpush.msra.mxu1 %v3193_v17  ;;  %1388 = vmatpush.msra.mxu0 %v3198_v18  ;;  %v623_v10 = vpop.f32.mrf.mxu1  ;;  %v289_v52 = vpop.f32.mrf.mxu2 }
  0xab   :  { %647 = vst [vmem:[#allocation3 + $0x8] sm:$0x3f] %v623_v10 }
  0xac   :  { %v591_v15 = vmax.f32 %v589_v9, 0.0 }
  0xae   :  { %v592_v19 = vsub.f32 0.0, %v591_v15 }
  0xaf   :  { %v196_v37 = vpop.f32.mrf.mxu3 }
  0xb0   :  { %v2700_v21 = vpop.eup %2699  ;;  %v593_v22 = vmul.f32 1.442695, %v592_v19  ;;  %v197_v39 = vadd.f32 %v196_v37, %v172_v16 }
  0xb1   :  { %478 = vst.msk [vmem:[#allocation2 + $0x18] sm:$0x3f] %vm118_vm2, %v2700_v21  ;;  %v706_v1 = vpop.f32.mrf.mxu0 }
  0xb2   :  { %2701 = vpow2.f32 %v593_v22  ;;  %v741_v24 = vpop.f32.mrf.mxu1  ;;  %v707_v26 = vadd.f32 %v3218_v25, %v706_v1  ;;  %v202_v43 = vadd.f32 %v3283_v36, %v197_v39  ;;  %v407_v56 = vpop.f32.mrf.mxu2 }
  0xb3   :  { %765 = vst [vmem:[#allocation3 + $0x20] sm:$0x3f] %v741_v24 }
  0xb4   :  { %v709_v28 = vmax.f32 %v707_v26, 0.0  ;;  %204 = vst.msk [vmem:[#allocation4] sm:$0x3f] %vm203_vm1, %v202_v43 }
  0xb6   :  { %v710_v30 = vsub.f32 0.0, %v709_v28 }
  0xb7   :  { %v314_v53 = vpop.f32.mrf.mxu3 }
  0xb8   :  { %v2702_v23 = vpop.eup %2701  ;;  %v711_v31 = vmul.f32 1.442695, %v710_v30  ;;  %v315_v54 = vadd.f32 %v314_v53, %v289_v52 }
  0xb9   :  { %596 = vst.msk [vmem:[#allocation2 + $0x20] sm:$0x3f] %vm118_vm2, %v2702_v23  ;;  %v824_v32 = vpop.f32.mrf.mxu0 }
  0xba   :  { %v859_v33 = vpop.f32.mrf.mxu1  ;;  %2703 = vpow2.f32 %v711_v31  ;;  %v825_v34 = vadd.f32 %v3218_v25, %v824_v32  ;;  %v317_v55 = vadd.f32 %v3283_v36, %v315_v54  ;;  %v525_v59 = vpop.f32.mrf.mxu2  ;;  %v3316_v32 = vld [vmem:[%s3733_s16] sm:$0xff] }
  0xbb   :  { %883 = vst [vmem:[#allocation3 + $0x28] sm:$0x3f] %v859_v33  ;;  %1152 = vmatpush.msra.mxu3 %v3316_v32  ;;  %v1116_v33 = vld [vmem:[#allocation4] sm:$0x3f] }
  0xbc   :  { %v827_v35 = vmax.f32 %v825_v34, 0.0  ;;  %319 = vst.msk [vmem:[#allocation4 + $0x8] sm:$0x3f] %vm203_vm1, %v317_v55  ;;  %v3323_v34 = vld [vmem:[%s3729_s12] ss:$0 sm:$0xff] }
  0xbd   :  { %1317 = vmatpush.msrb.mxu3 %v3316_v32  ;;  %v3336_v55 = vld [vmem:[%s3734_s17] ss:$0 sm:$0xff]  ;;  %s2830_s17 = smov 32  }
  0xbe   :  { %v828_v38 = vsub.f32 0.0, %v827_v35  ;;  %v1118_v35 = vsub.f32 1.0, %v1116_v33 }
  0xbf   :  { %v432_v57 = vpop.f32.mrf.mxu3 }
  0xc0   :  { %v2704_v40 = vpop.eup %2703  ;;  %v829_v42 = vmul.f32 1.442695, %v828_v38 }
  0xc1   :  { %714 = vst.msk [vmem:[#allocation2 + $0x28] sm:$0x3f] %vm118_vm2, %v2704_v40  ;;  %v942_v27 = vpop.f32.mrf.mxu0 }
  0xc2   :  { %v977_v44 = vpop.f32.mrf.mxu1  ;;  %2705 = vpow2.f32 %v829_v42  ;;  %v943_v45 = vadd.f32 %v3218_v25, %v942_v27  ;;  %v433_v25 = vadd.f32 %v432_v57, %v407_v56  ;;  %v643_v63 = vpop.f32.mrf.mxu2  ;;  %v1157_v56 = vld [vmem:[#allocation3 + $0x30] sm:$0x3f] }
  0xc4   :  { %v945_v48 = vmax.f32 %v943_v45, 0.0  ;;  %v435_v58 = vadd.f32 %v3283_v36, %v433_v25 }
  0xc6   :  { %v946_v49 = vsub.f32 0.0, %v945_v48  ;;  %437 = vst.msk [vmem:[#allocation4 + $0x10] sm:$0x3f] %vm203_vm1, %v435_v58 }
  0xc8   :  { %v2706_v29 = vpop.eup %2705  ;;  %v947_v50 = vmul.f32 1.442695, %v946_v49 }
  0xc9   :  { %832 = vst.msk [vmem:[#allocation2 + $0x30] sm:$0x3f] %vm118_vm2, %v2706_v29  ;;  %v550_v60 = vpop.f32.mrf.mxu3 }
  0xca   :  { %2707 = vpow2.f32 %v947_v50  ;;  %v551_v61 = vadd.f32 %v550_v60, %v525_v59 }
  0xcb   :  { %v761_v10 = vpop.f32.mrf.mxu2 }
  0xcc   :  { %v553_v41 = vadd.f32 %v3283_v36, %v551_v61 }
  0xce   :  { %555 = vst.msk [vmem:[#allocation4 + $0x18] sm:$0x3f] %vm203_vm1, %v553_v41 }
  0xd0   :  { %v2708_v20 = vpop.eup %2707 }
  0xd1   :  { %950 = vst.msk [vmem:[#allocation2 + $0x38] sm:$0x3f] %vm118_vm2, %v2708_v20  ;;  %v668_v46 = vpop.f32.mrf.mxu3 }
  0xd2   :  { %v669_v2 = vadd.f32 %v668_v46, %v643_v63 }
  0xd3   :  { %v879_v22 = vpop.f32.mrf.mxu2 }
  0xd4   :  { %v671_v7 = vadd.f32 %v3283_v36, %v669_v2 }
  0xd6   :  { %673 = vst.msk [vmem:[#allocation4 + $0x20] sm:$0x3f] %vm203_vm1, %v671_v7 }
  0xd9   :  { %v786_v15 = vpop.f32.mrf.mxu3 }
  0xda   :  { %v787_v19 = vadd.f32 %v786_v15, %v761_v10 }
  0xdb   :  { %v997_v26 = vpop.f32.mrf.mxu2 }
  0xdc   :  { %v789_v21 = vadd.f32 %v3283_v36, %v787_v19 }
  0xde   :  { %791 = vst.msk [vmem:[#allocation4 + $0x28] sm:$0x3f] %vm203_vm1, %v789_v21 }
 0x11d   :  { %v904_v23 = vpop.f32.mrf.mxu3 }
 0x11e   :  { %v905_v1 = vadd.f32 %v904_v23, %v879_v22  ;;  %v1200_v23 = vld [vmem:[#allocation2 + $0x8] sm:$0x3f] }
 0x120   :  { %v1079_v47 = vpop.f32.mrf.mxu1  ;;  %v907_v24 = vadd.f32 %v3283_v36, %v905_v1  ;;  %v1059_v52 = vpop.f32.mrf.mxu0 }
 0x121   :  { %v1085_v3 = vadd.f32 %v3300_v62, %v1079_v47 }
 0x122   :  { %909 = vst.msk [vmem:[#allocation4 + $0x30] sm:$0x3f] %vm203_vm1, %v907_v24 }
 0x123   :  { %v1088_v8 = vmul.f32 %v1087_v0, %v1085_v3  ;;  %v1119_v39 = vmul.f32 %v1118_v35, %v1085_v3 }
 0x125   :  { %v1089_v9 = vadd.f32 %v1088_v8, %v1086_v51  ;;  %v1022_v28 = vpop.f32.mrf.mxu3 }
 0x126   :  { %v1023_v30 = vadd.f32 %v1022_v28, %v997_v26 }
 0x127   :  { %2617 = vmatmul.msk.f32.vlgmr.msra.gmra.mxu2 %vm90_vm0, %v1089_v9 }
 0x128   :  { %1436 = vmatpush.msra.mxu2 %v3274_v11  ;;  %v1025_v31 = vadd.f32 %v3283_v36, %v1023_v30  ;;  %v1123_v36 = vld [vmem:[%s3747_s26] sm:$0x3f] }
 0x129   :  { %v1124_v40 = vsub.f32 %v1123_v36, %v1085_v3 }
 0x12a   :  { %1027 = vst.msk [vmem:[#allocation4 + $0x38] sm:$0x3f] %vm203_vm1, %v1025_v31 }
 0x12b   :  { %v1125_v45 = vand.u32 2147483647, %v1124_v40  ;;  %v2623_v40 = vld [vmem:[%s3747_s26 + $0x8] sm:$0x3f] }
 0x1aa   :  { %v1113_v16 = vpop.f32.mrf.mxu2 }
 0x1ab   :  { %v1114_v37 = vadd.f32 %v3323_v34, %v1113_v16  ;;  %v1252_v16 = vld [vmem:[#allocation5 + $0x8] sm:$0x3f] }
 0x1ad   :  { %v1117_v38 = vmul.f32 %v1116_v33, %v1114_v37  ;;  %v1126_v42 = vsub.f32 %v1123_v36, %v1114_v37  ;;  %v1253_v33 = vld [vmem:[#allocation6 + $0x8] sm:$0x3f] }
 0x1af   :  { %v1120_v43 = vadd.f32 %v1119_v39, %v1117_v38  ;;  %v1127_v27 = vand.u32 2147483647, %v1126_v42  ;;  %v1279_v38 = vld [vmem:[#allocation4 + $0x8] sm:$0x3f] }
 0x1b1   :  { %v1121_v44 = vmul.f32 %v1120_v43, %v1087_v0  ;;  %v1129_v48 = vsub.f32 %v1123_v36, %v1120_v43  ;;  %v1128_v29 = vadd.f32 %v1127_v27, %v1125_v45  ;;  %v1281_v43 = vsub.f32 1.0, %v1279_v38 }
 0x1b3   :  { %v1122_v49 = vadd.f32 %v1121_v44, %v1086_v51  ;;  %v1130_v50 = vand.u32 2147483647, %v1129_v48 }
 0x1b5   :  { %v1131_v20 = vadd.f32 %v1130_v50, %v1128_v29  ;;  %1133 = vst.msk [vmem:[#allocation7] sm:$0x3f] %vm203_vm1, %v1122_v49  ;;  %2618 = vmatmul.msk.f32.vlgmr.msra.gmra.mxu3 %vm90_vm0, %v1122_v49 }
 0x1b6   :  { %1479 = vmatpush.msra.mxu3 %v3316_v32 }
 0x1b7   :  { %1132 = vst.msk [vmem:[#allocation8] sm:$0x3f] %vm203_vm1, %v1131_v20 }
 0x238   :  { %v1154_v53 = vpop.f32.mrf.mxu3 }
 0x239   :  { %v1155_v54 = vadd.f32 %v1154_v53, %v1059_v52 }
 0x23b   :  { %v1158_v57 = vadd.f32 %v1157_v56, %v1155_v54 }
 0x23d   :  { %v1162_v25 = vadd.f32 %v3336_v55, %v1158_v57 }
 0x23f   :  { %2709 = vtanh.f32 %v1162_v25  ;;  %v2619_v59 = vmul.f32 -1.442695, %v1162_v25 }
 0x241   :  { %2711 = vpow2.f32 %v2619_v59 }
 0x245   :  { %v2710_v58 = vpop.eup %2709 }
 0x246   :  { %1185 = vrot.lane.b32.xlu0 %v2710_v58, %s2829_s3 }
 0x247   :  { %v2712_v60 = vpop.eup %2711 }
 0x248   :  { %v1166_v61 = vadd.f32 1.0, %v2712_v60  ;;  %v1322_v60 = vld [vmem:[#allocation3] sm:$0x3f] }
 0x24a   :  { %2713 = vrcp.f32 %v1166_v61  ;;  %v1178_v2 = vand.u32 2147483648, %v1166_v61  ;;  %vm1172_vm5 = vweird.f32 %v1166_v61  ;;  %v1176_v3 = vand.u32 2147483647, %v1166_v61 }
 0x24c   :  { %v1179_v7 = vor.u32 1.1754944e-38, %v1178_v2  ;;  %vm1177_vm7 = vcmp.eq.f32.partialorder %v1176_v3, 8.507059e+37 }
 0x250   :  { %v2714_v41 = vpop.eup %2713 }
 0x251   :  { %v1168_v63 = vmul.f32 %v2714_v41, %v1166_v61  ;;  %vm1173_vm4 = vweird.f32 %v2714_v41 }
 0x252   :  { %vm1174_vm6 = vmor %vm1172_vm5, %vm1173_vm4 }
 0x253   :  { %v1169_v46 = vsub.f32 1.0, %v1168_v63 }
 0x255   :  { %v1170_v47 = vmul.f32 %v2714_v41, %v1169_v46  ;;  %v1362_v46 = vld [vmem:[#allocation2 + $0x10] sm:$0x3f] }
 0x257   :  { %v1171_v0 = vadd.f32 %v2714_v41, %v1170_v47 }
 0x259   :  { %v1175_v51 = vsel %vm1174_vm6, %v2714_v41, %v1171_v0 }
 0x25a   :  { %v1180_v9 = vsel %vm1177_vm7, %v1179_v7, %v1175_v51 }
 0x25b   :  { %v1183_v15 = vmul.f32 0.0, %v1180_v9 }
 0x2b8   :  { %v1186_v8 = vpop.permute.xlu0 %1185 }
 0x2b9   :  { %v1188_v10 = vmul.f32 %v1186_v8, %v1180_v9 }
 0x2bb   :  { %1190 = vrot.lane.b32.xlu0 %v1188_v10, %s2830_s17 }
 0x32d   :  { %v1191_v19 = vpop.permute.xlu0 %1190 }
 0x32e   :  { %v3341_v21 = vadd.f32 %v1191_v19, %v1183_v15 }
 0x330   :  { %2715 = vtanh.f32 %v3341_v21 }
 0x336   :  { %v2716_v22 = vpop.eup %2715 }
 0x337   :  { %1196 = vrot.lane.b32.xlu1 %v2716_v22, %s2829_s3 }
 0x33f   :  { %1202 = vrot.lane.b32.xlu1 %v1200_v23, %s2831_s27 }
 0x3a9   :  { %v1197_v1 = vpop.permute.xlu1 %1196 }
 0x3aa   :  { %v1199_v24 = vmul.f32 %v1197_v1, %v1180_v9 }
 0x3b1   :  { %v1203_v26 = vpop.permute.xlu1 %1202 }
 0x3b2   :  { %v1205_v28 = vmul.f32 %v1203_v26, %v1199_v24 }
 0x3b4   :  { %1207 = vrot.lane.b32.xlu2 %v1205_v28, %s2830_s17 }
 0x40e   :  { %v1208_v30 = vpop.permute.xlu2 %1207 }
 0x40f   :  { %2620 = vmatmul.msk.f32.vlgmr.msrb.gmra.mxu0 %vm1038_vm3, %v1208_v30  ;;  %2621 = vmatmul.msk.f32.vlgmr.msrb.gmra.mxu1 %vm1038_vm3, %v1208_v30 }
 0x410   :  { %1567 = vmatpush.msrb.mxu1 %v3152_v4  ;;  %1547 = vmatpush.msrb.mxu0 %v3157_v5 }
 0x412   :  { %1568 = vmatpush.msrb.mxu1 %v3162_v6  ;;  %1548 = vmatpush.msrb.mxu0 %v3173_v12 }
 0x414   :  { %1569 = vmatpush.msrb.mxu1 %v3179_v13  ;;  %1549 = vmatpush.msrb.mxu0 %v3184_v14 }
 0x416   :  { %1570 = vmatpush.msrb.mxu1 %v3193_v17  ;;  %1550 = vmatpush.msrb.mxu0 %v3198_v18 }
 0x48c   :  { %v1248_v31 = vpop.f32.mrf.mxu1  ;;  %v1228_v25 = vpop.f32.mrf.mxu0 }
 0x48d   :  { %v1251_v35 = vadd.f32 %v3300_v62, %v1248_v31 }
 0x48f   :  { %v1254_v36 = vmul.f32 %v1253_v33, %v1251_v35  ;;  %v1282_v44 = vmul.f32 %v1281_v43, %v1251_v35  ;;  %v1287_v45 = vsub.f32 %v2623_v40, %v1251_v35 }
 0x491   :  { %v1255_v37 = vadd.f32 %v1254_v36, %v1252_v16  ;;  %v1288_v20 = vand.u32 2147483647, %v1287_v45  ;;  %v2629_v45 = vld [vmem:[%s3747_s26 + $0x10] sm:$0x3f] }
 0x493   :  { %2622 = vmatmul.msk.f32.vlgmr.msrb.gmra.mxu2 %vm90_vm0, %v1255_v37 }
 0x494   :  { %1598 = vmatpush.msrb.mxu2 %v3274_v11 }
 0x516   :  { %v1276_v39 = vpop.f32.mrf.mxu2 }
 0x517   :  { %v1277_v42 = vadd.f32 %v3323_v34, %v1276_v39 }
 0x519   :  { %v1280_v27 = vmul.f32 %v1279_v38, %v1277_v42  ;;  %v1289_v48 = vsub.f32 %v2623_v40, %v1277_v42  ;;  %v1415_v38 = vld [vmem:[#allocation6 + $0x10] sm:$0x3f] }
 0x51b   :  { %v1283_v49 = vadd.f32 %v1282_v44, %v1280_v27  ;;  %v1290_v29 = vand.u32 2147483647, %v1289_v48  ;;  %v1441_v27 = vld [vmem:[#allocation4 + $0x10] sm:$0x3f] }
 0x51d   :  { %v1284_v50 = vmul.f32 %v1283_v49, %v1253_v33  ;;  %v1292_v52 = vsub.f32 %v2623_v40, %v1283_v49  ;;  %v1291_v54 = vadd.f32 %v1290_v29, %v1288_v20  ;;  %v1414_v40 = vld [vmem:[#allocation5 + $0x10] sm:$0x3f]  ;;  %v1443_v49 = vsub.f32 1.0, %v1441_v27 }
 0x51f   :  { %v1285_v53 = vadd.f32 %v1284_v50, %v1252_v16  ;;  %v1293_v56 = vand.u32 2147483647, %v1292_v52 }
 0x521   :  { %v1294_v57 = vadd.f32 %v1293_v56, %v1291_v54  ;;  %1298 = vst.msk [vmem:[#allocation7 + $0x8] sm:$0x3f] %vm203_vm1, %v1285_v53  ;;  %2624 = vmatmul.msk.f32.vlgmr.msrb.gmra.mxu3 %vm90_vm0, %v1285_v53 }
 0x522   :  { %1641 = vmatpush.msrb.mxu3 %v3316_v32 }
 0x523   :  { %1296 = vst.msk [vmem:[#allocation8 + $0x8] sm:$0x3f] %vm203_vm1, %v1294_v57 }
 0x5a4   :  { %v1319_v58 = vpop.f32.mrf.mxu3 }
 0x5a5   :  { %v1320_v59 = vadd.f32 %v1319_v58, %v1228_v25 }
 0x5a7   :  { %v1323_v61 = vadd.f32 %v1322_v60, %v1320_v59 }
 0x5a9   :  { %v1324_v41 = vadd.f32 %v3336_v55, %v1323_v61 }
 0x5ab   :  { %2717 = vtanh.f32 %v1324_v41  ;;  %v2625_v47 = vmul.f32 -1.442695, %v1324_v41 }
 0x5ad   :  { %2719 = vpow2.f32 %v2625_v47  ;;  %v1484_v47 = vld [vmem:[#allocation3 + $0x18] sm:$0x3f] }
 0x5b1   :  { %v2718_v63 = vpop.eup %2717 }
 0x5b2   :  { %1347 = vrot.lane.b32.xlu2 %v2718_v63, %s2829_s3 }
 0x5b3   :  { %v2720_v0 = vpop.eup %2719 }
 0x5b4   :  { %v1328_v2 = vadd.f32 1.0, %v2720_v0 }
 0x5b6   :  { %2721 = vrcp.f32 %v1328_v2  ;;  %v1340_v10 = vand.u32 2147483648, %v1328_v2  ;;  %vm1334_vm9 = vweird.f32 %v1328_v2  ;;  %v1338_v15 = vand.u32 2147483647, %v1328_v2 }
 0x5b8   :  { %v1341_v22 = vor.u32 1.1754944e-38, %v1340_v10  ;;  %vm1339_vm11 = vcmp.eq.f32.partialorder %v1338_v15, 8.507059e+37 }
 0x5ba   :  { %1364 = vrot.lane.b32.xlu2 %v1362_v46, %s2831_s27 }
 0x5bc   :  { %v2722_v3 = vpop.eup %2721 }
 0x5bd   :  { %v1330_v51 = vmul.f32 %v2722_v3, %v1328_v2  ;;  %vm1335_vm8 = vweird.f32 %v2722_v3 }
 0x5be   :  { %vm1336_vm10 = vmor %vm1334_vm9, %vm1335_vm8 }
 0x5bf   :  { %v1331_v7 = vsub.f32 1.0, %v1330_v51  ;;  %v1524_v51 = vld [vmem:[#allocation2 + $0x18] sm:$0x3f] }
 0x5c1   :  { %v1332_v8 = vmul.f32 %v2722_v3, %v1331_v7 }
 0x5c3   :  { %v1333_v9 = vadd.f32 %v2722_v3, %v1332_v8 }
 0x5c5   :  { %v1337_v19 = vsel %vm1336_vm10, %v2722_v3, %v1333_v9 }
 0x5c6   :  { %v1342_v1 = vsel %vm1339_vm11, %v1341_v22, %v1337_v19 }
 0x5c7   :  { %v1345_v26 = vmul.f32 %v1342_v1, %v3341_v21 }
 0x60c   :  { %v1348_v23 = vpop.permute.xlu2 %1347 }
 0x60d   :  { %v1350_v24 = vmul.f32 %v1348_v23, %v1342_v1 }
 0x60f   :  { %1352 = vrot.lane.b32.xlu0 %v1350_v24, %s2830_s17 }
 0x614   :  { %v1365_v16 = vpop.permute.xlu2 %1364 }
 0x681   :  { %v1353_v28 = vpop.permute.xlu0 %1352 }
 0x682   :  { %v3373_v30 = vadd.f32 %v1353_v28, %v1345_v26 }
 0x684   :  { %2723 = vtanh.f32 %v3373_v30 }
 0x68a   :  { %v2724_v31 = vpop.eup %2723 }
 0x68b   :  { %1358 = vrot.lane.b32.xlu1 %v2724_v31, %s2829_s3 }
 0x6fd   :  { %v1359_v33 = vpop.permute.xlu1 %1358 }
 0x6fe   :  { %v1361_v35 = vmul.f32 %v1359_v33, %v1342_v1 }
 0x700   :  { %v1367_v36 = vmul.f32 %v1365_v16, %v1361_v35 }
 0x702   :  { %1369 = vrot.lane.b32.xlu0 %v1367_v36, %s2830_s17 }
 0x774   :  { %v1370_v37 = vpop.permute.xlu0 %1369 }
 0x775   :  { %2626 = vmatmul.msk.f32.vlgmr.msra.gmra.mxu0 %vm1038_vm3, %v1370_v37  ;;  %2627 = vmatmul.msk.f32.vlgmr.msra.gmra.mxu1 %vm1038_vm3, %v1370_v37 }
 0x776   :  { %1729 = vmatpush.msra.mxu1 %v3152_v4  ;;  %1709 = vmatpush.msra.mxu0 %v3157_v5 }
 0x778   :  { %1730 = vmatpush.msra.mxu1 %v3162_v6  ;;  %1710 = vmatpush.msra.mxu0 %v3173_v12 }
 0x77a   :  { %1731 = vmatpush.msra.mxu1 %v3179_v13  ;;  %1711 = vmatpush.msra.mxu0 %v3184_v14 }
 0x77c   :  { %1732 = vmatpush.msra.mxu1 %v3193_v17  ;;  %1712 = vmatpush.msra.mxu0 %v3198_v18 }
 0x7f2   :  { %v1410_v21 = vpop.f32.mrf.mxu1  ;;  %v1390_v41 = vpop.f32.mrf.mxu0 }
 0x7f3   :  { %v1413_v39 = vadd.f32 %v3300_v62, %v1410_v21 }
 0x7f5   :  { %v1416_v42 = vmul.f32 %v1415_v38, %v1413_v39  ;;  %v1444_v50 = vmul.f32 %v1443_v49, %v1413_v39  ;;  %v1449_v20 = vsub.f32 %v2629_v45, %v1413_v39 }
 0x7f7   :  { %v1417_v43 = vadd.f32 %v1416_v42, %v1414_v40  ;;  %v1450_v57 = vand.u32 2147483647, %v1449_v20 }
 0x7f9   :  { %2628 = vmatmul.msk.f32.vlgmr.msra.gmra.mxu2 %vm90_vm0, %v1417_v43 }
 0x7fa   :  { %1760 = vmatpush.msra.mxu2 %v3274_v11 }
 0x87c   :  { %v1438_v44 = vpop.f32.mrf.mxu2 }
 0x87d   :  { %v1439_v48 = vadd.f32 %v3323_v34, %v1438_v44 }
 0x87f   :  { %v1442_v29 = vmul.f32 %v1441_v27, %v1439_v48  ;;  %v1451_v52 = vsub.f32 %v2629_v45, %v1439_v48  ;;  %v1577_v27 = vld [vmem:[#allocation6 + $0x18] sm:$0x3f] }
 0x881   :  { %v1445_v53 = vadd.f32 %v1444_v50, %v1442_v29  ;;  %v1452_v54 = vand.u32 2147483647, %v1451_v52 }
 0x883   :  { %v1446_v56 = vmul.f32 %v1445_v53, %v1415_v38  ;;  %v1454_v25 = vsub.f32 %v2629_v45, %v1445_v53  ;;  %v1453_v59 = vadd.f32 %v1452_v54, %v1450_v57  ;;  %v1576_v45 = vld [vmem:[#allocation5 + $0x18] sm:$0x3f] }
 0x885   :  { %v1447_v58 = vadd.f32 %v1446_v56, %v1414_v40  ;;  %v1455_v60 = vand.u32 2147483647, %v1454_v25 }
 0x887   :  { %v1456_v61 = vadd.f32 %v1455_v60, %v1453_v59  ;;  %1460 = vst.msk [vmem:[#allocation7 + $0x10] sm:$0x3f] %vm203_vm1, %v1447_v58  ;;  %2630 = vmatmul.msk.f32.vlgmr.msra.gmra.mxu3 %vm90_vm0, %v1447_v58 }
 0x888   :  { %1803 = vmatpush.msra.mxu3 %v3316_v32 }
 0x889   :  { %1458 = vst.msk [vmem:[#allocation8 + $0x10] sm:$0x3f] %vm203_vm1, %v1456_v61 }
 0x90a   :  { %v1481_v63 = vpop.f32.mrf.mxu3 }
 0x90b   :  { %v1482_v46 = vadd.f32 %v1481_v63, %v1390_v41  ;;  %v1646_v41 = vld [vmem:[#allocation3 + $0x10] sm:$0x3f] }
 0x90d   :  { %v1485_v0 = vadd.f32 %v1484_v47, %v1482_v46 }
 0x90f   :  { %v1486_v2 = vadd.f32 %v3336_v55, %v1485_v0  ;;  %v1686_v0 = vld [vmem:[#allocation2 + $0x20] sm:$0x3f] }
 0x911   :  { %2725 = vtanh.f32 %v1486_v2  ;;  %v2631_v7 = vmul.f32 -1.442695, %v1486_v2 }
 0x913   :  { %2727 = vpow2.f32 %v2631_v7 }
 0x917   :  { %v2726_v3 = vpop.eup %2725 }
 0x918   :  { %1509 = vrot.lane.b32.xlu1 %v2726_v3, %s2829_s3 }
 0x919   :  { %v2728_v8 = vpop.eup %2727 }
 0x91a   :  { %v1490_v9 = vadd.f32 1.0, %v2728_v8 }
 0x91c   :  { %2729 = vrcp.f32 %v1490_v9  ;;  %v1502_v1 = vand.u32 2147483648, %v1490_v9  ;;  %vm1496_vm13 = vweird.f32 %v1490_v9  ;;  %v1500_v24 = vand.u32 2147483647, %v1490_v9 }
 0x91e   :  { %v1503_v28 = vor.u32 1.1754944e-38, %v1502_v1  ;;  %vm1501_vm15 = vcmp.eq.f32.partialorder %v1500_v24, 8.507059e+37 }
 0x920   :  { %1526 = vrot.lane.b32.xlu1 %v1524_v51, %s2831_s27 }
 0x922   :  { %v2730_v10 = vpop.eup %2729 }
 0x923   :  { %v1492_v15 = vmul.f32 %v2730_v10, %v1490_v9  ;;  %vm1497_vm12 = vweird.f32 %v2730_v10 }
 0x924   :  { %vm1498_vm14 = vmor %vm1496_vm13, %vm1497_vm12 }
 0x925   :  { %v1493_v19 = vsub.f32 1.0, %v1492_v15 }
 0x927   :  { %v1494_v22 = vmul.f32 %v2730_v10, %v1493_v19 }
 0x929   :  { %v1495_v23 = vadd.f32 %v2730_v10, %v1494_v22 }
 0x92b   :  { %v1499_v26 = vsel %vm1498_vm14, %v2730_v10, %v1495_v23 }
 0x92c   :  { %v1504_v33 = vsel %vm1501_vm15, %v1503_v28, %v1499_v26 }
 0x92d   :  { %v1507_v16 = vmul.f32 %v1504_v33, %v3373_v30 }
 0x98a   :  { %v1510_v31 = vpop.permute.xlu1 %1509 }
 0x98b   :  { %v1512_v35 = vmul.f32 %v1510_v31, %v1504_v33 }
 0x98d   :  { %1514 = vrot.lane.b32.xlu2 %v1512_v35, %s2830_s17 }
 0x992   :  { %v1527_v40 = vpop.permute.xlu1 %1526 }
 0x9e7   :  { %v1515_v36 = vpop.permute.xlu2 %1514 }
 0x9e8   :  { %v3404_v37 = vadd.f32 %v1515_v36, %v1507_v16 }
 0x9ea   :  { %2731 = vtanh.f32 %v3404_v37 }
 0x9f0   :  { %v2732_v21 = vpop.eup %2731 }
 0x9f1   :  { %1520 = vrot.lane.b32.xlu0 %v2732_v21, %s2829_s3 }
 0xa63   :  { %v1521_v38 = vpop.permute.xlu0 %1520 }
 0xa64   :  { %v1523_v39 = vmul.f32 %v1521_v38, %v1504_v33 }
 0xa66   :  { %v1529_v42 = vmul.f32 %v1527_v40, %v1523_v39 }
 0xa68   :  { %1531 = vrot.lane.b32.xlu2 %v1529_v42, %s2830_s17  ;;  %v2768_v42 = vld [vmem:[%s3726_s9 + $0x30] sm:$0xff] }
 0xac2   :  { %v1532_v43 = vpop.permute.xlu2 %1531 }
 0xac3   :  { %2632 = vmatmul.msk.f32.vlgmr.msrb.gmra.mxu0 %vm1038_vm3, %v1532_v43  ;;  %2633 = vmatmul.msk.f32.vlgmr.msrb.gmra.mxu1 %vm1038_vm3, %v1532_v43  ;;  %v3454_v43 = vld [vmem:[%s3726_s9 + $0x28] sm:$0xff] }
 0xac4   :  { %1891 = vmatpush.msrb.mxu1 %v3152_v4  ;;  %1871 = vmatpush.msrb.mxu0 %v3157_v5  ;;  %v1603_v5 = vld [vmem:[#allocation4 + $0x18] sm:$0x3f] }
 0xac6   :  { %1892 = vmatpush.msrb.mxu1 %v3162_v6  ;;  %1872 = vmatpush.msrb.mxu0 %v3173_v12  ;;  %v2635_v12 = vld [vmem:[%s3747_s26 + $0x18] sm:$0x3f] }
 0xac8   :  { %1893 = vmatpush.msrb.mxu1 %v3179_v13  ;;  %1873 = vmatpush.msrb.mxu0 %v3184_v14  ;;  %v1605_v14 = vsub.f32 1.0, %v1603_v5 }
 0xaca   :  { %1894 = vmatpush.msrb.mxu1 %v3193_v17  ;;  %1874 = vmatpush.msrb.mxu0 %v3198_v18 }
 0xb40   :  { %v1572_v30 = vpop.f32.mrf.mxu1  ;;  %v1552_v59 = vpop.f32.mrf.mxu0 }
 0xb41   :  { %v1575_v44 = vadd.f32 %v3300_v62, %v1572_v30  ;;  %v2770_v30 = vld [vmem:[%s3726_s9 + $0x20] sm:$0xff] }
 0xb43   :  { %v1578_v4 = vmul.f32 %v1577_v27, %v1575_v44  ;;  %v1606_v18 = vmul.f32 %v1605_v14, %v1575_v44  ;;  %v1611_v49 = vsub.f32 %v2635_v12, %v1575_v44  ;;  %v2772_v44 = vld [vmem:[%s3726_s9 + $0x10] sm:$0xff] }
 0xb45   :  { %v1579_v48 = vadd.f32 %v1578_v4, %v1576_v45  ;;  %v1612_v53 = vand.u32 2147483647, %v1611_v49  ;;  %v2774_v4 = vld [vmem:[%s3726_s9] sm:$0xff] }
 0xb46   :  { %v2641_v49 = vld [vmem:[%s3747_s26 + $0x20] sm:$0x3f] }
 0xb47   :  { %2634 = vmatmul.msk.f32.vlgmr.msrb.gmra.mxu2 %vm90_vm0, %v1579_v48 }
 0xb48   :  { %1922 = vmatpush.msrb.mxu2 %v3274_v11 }
 0xbca   :  { %v1600_v6 = vpop.f32.mrf.mxu2 }
 0xbcb   :  { %v1601_v13 = vadd.f32 %v3323_v34, %v1600_v6 }
 0xbcd   :  { %v1604_v17 = vmul.f32 %v1603_v5, %v1601_v13  ;;  %v1613_v29 = vsub.f32 %v2635_v12, %v1601_v13  ;;  %v1739_v5 = vld [vmem:[#allocation6 + $0x20] sm:$0x3f] }
 0xbcf   :  { %v1607_v50 = vadd.f32 %v1606_v18, %v1604_v17  ;;  %v1614_v20 = vand.u32 2147483647, %v1613_v29  ;;  %v1765_v17 = vld [vmem:[#allocation4 + $0x20] sm:$0x3f] }
 0xbd1   :  { %v1608_v52 = vmul.f32 %v1607_v50, %v1577_v27  ;;  %v1616_v54 = vsub.f32 %v2635_v12, %v1607_v50  ;;  %v1615_v57 = vadd.f32 %v1614_v20, %v1612_v53  ;;  %v3463_v27 = vld [vmem:[%s3726_s9 + $0x18] sm:$0xff]  ;;  %v1738_v12 = vld [vmem:[#allocation5 + $0x20] sm:$0x3f]  ;;  %v1767_v50 = vsub.f32 1.0, %v1765_v17 }
 0xbd3   :  { %v1609_v56 = vadd.f32 %v1608_v52, %v1576_v45  ;;  %v1617_v25 = vand.u32 2147483647, %v1616_v54  ;;  %v3472_v45 = vld [vmem:[%s3726_s9 + $0x8] sm:$0xff] }
 0xbd5   :  { %v1618_v58 = vadd.f32 %v1617_v25, %v1615_v57  ;;  %1622 = vst.msk [vmem:[#allocation7 + $0x18] sm:$0x3f] %vm203_vm1, %v1609_v56  ;;  %2636 = vmatmul.msk.f32.vlgmr.msrb.gmra.mxu3 %vm90_vm0, %v1609_v56 }
 0xbd6   :  { %1965 = vmatpush.msrb.mxu3 %v3316_v32 }
 0xbd7   :  { %1620 = vst.msk [vmem:[#allocation8 + $0x18] sm:$0x3f] %vm203_vm1, %v1618_v58 }
 0xc58   :  { %v1643_v60 = vpop.f32.mrf.mxu3 }
 0xc59   :  { %v1644_v61 = vadd.f32 %v1643_v60, %v1552_v59 }
 0xc5b   :  { %v1647_v63 = vadd.f32 %v1646_v41, %v1644_v61 }
 0xc5d   :  { %v1648_v46 = vadd.f32 %v3336_v55, %v1647_v63 }
 0xc5f   :  { %2733 = vtanh.f32 %v1648_v46  ;;  %v2637_v2 = vmul.f32 -1.442695, %v1648_v46 }
 0xc61   :  { %2735 = vpow2.f32 %v2637_v2  ;;  %v1808_v2 = vld [vmem:[#allocation3 + $0x8] sm:$0x3f] }
 0xc65   :  { %v2734_v47 = vpop.eup %2733 }
 0xc66   :  { %1671 = vrot.lane.b32.xlu0 %v2734_v47, %s2829_s3 }
 0xc67   :  { %v2736_v3 = vpop.eup %2735 }
 0xc68   :  { %v1652_v51 = vadd.f32 1.0, %v2736_v3 }
 0xc6a   :  { %2737 = vrcp.f32 %v1652_v51  ;;  %v1664_v19 = vand.u32 2147483648, %v1652_v51  ;;  %vm1658_vm4 = vweird.f32 %v1652_v51  ;;  %v1662_v22 = vand.u32 2147483647, %v1652_v51 }
 0xc6c   :  { %v1665_v1 = vor.u32 1.1754944e-38, %v1664_v19  ;;  %vm1663_vm6 = vcmp.eq.f32.partialorder %v1662_v22, 8.507059e+37 }
 0xc6e   :  { %1688 = vrot.lane.b32.xlu0 %v1686_v0, %s2831_s27 }
 0xc70   :  { %v2738_v7 = vpop.eup %2737 }
 0xc71   :  { %v1654_v8 = vmul.f32 %v2738_v7, %v1652_v51  ;;  %vm1659_vm2 = vweird.f32 %v2738_v7 }
 0xc72   :  { %vm1660_vm5 = vmor %vm1658_vm4, %vm1659_vm2 }
 0xc73   :  { %v1655_v9 = vsub.f32 1.0, %v1654_v8  ;;  %v1848_v8 = vld [vmem:[#allocation2 + $0x28] sm:$0x3f] }
 0xc75   :  { %v1656_v10 = vmul.f32 %v2738_v7, %v1655_v9 }
 0xc77   :  { %v1657_v15 = vadd.f32 %v2738_v7, %v1656_v10 }
 0xc79   :  { %v1661_v23 = vsel %vm1660_vm5, %v2738_v7, %v1657_v15 }
 0xc7a   :  { %v1666_v26 = vsel %vm1663_vm6, %v1665_v1, %v1661_v23  ;;  %vm2519_vm6 = vcmask 58368  }
 0xc7b   :  { %v1669_v31 = vmul.f32 %v1666_v26, %v3404_v37  ;;  %v3445_v37 = vld [vmem:[%s3726_s9 + $0x38] sm:$0xff]  ;;  %s2535_s9 = sshll.u32 %s3735_s18, 4  ;;  %s2536_s9 = int_to_ptr.hbm [resolvable:$true] %s2535_s9 }
 0xcd8   :  { %v1672_v24 = vpop.permute.xlu0 %1671 }
 0xcd9   :  { %v1674_v28 = vmul.f32 %v1672_v24, %v1666_v26 }
 0xcdb   :  { %1676 = vrot.lane.b32.xlu1 %v1674_v28, %s2830_s17 }
 0xce0   :  { %v1689_v38 = vpop.permute.xlu0 %1688 }
 0xd4d   :  { %v1677_v33 = vpop.permute.xlu1 %1676 }
 0xd4e   :  { %v3435_v35 = vadd.f32 %v1677_v33, %v1669_v31 }
 0xd50   :  { %2739 = vtanh.f32 %v3435_v35 }
 0xd56   :  { %v2740_v16 = vpop.eup %2739 }
 0xd57   :  { %1682 = vrot.lane.b32.xlu2 %v2740_v16, %s2829_s3 }
 0xdb1   :  { %v1683_v36 = vpop.permute.xlu2 %1682 }
 0xdb2   :  { %v1685_v21 = vmul.f32 %v1683_v36, %v1666_v26 }
 0xdb4   :  { %v1691_v39 = vmul.f32 %v1689_v38, %v1685_v21 }
 0xdb6   :  { %1693 = vrot.lane.b32.xlu1 %v1691_v39, %s2830_s17 }
 0xe28   :  { %v1694_v40 = vpop.permute.xlu1 %1693 }
 0xe29   :  { %2638 = vmatmul.msk.f32.vlgmr.msra.gmra.mxu0 %vm1038_vm3, %v1694_v40  ;;  %2639 = vmatmul.msk.f32.vlgmr.msra.gmra.mxu1 %vm1038_vm3, %v1694_v40 }
 0xe2a   :  { %2053 = vmatpush.msra.mxu1 %v3445_v37  ;;  %2033 = vmatpush.msra.mxu0 %v2768_v42 }
 0xe2c   :  { %2054 = vmatpush.msra.mxu1 %v3454_v43  ;;  %2034 = vmatpush.msra.mxu0 %v2770_v30 }
 0xe2e   :  { %2055 = vmatpush.msra.mxu1 %v3463_v27  ;;  %2035 = vmatpush.msra.mxu0 %v2772_v44 }
 0xe30   :  { %2056 = vmatpush.msra.mxu1 %v3472_v45  ;;  %2036 = vmatpush.msra.mxu0 %v2774_v4 }
 0xea6   :  { %v1734_v48 = vpop.f32.mrf.mxu1  ;;  %v1714_v46 = vpop.f32.mrf.mxu0 }
 0xea7   :  { %v1737_v6 = vadd.f32 %v3300_v62, %v1734_v48 }
 0xea9   :  { %v1740_v13 = vmul.f32 %v1739_v5, %v1737_v6  ;;  %v1768_v52 = vmul.f32 %v1767_v50, %v1737_v6  ;;  %v1773_v53 = vsub.f32 %v2641_v49, %v1737_v6 }
 0xeab   :  { %v1741_v14 = vadd.f32 %v1740_v13, %v1738_v12  ;;  %v1774_v58 = vand.u32 2147483647, %v1773_v53 }
 0xead   :  { %2640 = vmatmul.msk.f32.vlgmr.msra.gmra.mxu2 %vm90_vm0, %v1741_v14 }
 0xeae   :  { %2084 = vmatpush.msra.mxu2 %v3274_v11 }
 0xf30   :  { %v1762_v18 = vpop.f32.mrf.mxu2 }
 0xf31   :  { %v1763_v29 = vadd.f32 %v3323_v34, %v1762_v18 }
 0xf33   :  { %v1766_v20 = vmul.f32 %v1765_v17, %v1763_v29  ;;  %v1775_v54 = vsub.f32 %v2641_v49, %v1763_v29  ;;  %v1927_v17 = vld [vmem:[#allocation4 + $0x28] sm:$0x3f] }
 0xf35   :  { %v1769_v56 = vadd.f32 %v1768_v52, %v1766_v20  ;;  %v1776_v57 = vand.u32 2147483647, %v1775_v54 }
 0xf37   :  { %v1770_v25 = vmul.f32 %v1769_v56, %v1739_v5  ;;  %v1778_v59 = vsub.f32 %v2641_v49, %v1769_v56  ;;  %v1777_v61 = vadd.f32 %v1776_v57, %v1774_v58  ;;  %v1901_v5 = vld [vmem:[#allocation6 + $0x28] sm:$0x3f] }
 0xf39   :  { %v1771_v60 = vadd.f32 %v1770_v25, %v1738_v12  ;;  %v1779_v41 = vand.u32 2147483647, %v1778_v59  ;;  %v1900_v12 = vld [vmem:[#allocation5 + $0x28] sm:$0x3f] }
 0xf3b   :  { %v1780_v63 = vadd.f32 %v1779_v41, %v1777_v61  ;;  %1784 = vst.msk [vmem:[#allocation7 + $0x20] sm:$0x3f] %vm203_vm1, %v1771_v60  ;;  %2642 = vmatmul.msk.f32.vlgmr.msra.gmra.mxu3 %vm90_vm0, %v1771_v60  ;;  %v1970_v61 = vld [vmem:[#allocation3 + $0x20] sm:$0x3f] }
 0xf3c   :  { %2127 = vmatpush.msra.mxu3 %v3316_v32 }
 0xf3d   :  { %1782 = vst.msk [vmem:[#allocation8 + $0x20] sm:$0x3f] %vm203_vm1, %v1780_v63 }
 0xfbe   :  { %v1805_v47 = vpop.f32.mrf.mxu3 }
 0xfbf   :  { %v1806_v0 = vadd.f32 %v1805_v47, %v1714_v46  ;;  %v2010_v47 = vld [vmem:[#allocation2 + $0x30] sm:$0x3f] }
 0xfc1   :  { %v1809_v3 = vadd.f32 %v1808_v2, %v1806_v0 }
 0xfc3   :  { %v1810_v51 = vadd.f32 %v3336_v55, %v1809_v3 }
 0xfc5   :  { %2741 = vtanh.f32 %v1810_v51  ;;  %v2643_v9 = vmul.f32 -1.442695, %v1810_v51 }
 0xfc7   :  { %2743 = vpow2.f32 %v2643_v9 }
 0xfcb   :  { %v2742_v7 = vpop.eup %2741 }
 0xfcc   :  { %1833 = vrot.lane.b32.xlu2 %v2742_v7, %s2829_s3 }
 0xfcd   :  { %v2744_v10 = vpop.eup %2743 }
 0xfce   :  { %v1814_v32 = vadd.f32 1.0, %v2744_v10 }
 0xfd0   :  { %2745 = vrcp.f32 %v1814_v32  ;;  %v1826_v24 = vand.u32 2147483648, %v1814_v32  ;;  %vm1820_vm8 = vweird.f32 %v1814_v32  ;;  %v1824_v26 = vand.u32 2147483647, %v1814_v32 }
 0xfd2   :  { %v1827_v31 = vor.u32 1.1754944e-38, %v1826_v24  ;;  %vm1825_vm10 = vcmp.eq.f32.partialorder %v1824_v26, 8.507059e+37 }
 0xfd4   :  { %1850 = vrot.lane.b32.xlu2 %v1848_v8, %s2831_s27 }
 0xfd6   :  { %v2746_v15 = vpop.eup %2745 }
 0xfd7   :  { %v1816_v19 = vmul.f32 %v2746_v15, %v1814_v32  ;;  %vm1821_vm7 = vweird.f32 %v2746_v15 }
 0xfd8   :  { %vm1822_vm9 = vmor %vm1820_vm8, %vm1821_vm7  ;;  %vm2314_vm7 = vcmask 1041409   ;;  %vm2316_vm8 = vcmask 1042434  }
 0xfd9   :  { %v1817_v22 = vsub.f32 1.0, %v1816_v19 }
 0xfdb   :  { %v1818_v23 = vmul.f32 %v2746_v15, %v1817_v22 }
 0xfdd   :  { %v1819_v1 = vadd.f32 %v2746_v15, %v1818_v23 }
 0xfdf   :  { %v1823_v28 = vsel %vm1822_vm9, %v2746_v15, %v1819_v1  ;;  %vm2320_vm9 = vcmask 1044484  }
 0xfe0   :  { %v1828_v16 = vsel %vm1825_vm10, %v1827_v31, %v1823_v28  ;;  %vm2322_vm10 = vcmask 1045509  }
 0xfe1   :  { %v1831_v21 = vmul.f32 %v1828_v16, %v3435_v35 }
0x1026   :  { %v1834_v33 = vpop.permute.xlu2 %1833 }
0x1027   :  { %v1836_v36 = vmul.f32 %v1834_v33, %v1828_v16 }
0x1029   :  { %1838 = vrot.lane.b32.xlu0 %v1836_v36, %s2830_s17 }
0x102e   :  { %v1851_v44 = vpop.permute.xlu2 %1850 }
0x109b   :  { %v1839_v38 = vpop.permute.xlu0 %1838 }
0x109c   :  { %v3494_v39 = vadd.f32 %v1839_v38, %v1831_v21 }
0x109e   :  { %2747 = vtanh.f32 %v3494_v39 }
0x10a4   :  { %v2748_v40 = vpop.eup %2747 }
0x10a5   :  { %1844 = vrot.lane.b32.xlu1 %v2748_v40, %s2829_s3 }
0x1117   :  { %v1845_v42 = vpop.permute.xlu1 %1844 }
0x1118   :  { %v1847_v30 = vmul.f32 %v1845_v42, %v1828_v16  ;;  %v2063_v42 = vld [vmem:[#allocation6 + $0x30] sm:$0x3f] }
0x111a   :  { %v1853_v4 = vmul.f32 %v1851_v44, %v1847_v30  ;;  %v3530_v30 = vld [vmem:[%s3727_s10] ss:$0 sm:$0xff] }
0x111c   :  { %1855 = vrot.lane.b32.xlu0 %v1853_v4, %s2830_s17  ;;  %v2062_v4 = vld [vmem:[#allocation5 + $0x30] sm:$0x3f] }
0x118e   :  { %v1856_v48 = vpop.permute.xlu0 %1855 }
0x118f   :  { %2644 = vmatmul.msk.f32.vlgmr.msrb.gmra.mxu0 %vm1038_vm3, %v1856_v48  ;;  %2645 = vmatmul.msk.f32.vlgmr.msrb.gmra.mxu1 %vm1038_vm3, %v1856_v48 }
0x1190   :  { %2195 = vmatpush.msrb.mxu0 %v3445_v37  ;;  %2226 = vmatpush.msrb.mxu1 %v3274_v11  ;;  %v2647_v11 = vld [vmem:[%s3747_s26 + $0x28] sm:$0x3f] }
0x1192   :  { %2196 = vmatpush.msrb.mxu0 %v3454_v43  ;;  %v1929_v43 = vsub.f32 1.0, %v1927_v17 }
0x1194   :  { %2197 = vmatpush.msrb.mxu0 %v3463_v27 }
0x1196   :  { %2198 = vmatpush.msrb.mxu0 %v3472_v45 }
0x120c   :  { %v1896_v35 = vpop.f32.mrf.mxu1  ;;  %v1876_v58 = vpop.f32.mrf.mxu0 }
0x120d   :  { %v1899_v6 = vadd.f32 %v3300_v62, %v1896_v35 }
0x120f   :  { %v1902_v13 = vmul.f32 %v1901_v5, %v1899_v6  ;;  %v1930_v45 = vmul.f32 %v1929_v43, %v1899_v6  ;;  %v1935_v49 = vsub.f32 %v2647_v11, %v1899_v6 }
0x1211   :  { %v1903_v14 = vadd.f32 %v1902_v13, %v1900_v12  ;;  %v1936_v52 = vand.u32 2147483647, %v1935_v49 }
0x1213   :  { %2646 = vmatmul.msk.f32.vlgmr.msrb.gmra.mxu2 %vm90_vm0, %v1903_v14 }
0x1296   :  { %v1924_v18 = vpop.f32.mrf.mxu2 }
0x1297   :  { %v1925_v37 = vadd.f32 %v3323_v34, %v1924_v18 }
0x1299   :  { %v1928_v27 = vmul.f32 %v1927_v17, %v1925_v37  ;;  %v1937_v29 = vsub.f32 %v2647_v11, %v1925_v37 }
0x129b   :  { %v1931_v50 = vadd.f32 %v1930_v45, %v1928_v27  ;;  %v1938_v62 = vand.u32 2147483647, %v1937_v29 }
0x129d   :  { %v1932_v20 = vmul.f32 %v1931_v50, %v1901_v5  ;;  %v1940_v53 = vsub.f32 %v2647_v11, %v1931_v50  ;;  %v1939_v56 = vadd.f32 %v1938_v62, %v1936_v52  ;;  %v2089_v5 = vld [vmem:[#allocation4 + $0x30] sm:$0x3f] }
0x129e   :  { %v2091_v14 = vsub.f32 1.0, %v2089_v5 }
0x129f   :  { %v1933_v54 = vadd.f32 %v1932_v20, %v1900_v12  ;;  %v1941_v57 = vand.u32 2147483647, %v1940_v53  ;;  %v2653_v12 = vld [vmem:[%s3747_s26 + $0x30] sm:$0x3f] }
0x12a1   :  { %v1942_v25 = vadd.f32 %v1941_v57, %v1939_v56  ;;  %1946 = vst.msk [vmem:[#allocation7 + $0x28] sm:$0x3f] %vm203_vm1, %v1933_v54  ;;  %2648 = vmatmul.msk.f32.vlgmr.msrb.gmra.mxu3 %vm90_vm0, %v1933_v54  ;;  %v2132_v56 = vld [vmem:[#allocation3 + $0x28] sm:$0x3f] }
0x12a3   :  { %1944 = vst.msk [vmem:[#allocation8 + $0x28] sm:$0x3f] %vm203_vm1, %v1942_v25 }
0x1324   :  { %v1967_v59 = vpop.f32.mrf.mxu3 }
0x1325   :  { %v1968_v60 = vadd.f32 %v1967_v59, %v1876_v58  ;;  %v2172_v59 = vld [vmem:[#allocation2 + $0x38] sm:$0x3f] }
0x1327   :  { %v1971_v41 = vadd.f32 %v1970_v61, %v1968_v60 }
0x1329   :  { %v1972_v63 = vadd.f32 %v3336_v55, %v1971_v41 }
0x132b   :  { %2749 = vtanh.f32 %v1972_v63  ;;  %v2649_v0 = vmul.f32 -1.442695, %v1972_v63 }
0x132d   :  { %2751 = vpow2.f32 %v2649_v0 }
0x1331   :  { %v2750_v46 = vpop.eup %2749 }
0x1332   :  { %1995 = vrot.lane.b32.xlu1 %v2750_v46, %s2829_s3 }
0x1333   :  { %v2752_v2 = vpop.eup %2751 }
0x1334   :  { %v1976_v3 = vadd.f32 1.0, %v2752_v2 }
0x1336   :  { %2753 = vrcp.f32 %v1976_v3  ;;  %v1988_v32 = vand.u32 2147483648, %v1976_v3  ;;  %vm1982_vm12 = vweird.f32 %v1976_v3  ;;  %v1986_v15 = vand.u32 2147483647, %v1976_v3 }
0x1338   :  { %v1989_v22 = vor.u32 1.1754944e-38, %v1988_v32  ;;  %vm1987_vm14 = vcmp.eq.f32.partialorder %v1986_v15, 8.507059e+37  ;;  %v2832_v32 = vmov 0  }
0x1339   :  { %2668 = vset.pattern.permute.xlu2 %v2832_v32  ;;  %2669 = vset.pattern.permute.xlu0 %v2832_v32 }
0x133a   :  { %2012 = vrot.lane.b32.xlu1 %v2010_v47, %s2831_s27 }
0x133c   :  { %v2754_v51 = vpop.eup %2753 }
0x133d   :  { %v1978_v7 = vmul.f32 %v2754_v51, %v1976_v3  ;;  %vm1983_vm11 = vweird.f32 %v2754_v51 }
0x133e   :  { %vm1984_vm13 = vmor %vm1982_vm12, %vm1983_vm11  ;;  %vm2326_vm11 = vcmask 1047559   ;;  %vm2329_vm12 = vcmask 48128  }
0x133f   :  { %v1979_v8 = vsub.f32 1.0, %v1978_v7 }
0x1341   :  { %v1980_v9 = vmul.f32 %v2754_v51, %v1979_v8 }
0x1343   :  { %v1981_v10 = vadd.f32 %v2754_v51, %v1980_v9 }
0x1345   :  { %v1985_v19 = vsel %vm1984_vm13, %v2754_v51, %v1981_v10 }
0x1346   :  { %v1990_v1 = vsel %vm1987_vm14, %v1989_v22, %v1985_v19 }
0x1347   :  { %v1993_v26 = vmul.f32 %v1990_v1, %v3494_v39 }
0x13a4   :  { %v1996_v23 = vpop.permute.xlu1 %1995 }
0x13a5   :  { %v1998_v24 = vmul.f32 %v1996_v23, %v1990_v1 }
0x13a7   :  { %2000 = vrot.lane.b32.xlu2 %v1998_v24, %s2830_s17 }
0x13ac   :  { %v2013_v21 = vpop.permute.xlu1 %2012 }
0x1401   :  { %v2001_v28 = vpop.permute.xlu2 %2000 }
0x1402   :  { %v3520_v31 = vadd.f32 %v2001_v28, %v1993_v26 }
0x1404   :  { %2755 = vtanh.f32 %v3520_v31 }
0x140a   :  { %v2756_v33 = vpop.eup %2755 }
0x140b   :  { %2006 = vrot.lane.b32.xlu0 %v2756_v33, %s2829_s3 }
0x147d   :  { %v2007_v16 = vpop.permute.xlu0 %2006 }
0x147e   :  { %v2009_v36 = vmul.f32 %v2007_v16, %v1990_v1  ;;  %v84_v1 = vld [vmem:[%s3721_s4] sm:$0x3f] }
0x147f   :  { %v2251_v16 = vld [vmem:[%s3746_s25] sm:$0x3f] }
0x1480   :  { %v2015_v38 = vmul.f32 %v2013_v21, %v2009_v36  ;;  %v2431_v36 = vld [vmem:[#allocation7] sm:$0x3f] }
0x1481   :  { %v2439_v21 = vld [vmem:[%s3748_s2] sm:$0x3f] }
0x1482   :  { %2017 = vrot.lane.b32.xlu2 %v2015_v38, %s2830_s17  ;;  %v2432_v38 = vld [vmem:[#allocation7 + $0x8] sm:$0x3f] }
0x14dc   :  { %v2018_v40 = vpop.permute.xlu2 %2017 }
0x14dd   :  { %2650 = vmatmul.msk.f32.vlgmr.msra.gmra.mxu0 %vm1038_vm3, %v2018_v40  ;;  %2651 = vmatmul.msk.f32.vlgmr.msra.gmra.mxu1 %vm1038_vm3, %v2018_v40  ;;  %v2440_v40 = vld [vmem:[%s3748_s2 + $0x8] sm:$0x3f] }
0x155a   :  { %v2058_v39 = vpop.f32.mrf.mxu1 }
0x155b   :  { %v2061_v44 = vadd.f32 %v3530_v30, %v2058_v39 }
0x155d   :  { %v2064_v48 = vmul.f32 %v2063_v42, %v2061_v44  ;;  %v2092_v18 = vmul.f32 %v2091_v14, %v2061_v44  ;;  %v2097_v11 = vsub.f32 %v2653_v12, %v2061_v44  ;;  %v2441_v44 = vld [vmem:[%s3748_s2 + $0x10] sm:$0x3f] }
0x155f   :  { %v2065_v35 = vadd.f32 %v2064_v48, %v2062_v4  ;;  %v2098_v49 = vand.u32 2147483647, %v2097_v11  ;;  %v2442_v48 = vld [vmem:[%s3748_s2 + $0x18] sm:$0x3f]  ;;  %v2255_v11 = vld [vmem:[%s3746_s25 + $0x20] sm:$0x3f] }
0x1561   :  { %2652 = vmatmul.msk.f32.vlgmr.msra.gmra.mxu2 %vm90_vm0, %v2065_v35 }
0x15e4   :  { %v2086_v6 = vpop.f32.mrf.mxu2 }
0x15e5   :  { %v2087_v13 = vadd.f32 %v3323_v34, %v2086_v6  ;;  %v2038_v34 = vpop.f32.mrf.mxu0  ;;  %v2435_v6 = vld [vmem:[#allocation7 + $0x20] sm:$0x3f] }
0x15e7   :  { %v2090_v17 = vmul.f32 %v2089_v5, %v2087_v13  ;;  %v2099_v37 = vsub.f32 %v2653_v12, %v2087_v13  ;;  %v2444_v13 = vld [vmem:[%s3748_s2 + $0x28] sm:$0x3f] }
0x15e9   :  { %v2093_v43 = vadd.f32 %v2092_v18, %v2090_v17  ;;  %v2100_v27 = vand.u32 2147483647, %v2099_v37  ;;  %v2254_v18 = vld [vmem:[%s3746_s25 + $0x18] sm:$0x3f]  ;;  %v2436_v37 = vld [vmem:[#allocation7 + $0x28] sm:$0x3f] }
0x15eb   :  { %v2094_v45 = vmul.f32 %v2093_v43, %v2063_v42  ;;  %v2102_v29 = vsub.f32 %v2653_v12, %v2093_v43  ;;  %v2101_v62 = vadd.f32 %v2100_v27, %v2098_v49  ;;  %v2433_v42 = vld [vmem:[#allocation7 + $0x10] sm:$0x3f]  ;;  %v2443_v12 = vld [vmem:[%s3748_s2 + $0x20] sm:$0x3f]  ;;  %v2448_v49 = vadd.f32 %v2440_v40, %v2432_v38 }
0x15ec   :  { %v2445_v27 = vld [vmem:[%s3748_s2 + $0x30] sm:$0x3f] }
0x15ed   :  { %v2095_v50 = vadd.f32 %v2094_v45, %v2062_v4  ;;  %v2103_v20 = vand.u32 2147483647, %v2102_v29  ;;  %v2434_v4 = vld [vmem:[#allocation7 + $0x18] sm:$0x3f]  ;;  %v2447_v45 = vadd.f32 %v2439_v21, %v2431_v36  ;;  %v2449_v29 = vadd.f32 %v2441_v44, %v2433_v42  ;;  %v2252_v21 = vld [vmem:[%s3746_s25 + $0x8] sm:$0x3f] }
0x15ef   :  { %v2104_v52 = vadd.f32 %v2103_v20, %v2101_v62  ;;  %2108 = vst.msk [vmem:[#allocation7 + $0x30] sm:$0x3f] %vm203_vm1, %v2095_v50  ;;  %2654 = vmatmul.msk.f32.vlgmr.msra.gmra.mxu3 %vm90_vm0, %v2095_v50  ;;  %v2450_v50 = vadd.f32 %v2442_v48, %v2434_v4 }
0x15f1   :  { %2106 = vst.msk [vmem:[#allocation8 + $0x30] sm:$0x3f] %vm203_vm1, %v2104_v52  ;;  %v2451_v52 = vadd.f32 %v2443_v12, %v2435_v6 }
0x15f6   :  { %v2437_v43 = vld [vmem:[#allocation7 + $0x30] sm:$0x3f] }
0x1672   :  { %v2129_v53 = vpop.f32.mrf.mxu3 }
0x1673   :  { %v2130_v54 = vadd.f32 %v2129_v53, %v2038_v34  ;;  %v2452_v34 = vadd.f32 %v2444_v13, %v2436_v37  ;;  %v2453_v53 = vadd.f32 %v2445_v27, %v2437_v43  ;;  %v2256_v43 = vld [vmem:[%s3746_s25 + $0x28] sm:$0x3f] }
0x1675   :  { %v2133_v57 = vadd.f32 %v2132_v56, %v2130_v54  ;;  %v2258_v54 = vld [vmem:[%s3746_s25 + $0x38] sm:$0x3f] }
0x1677   :  { %v2134_v25 = vadd.f32 %v3336_v55, %v2133_v57 }
0x1679   :  { %2757 = vtanh.f32 %v2134_v25  ;;  %v2655_v60 = vmul.f32 -1.442695, %v2134_v25 }
0x167b   :  { %2759 = vpow2.f32 %v2655_v60 }
0x167f   :  { %v2758_v58 = vpop.eup %2757 }
0x1680   :  { %2157 = vrot.lane.b32.xlu0 %v2758_v58, %s2829_s3 }
0x1681   :  { %v2760_v61 = vpop.eup %2759 }
0x1682   :  { %v2138_v41 = vadd.f32 1.0, %v2760_v61 }
0x1684   :  { %2761 = vrcp.f32 %v2138_v41  ;;  %v2150_v3 = vand.u32 2147483648, %v2138_v41  ;;  %vm2144_vm2 = vweird.f32 %v2138_v41  ;;  %v2148_v55 = vand.u32 2147483647, %v2138_v41 }
0x1686   :  { %v2151_v7 = vor.u32 1.1754944e-38, %v2150_v3  ;;  %vm2149_vm5 = vcmp.eq.f32.partialorder %v2148_v55, 8.507059e+37 }
0x1688   :  { %2174 = vrot.lane.b32.xlu0 %v2172_v59, %s2831_s27 }
0x168a   :  { %v2762_v63 = vpop.eup %2761 }
0x168b   :  { %v2140_v46 = vmul.f32 %v2762_v63, %v2138_v41  ;;  %vm2145_vm15 = vweird.f32 %v2762_v63 }
0x168c   :  { %vm2146_vm4 = vmor %vm2144_vm2, %vm2145_vm15  ;;  %vm2416_vm2 = vcmask 7168  }
0x168d   :  { %v2141_v47 = vsub.f32 1.0, %v2140_v46 }
0x168f   :  { %v2142_v0 = vmul.f32 %v2762_v63, %v2141_v47 }
0x1691   :  { %v2143_v2 = vadd.f32 %v2762_v63, %v2142_v0 }
0x1693   :  { %v2147_v51 = vsel %vm2146_vm4, %v2762_v63, %v2143_v2  ;;  %v2257_v2 = vld [vmem:[%s3746_s25 + $0x30] sm:$0x3f]  ;;  %vm2429_vm4 = vcmask 0  }
0x1694   :  { %v2152_v9 = vsel %vm2149_vm5, %v2151_v7, %v2147_v51 }
0x1695   :  { %v2155_v15 = vmul.f32 %v2152_v9, %v3520_v31  ;;  %v2253_v31 = vld [vmem:[%s3746_s25 + $0x10] sm:$0x3f] }
0x16f2   :  { %v2158_v8 = vpop.permute.xlu0 %2157 }
0x16f3   :  { %v2160_v10 = vmul.f32 %v2158_v8, %v2152_v9 }
0x16f5   :  { %2162 = vrot.lane.b32.xlu1 %v2160_v10, %s2830_s17 }
0x16fa   :  { %v2175_v28 = vpop.permute.xlu0 %2174 }
0x1767   :  { %v2163_v19 = vpop.permute.xlu1 %2162 }
0x1768   :  { %v2165_v22 = vadd.f32 %v2163_v19, %v2155_v15 }
0x176a   :  { %2763 = vtanh.f32 %v2165_v22 }
0x1770   :  { %v2764_v23 = vpop.eup %2763 }
0x1771   :  { %2168 = vrot.lane.b32.xlu2 %v2764_v23, %s2829_s3 }
0x1779   :  { %2261 = vperm.xlu2 %2668, %v84_v1  }
0x17cb   :  { %v2169_v24 = vpop.permute.xlu2 %2168 }
0x17cc   :  { %v2171_v26 = vmul.f32 %v2169_v24, %v2152_v9 }
0x17ce   :  { %v2177_v33 = vmul.f32 %v2175_v28, %v2171_v26 }
0x17d0   :  { %2179 = vrot.lane.b32.xlu1 %v2177_v33, %s2830_s17 }
0x17d3   :  { %v3563_v39 = vpop.permute.xlu2 %2261 }
0x17d4   :  { %v3572_v35 = vmul.f32 %v3563_v39, %v2253_v31  ;;  %v3575_v5 = vmul.f32 %v3563_v39, %v2251_v16  ;;  %v3597_v62 = vmul.f32 %v3563_v39, %v2254_v18  ;;  %v3600_v20 = vmul.f32 %v3563_v39, %v2255_v11  ;;  %v2336_v18 = vld [vmem:[#allocation8 + $0x10] sm:$0x3f] }
0x17d5   :  { %v2455_v25 = vmul.f32 %v2447_v45, %v3563_v39  ;;  %v2456_v58 = vmul.f32 %v2448_v49, %v3563_v39  ;;  %v2457_v59 = vmul.f32 %v2449_v29, %v3563_v39  ;;  %v2458_v60 = vmul.f32 %v2450_v50, %v3563_v39  ;;  %v2338_v29 = vld [vmem:[#allocation8 + $0x20] sm:$0x3f]  ;;  %v2339_v50 = vld [vmem:[#allocation8 + $0x28] sm:$0x3f] }
0x17d6   :  { %v2278_v14 = vsel %vm203_vm1, %v3572_v35, 0.0  ;;  %v2272_v17 = vsel %vm203_vm1, %v3575_v5, 0.0  ;;  %v2281_v56 = vsel %vm203_vm1, %v3597_v62, 0.0  ;;  %v2284_v57 = vsel %vm203_vm1, %v3600_v20, 0.0 }
0x17d7   :  { %2279 = vadd.xlane.f32.xlu2 %v2278_v14  ;;  %2273 = vadd.xlane.f32.xlu0 %v2272_v17  ;;  %v2459_v61 = vmul.f32 %v2451_v52, %v3563_v39  ;;  %v2460_v41 = vmul.f32 %v2452_v34, %v3563_v39  ;;  %v3616_v63 = vmul.f32 %v3563_v39, %v2258_v54  ;;  %v2471_v47 = vrot.slane %v2455_v25, 2  ;;  %v2335_v17 = vld [vmem:[#allocation8 + $0x8] sm:$0x3f] }
0x17d8   :  { %v2461_v46 = vmul.f32 %v2453_v53, %v3563_v39  ;;  %v2472_v0 = vrot.slane %v2456_v58, 2  ;;  %v2473_v3 = vrot.slane %v2457_v59, 2  ;;  %v2474_v55 = vrot.slane %v2458_v60, 2 }
0x17d9   :  { %v2475_v51 = vrot.slane %v2459_v61, 2  ;;  %v2476_v7 = vrot.slane %v2460_v41, 2  ;;  %v2487_v9 = vadd.f32 %v2471_v47, %v2455_v25  ;;  %v2495_v32 = vrot.slane %v2455_v25, 4 }
0x17da   :  { %v2477_v8 = vrot.slane %v2461_v46, 2  ;;  %v2488_v10 = vadd.f32 %v2472_v0, %v2456_v58  ;;  %v2489_v15 = vadd.f32 %v2473_v3, %v2457_v59  ;;  %v2490_v19 = vadd.f32 %v2474_v55, %v2458_v60 }
0x17db   :  { %v2491_v22 = vadd.f32 %v2475_v51, %v2459_v61  ;;  %v2496_v23 = vrot.slane %v2456_v58, 4  ;;  %v2270_v1 = vmul.f32 %v3563_v39, %v2257_v2  ;;  %v2492_v24 = vadd.f32 %v2476_v7, %v2460_v41 }
0x17dc   :  { %v2497_v26 = vrot.slane %v2457_v59, 4  ;;  %v2498_v28 = vrot.slane %v2458_v60, 4  ;;  %v2493_v33 = vadd.f32 %v2477_v8, %v2461_v46  ;;  %v2499_v31 = vrot.slane %v2459_v61, 4  ;;  %v2340_v61 = vld [vmem:[#allocation8 + $0x30] sm:$0x3f] }
0x17dd   :  { %v2511_v16 = vadd.f32 %v2495_v32, %v2487_v9  ;;  %v2512_v36 = vadd.f32 %v2496_v23, %v2488_v10  ;;  %v2500_v38 = vrot.slane %v2460_v41, 4  ;;  %v2290_v44 = vsel %vm203_vm1, %v2270_v1, 0.0 }
0x17de   :  { %v2513_v40 = vadd.f32 %v2497_v26, %v2489_v15  ;;  %v2514_v42 = vadd.f32 %v2498_v28, %v2490_v19  ;;  %v2293_v4 = vsel %vm203_vm1, %v3616_v63, 0.0  ;;  %v2501_v48 = vrot.slane %v2461_v46, 4 }
0x17df   :  { %2282 = vadd.xlane.f32.xlu2 %v2281_v56  ;;  %2285 = vadd.xlane.f32.xlu0 %v2284_v57  ;;  %v2515_v6 = vadd.f32 %v2499_v31, %v2491_v22  ;;  %2520 = vst.msk [vmem:[#allocation11] sm:$0x3] %vm2519_vm6, %v2511_v16  ;;  %v2516_v12 = vadd.f32 %v2500_v38, %v2492_v24  ;;  %v2334_v57 = vld [vmem:[#allocation8] sm:$0x3f] }
0x17e0   :  { %2521 = vst.msk [vmem:[#allocation11 + $0x2] sm:$0x3] %vm2519_vm6, %v2512_v36  ;;  %v2265_v13 = vmul.f32 %v3563_v39, %v2252_v21  ;;  %v2517_v14 = vadd.f32 %v2501_v48, %v2493_v33  ;;  %v2344_v37 = vmul.f32 %v2336_v18, %v3572_v35  ;;  %v2269_v49 = vmul.f32 %v3563_v39, %v2256_v43  ;;  %v2204_v48 = vld [vmem:[#allocation5 + $0x38] sm:$0x3f] }
0x17e1   :  { %2522 = vst.msk [vmem:[#allocation11 + $0x4] sm:$0x3] %vm2519_vm6, %v2513_v40  ;;  %v2346_v52 = vmul.f32 %v2338_v29, %v3600_v20  ;;  %v2342_v25 = vmul.f32 %v2334_v57, %v3575_v5  ;;  %v2337_v20 = vld [vmem:[#allocation8 + $0x18] sm:$0x3f]  ;;  %v2348_v41 = vmul.f32 %v2340_v61, %v2270_v1  ;;  %v2776_v57 = vld [vmem:[%s3729_s12] ss:$0 sm:$0xff] }
0x17e2   :  { %2523 = vst.msk [vmem:[#allocation11 + $0x6] sm:$0x3] %vm2519_vm6, %v2514_v42  ;;  %v2343_v11 = vmul.f32 %v2335_v17, %v2265_v13  ;;  %v2356_v45 = vsel %vm203_vm1, %v2344_v37, 0.0  ;;  %v2347_v34 = vmul.f32 %v2339_v50, %v2269_v49  ;;  %v2275_v54 = vsel %vm203_vm1, %v2265_v13, 0.0 }
0x17e3   :  { %2524 = vst.msk [vmem:[#allocation11 + $0x8] sm:$0x3] %vm2519_vm6, %v2515_v6  ;;  %v2362_v35 = vsel %vm203_vm1, %v2346_v52, 0.0  ;;  %v2287_v56 = vsel %vm203_vm1, %v2269_v49, 0.0  ;;  %v2350_v58 = vsel %vm203_vm1, %v2342_v25, 0.0  ;;  %v2345_v59 = vmul.f32 %v2337_v20, %v3597_v62 }
0x17e4   :  { %2525 = vst.msk [vmem:[#allocation11 + $0xa] sm:$0x3] %vm2519_vm6, %v2516_v12  ;;  %v2353_v27 = vsel %vm203_vm1, %v2343_v11, 0.0  ;;  %v2365_v53 = vsel %vm203_vm1, %v2347_v34, 0.0  ;;  %v2368_v46 = vsel %vm203_vm1, %v2348_v41, 0.0  ;;  %v2304_v62 = vlaneseq }
0x17e5   :  { %2526 = vst.msk [vmem:[#allocation11 + $0xc] sm:$0x3] %vm2519_vm6, %v2517_v14  ;;  %v2359_v60 = vsel %vm203_vm1, %v2345_v59, 0.0 }
0x17e6   :  { %v3655_v9 = vand.u32 127, %v2304_v62 }
0x17e7   :  { %2291 = vadd.xlane.f32.xlu2 %v2290_v44  ;;  %2294 = vadd.xlane.f32.xlu0 %v2293_v4  ;;  %v2205_v44 = vld [vmem:[#allocation6 + $0x38] sm:$0x3f] }
0x17ef   :  { %2354 = vadd.xlane.f32.xlu2 %v2353_v27  ;;  %2357 = vadd.xlane.f32.xlu0 %v2356_v45 }
0x17f7   :  { %2363 = vadd.xlane.f32.xlu2 %v2362_v35  ;;  %2366 = vadd.xlane.f32.xlu0 %v2365_v53  ;;  %v2231_v53 = vld [vmem:[#allocation4 + $0x38] sm:$0x3f] }
0x17fa   :  { %2276 = vadd.xlane.f32.xlu1 %v2275_v54 }
0x1802   :  { %2288 = vadd.xlane.f32.xlu1 %v2287_v56  ;;  %v2658_v56 = vld [vmem:[%s3747_s26 + $0x38] sm:$0x3f] }
0x180a   :  { %2351 = vadd.xlane.f32.xlu1 %v2350_v58  ;;  %v2233_v58 = vsub.f32 1.0, %v2231_v53 }
0x1812   :  { %2360 = vadd.xlane.f32.xlu1 %v2359_v60 }
0x181a   :  { %2369 = vadd.xlane.f32.xlu1 %v2368_v46 }
0x1842   :  { %v2180_v47 = vpop.permute.xlu1 %2179 }
0x1843   :  { %2656 = vmatmul.msk.f32.vlgmr.msrb.gmra.mxu0 %vm1038_vm3, %v2180_v47  ;;  %vm2318_vm3 = vcmask 1043459  }
0x184a   :  { %v2280_v0 = vpop.xlane.xlu2 %2279  ;;  %v2274_v2 = vpop.xlane.xlu0 %2273 }
0x184b   :  { %v2306_v13 = vperm.slane %v2274_v2, %v3655_v9  ;;  %v2308_v17 = vperm.slane %v2280_v0, %v3655_v9 }
0x1852   :  { %v2283_v5 = vpop.xlane.xlu2 %2282  ;;  %v2286_v3 = vpop.xlane.xlu0 %2285 }
0x1853   :  { %v2309_v11 = vperm.slane %v2283_v5, %v3655_v9  ;;  %v2310_v43 = vperm.slane %v2286_v3, %v3655_v9 }
0x185a   :  { %v2292_v51 = vpop.xlane.xlu2 %2291  ;;  %v2295_v7 = vpop.xlane.xlu0 %2294 }
0x185b   :  { %v2312_v49 = vperm.slane %v2292_v51, %v3655_v9  ;;  %v2313_v29 = vperm.slane %v2295_v7, %v3655_v9  ;;  %v2446_v7 = vld [vmem:[%s3748_s2 + $0x38] sm:$0x3f]  ;;  %s2833_s2 = smov [#allocation11]  }
0x185c   :  { %s2543_s24 = sshll.u32 %s2833_s2, 4  ;;  %s2544_s24 = int_to_ptr.vmem [resolvable:$true] %s2543_s24 }
0x1862   :  { %v2355_v10 = vpop.xlane.xlu2 %2354  ;;  %v2358_v32 = vpop.xlane.xlu0 %2357 }
0x1863   :  { %v2383_v19 = vperm.slane %v2355_v10, %v3655_v9  ;;  %v2384_v23 = vperm.slane %v2358_v32, %v3655_v9 }
0x186a   :  { %v2364_v26 = vpop.xlane.xlu2 %2363  ;;  %v2367_v28 = vpop.xlane.xlu0 %2366 }
0x186b   :  { %v2386_v16 = vperm.slane %v2364_v26, %v3655_v9  ;;  %v2387_v36 = vperm.slane %v2367_v28, %v3655_v9 }
0x186d   :  { %v2277_v55 = vpop.xlane.xlu1 %2276 }
0x186e   :  { %v2307_v14 = vperm.slane %v2277_v55, %v3655_v9 }
0x1870   :  { %v2315_v18 = vsel %vm2314_vm7, %v2307_v14, %v2306_v13 }
0x1871   :  { %v2317_v37 = vsel %vm2316_vm8, %v2308_v17, %v2315_v18 }
0x1875   :  { %v2289_v8 = vpop.xlane.xlu1 %2288 }
0x1876   :  { %v2311_v27 = vperm.slane %v2289_v8, %v3655_v9 }
0x187d   :  { %v2352_v15 = vpop.xlane.xlu1 %2351 }
0x187e   :  { %v2382_v22 = vperm.slane %v2352_v15, %v3655_v9 }
0x1880   :  { %v2390_v1 = vsel %vm2314_vm7, %v2383_v19, %v2382_v22 }
0x1881   :  { %v2391_v24 = vsel %vm2316_vm8, %v2384_v23, %v2390_v1 }
0x1885   :  { %v2361_v33 = vpop.xlane.xlu1 %2360 }
0x1886   :  { %v2385_v31 = vperm.slane %v2361_v33, %v3655_v9 }
0x1888   :  { %v2392_v21 = vsel %vm2318_vm3, %v2385_v31, %v2391_v24 }
0x1889   :  { %v2393_v38 = vsel %vm2320_vm9, %v2386_v16, %v2392_v21 }
0x188a   :  { %v3668_v40 = vsel %vm2322_vm10, %v2387_v36, %v2393_v38 }
0x188d   :  { %v2370_v26 = vpop.xlane.xlu1 %2369 }
0x188e   :  { %v2388_v28 = vperm.slane %v2370_v26, %v3655_v9 }
0x18c0   :  { %v2200_v42 = vpop.f32.mrf.mxu0 }
0x18c1   :  { %v2203_v4 = vadd.f32 %v3530_v30, %v2200_v42  ;;  %v2319_v30 = vsel %vm2318_vm3, %v2309_v11, %v2317_v37 }
0x18c2   :  { %v2321_v45 = vsel %vm2320_vm9, %v2310_v43, %v2319_v30 }
0x18c3   :  { %v2206_v6 = vmul.f32 %v2205_v44, %v2203_v4  ;;  %v2323_v50 = vsel %vm2322_vm10, %v2311_v27, %v2321_v45  ;;  %v2234_v59 = vmul.f32 %v2233_v58, %v2203_v4  ;;  %v2239_v60 = vsub.f32 %v2658_v56, %v2203_v4 }
0x18c5   :  { %v2207_v12 = vadd.f32 %v2206_v6, %v2204_v48  ;;  %v2240_v0 = vand.u32 2147483647, %v2239_v60 }
0x18c7   :  { %2657 = vmatmul.msk.f32.vlgmr.msrb.gmra.mxu1 %vm90_vm0, %v2207_v12  ;;  %vm2324_vm0 = vcmask 1046534  }
0x18c8   :  { %v2325_v52 = vsel %vm2324_vm0, %v2312_v49, %v2323_v50 }
0x18c9   :  { %v2327_v34 = vsel %vm2326_vm11, %v2313_v29, %v2325_v52 }
0x18ca   :  { %v2330_v35 = vsel %vm2329_vm12, %v2327_v34, 0.0 }
0x18cb   :  { %2331 = vadd.xlane.f32.xlu0 %v2330_v35 }
0x193e   :  { %v2332_v36 = vpop.xlane.xlu0 %2331 }
0x193f   :  { %v2333_v21 = vadd.f32 1e-05, %v2332_v36 }
0x1941   :  { %2765 = vrcp.f32 %v2333_v21 }
0x1944   :  { %v2228_v54 = vpop.f32.mrf.mxu1 }
0x1945   :  { %v2229_v25 = vadd.f32 %v2776_v57, %v2228_v54 }
0x1947   :  { %v2232_v20 = vmul.f32 %v2231_v53, %v2229_v25  ;;  %v2241_v61 = vsub.f32 %v2658_v56, %v2229_v25  ;;  %v2766_v38 = vpop.eup %2765 }
0x1948   :  { %v2402_v42 = vmul.f32 %v2766_v38, %v2333_v21  ;;  %vm2407_vm13 = vweird.f32 %v2766_v38 }
0x1949   :  { %v2235_v41 = vadd.f32 %v2234_v59, %v2232_v20  ;;  %v2242_v46 = vand.u32 2147483647, %v2241_v61 }
0x194b   :  { %v2236_v47 = vmul.f32 %v2235_v41, %v2205_v44  ;;  %v2244_v2 = vsub.f32 %v2658_v56, %v2235_v41  ;;  %v2243_v3 = vadd.f32 %v2242_v46, %v2240_v0  ;;  %v2403_v44 = vsub.f32 1.0, %v2402_v42 }
0x194d   :  { %v2237_v5 = vadd.f32 %v2236_v47, %v2204_v48  ;;  %v2245_v55 = vand.u32 2147483647, %v2244_v2  ;;  %v2404_v4 = vmul.f32 %v2766_v38, %v2403_v44  ;;  %v2412_v48 = vand.u32 2147483648, %v2333_v21 }
0x194f   :  { %v2246_v51 = vadd.f32 %v2245_v55, %v2243_v3  ;;  %2250 = vst.msk [vmem:[#allocation7 + $0x38] sm:$0x3f] %vm203_vm1, %v2237_v5  ;;  %v2405_v6 = vadd.f32 %v2766_v38, %v2404_v4  ;;  %v2413_v12 = vor.u32 1.1754944e-38, %v2412_v48 }
0x1951   :  { %2248 = vst.msk [vmem:[#allocation8 + $0x38] sm:$0x3f] %vm203_vm1, %v2246_v51 }
0x1956   :  { %v2438_v8 = vld [vmem:[#allocation7 + $0x38] sm:$0x3f] }
0x1957   :  { %v2454_v62 = vadd.f32 %v2446_v7, %v2438_v8 }
0x1958   :  { %v2341_v10 = vld [vmem:[#allocation8 + $0x38] sm:$0x3f] }
0x1959   :  { %v2462_v32 = vmul.f32 %v2454_v62, %v3563_v39  ;;  %v2349_v15 = vmul.f32 %v2341_v10, %v3616_v63  ;;  %v2395_v39 = vsel %vm2324_vm0, %v2388_v28, %v3668_v40 }
0x195b   :  { %v2371_v19 = vsel %vm203_vm1, %v2349_v15, 0.0  ;;  %v2478_v22 = vrot.slane %v2462_v32, 2  ;;  %v2502_v1 = vrot.slane %v2462_v32, 4  ;;  %vm2406_vm1 = vweird.f32 %v2333_v21 }
0x195c   :  { %2372 = vadd.xlane.f32.xlu2 %v2371_v19  ;;  %vm2408_vm14 = vmor %vm2406_vm1, %vm2407_vm13 }
0x195d   :  { %v2494_v23 = vadd.f32 %v2478_v22, %v2462_v32  ;;  %v2409_v40 = vsel %vm2408_vm14, %v2766_v38, %v2405_v6 }
0x195f   :  { %v2518_v24 = vadd.f32 %v2502_v1, %v2494_v23 }
0x1961   :  { %2527 = vst.msk [vmem:[#allocation11 + $0xe] sm:$0x3] %vm2519_vm6, %v2518_v24 }
0x1962   :  { %2551 = dma.vmem_to_hbm [thread:$0]  %s2544_s24, 256, %s2546_s28, [#allocation12], %s2830_s17, %s2830_s17, %s2834_s7  }
0x19cf   :  { %v2373_v33 = vpop.xlane.xlu2 %2372 }
0x19d0   :  { %v2389_v31 = vperm.slane %v2373_v33, %v3655_v9  ;;  %v2410_v9 = vand.u32 2147483647, %v2333_v21 }
0x19d2   :  { %v2396_v63 = vsel %vm2326_vm11, %v2389_v31, %v2395_v39  ;;  %vm2411_vm15 = vcmp.eq.f32.partialorder %v2410_v9, 8.507059e+37 }
0x19d3   :  { %v2398_v16 = vsel %vm2329_vm12, %v2396_v63, 0.0  ;;  %v2414_v14 = vsel %vm2411_vm15, %v2413_v12, %v2409_v40 }
0x19d4   :  { %2399 = vadd.xlane.f32.xlu1 %v2398_v16 }
0x1a47   :  { %v2400_v13 = vpop.xlane.xlu1 %2399 }
0x1a48   :  { %v2415_v17 = vmul.f32 %v2414_v14, %v2400_v13 }
0x1a4a   :  { %v2417_v18 = vsel %vm2416_vm2, %v2415_v17, 0.0 }
0x1a4b   :  { %2418 = vadd.xlane.f32.xlu2 %v2417_v18 }
0x1abe   :  { %v2419_v11 = vpop.xlane.xlu2 %2418 }
0x1abf   :  { %v2420_v37 = vrot.slane %v2419_v11, 4 }
0x1ac1   :  { %v2421_v43 = vadd.f32 %v2420_v37, %v2419_v11 }
0x1ac3   :  { %v2422_v30 = vrot.slane %v2421_v43, 2 }
0x1ac5   :  { %v2423_v27 = vadd.f32 %v2422_v30, %v2421_v43 }
0x1ac7   :  { %v2424_v45 = vrot.slane %v2423_v27, 1 }
0x1ac9   :  { %v2425_v49 = vadd.f32 %v2424_v45, %v2423_v27 }
0x1acb   :  { %2659 = vpush %v2425_v49 }
0x1afc   :  { %s2660_s30 = spop %2659 }
0x1afd   :  { %v2427_v29 = vstv %s2660_s30 }
0x1afe   :  { %2430 = vst.msk [vmem:[#allocation9] sm:$0x1] %vm2429_vm4, %v2427_v29 }
0x1aff   :  { %2538 = dma.vmem_to_hbm [thread:$0]  %s2534_s19, 16, %s2536_s9, [#allocation10]  }
0x1b00   :  { %2825 = dma.done.wait [#allocation10], 16  }
0x1b01   :  { %2826 = vsyncadd [#allocation10], 4294967280 }
0x1b02   :  { %2827 = dma.done.wait [#allocation12], 256  }
0x1b03   :  { %2828 = vsyncadd [#allocation12], 4294967040 }
0x1b04   :  { %2560 = vsyncpa [#allocation10], 1 }
0x1b05   :  { %2561 = vsyncpa [#allocation12], 1 }

</bundles_post_ra>
